<compile_context>
chip_gen: v5e
topology: v5e:2x2
jax: 0.10.0
libtpu: 0.0.40
codegen_flags: <defaults>
</compile_context>

<pallas_src>
import math

import jax
import jax.numpy as jnp
from jax.experimental import pallas as pl
from jax.experimental.pallas import tpu as pltpu

# ----------------------------------------------------------------------------
# Config consistent with the module structure
# ----------------------------------------------------------------------------
NUM_LAYERS = 32          # model_model_forward hard-codes state.chunk(32, dim=0)
HIDDEN = 128             # hidden_size
NUM_HEADS = 2
HEAD_DIM = HIDDEN // NUM_HEADS      # 64
HD = NUM_HEADS * HEAD_DIM           # 128
INTER = 256              # MLP intermediate size
CHUNK = 8                # chunk_size (tokens per chunk / memory length)
VOCAB = 256
EPS = 1e-6
ROPE_BASE = 10000.0

MEM = CHUNK              # per-layer memory length (one state chunk)
SK_H = MEM + CHUNK       # keys seen by the hidden stream
SK_G = MEM + 2 * CHUNK   # keys seen by each gate stream
SCALE = 1.0 / math.sqrt(HEAD_DIM)
WDTYPE = jnp.bfloat16    # stored weight dtype (f32 accumulation in-kernel)


# ----------------------------------------------------------------------------
# In-kernel helpers (traced inside the fused kernel)
# ----------------------------------------------------------------------------
def _rot_half(x):
    """Per-head rotate_half on lane-concatenated heads: x [*, NUM_HEADS*HEAD_DIM]."""
    parts = []
    for h in range(NUM_HEADS):
        lo = h * HEAD_DIM
        x1 = x[:, lo:lo + HEAD_DIM // 2]
        x2 = x[:, lo + HEAD_DIM // 2:lo + HEAD_DIM]
        parts.append(-x2)
        parts.append(x1)
    return jnp.concatenate(parts, axis=-1)


def _sdpa(q, k, v, bias):
    """Multi-head SDPA on lane-concatenated heads.

    q: [C, HD]   k, v: [Sk, HD]   bias: [C, Sk]   ->   [C, HD] (lane-dense).
    """
    outs = []
    for h in range(NUM_HEADS):
        lo = h * HEAD_DIM
        qh = q[:, lo:lo + HEAD_DIM]
        kh = k[:, lo:lo + HEAD_DIM]
        vh = v[:, lo:lo + HEAD_DIM]
        s = jax.lax.dot_general(qh, kh, (((1,), (1,)), ((), ())),
                                preferred_element_type=jnp.float32)
        s = s * SCALE + bias
        m = jnp.max(s, axis=-1, keepdims=True)
        p = jnp.exp(s - m)
        r = pl.reciprocal(jnp.sum(p, axis=-1, keepdims=True), approx=True)
        outs.append(jnp.dot(p * r, vh, preferred_element_type=jnp.float32))
    return jnp.concatenate(outs, axis=-1)        # heads folded into lanes


# ----------------------------------------------------------------------------
# The fused per-layer kernel (grid = (NUM_LAYERS,), sequential / "arbitrary")
# ----------------------------------------------------------------------------
def fused_encoder_kernel(init_ref, mem_ref, cells_ref, cos_ref, sin_ref,
                         bias_h_ref, bias_g_ref, ln_ref, wqkv_ref, phkv_ref,
                         wo_ref, gwqkv_ref, wgu_ref, wdown_ref,
                         cells_out_ref, state_out_ref, carry_sc):
    C = CHUNK
    l = pl.program_id(0)

    # Layer 0: load the initial carried streams [h | i | f | o | g] into VMEM.
    @pl.when(l == 0)
    def _():
        carry_sc[...] = init_ref[...]

    carry = carry_sc[...]                         # [5C, H] f32
    ig = carry[C:2 * C]
    fg = carry[2 * C:3 * C]
    og = carry[3 * C:4 * C]
    gg = carry[4 * C:5 * C]

    # LSTM-style cell update uses the gate states *entering* this layer
    # (torch records states before each decoder layer).  Folded here so no
    # separate cell-update kernel / extra HBM round-trip is needed.
    c_new = jax.nn.sigmoid(ig) * jnp.tanh(gg) + jax.nn.sigmoid(fg) * cells_ref[0]
    cells_out_ref[0] = c_new
    state_out_ref[0] = jax.nn.sigmoid(og) * jnp.tanh(c_new)

    # ------------------------- attention block -------------------------
    ln_w = ln_ref[0]                              # [2, H] f32  (ln1 | ln2)

    def rmsnorm(x, w_row):
        var = jnp.mean(x * x, axis=-1, keepdims=True)
        return x * jax.lax.rsqrt(var + EPS) * w_row

    normed = rmsnorm(carry, ln_w[0:1])            # [5C, H]
    nh_ = normed[0:C]
    gate_in = (normed[C:2 * C], normed[2 * C:3 * C],
               normed[3 * C:4 * C], normed[4 * C:5 * C])

    cos = cos_ref[...]                            # [3C, HD] (per-head tiled)
    sin = sin_ref[...]

    def rope(x, lo, hi):
        return x * cos[lo:hi] + _rot_half(x) * sin[lo:hi]

    # ProjectHead on the per-layer memory: fused key|val projection.
    mem = mem_ref[0]                                                  # [MEM, H]
    mem_kv = jnp.dot(mem.astype(WDTYPE), phkv_ref[0],
                     preferred_element_type=jnp.float32)              # [MEM, 2HD]
    mem_k = mem_kv[:, 0:HD]
    mem_v = mem_kv[:, HD:2 * HD]

    # Hidden-stream q|k|v in one matmul.
    hqkv = jnp.dot(nh_.astype(WDTYPE), wqkv_ref[0],
                   preferred_element_type=jnp.float32)                # [C, 3HD]
    hq = hqkv[:, 0:HD]
    hk = hqkv[:, HD:2 * HD]
    hv = hqkv[:, 2 * HD:3 * HD]

    # TODO(synk): do_hidden_attn / do_gate_attn sources were not provided;
    # reconstructed as RoPE + causal attention with queries occupying the last
    # key positions (KV-cache convention), identical to the previous version.
    keys_base = rope(jnp.concatenate([mem_k, hk], axis=0), 0, SK_H)   # [2C, HD]
    vals_base = jnp.concatenate([mem_v, hv], axis=0)                  # [2C, HD]
    hq_r = rope(hq, MEM, SK_H)

    wo = wo_ref[0]
    bias_h = bias_h_ref[...]
    bias_g = bias_g_ref[...]

    attn_h = _sdpa(hq_r, keys_base, vals_base, bias_h)                # [C, HD]
    outs = [jnp.dot(attn_h.astype(WDTYPE), wo,
                    preferred_element_type=jnp.float32)]

    for s_idx in range(4):                        # i / f / o / g gate streams
        gqkv = jnp.dot(gate_in[s_idx].astype(WDTYPE), gwqkv_ref[0, s_idx],
                       preferred_element_type=jnp.float32)            # [C, 3HD]
        gq = rope(gqkv[:, 0:HD], SK_H, SK_G)
        gk = rope(gqkv[:, HD:2 * HD], SK_H, SK_G)
        gv = gqkv[:, 2 * HD:3 * HD]
        k_all = jnp.concatenate([keys_base, gk], axis=0)              # [3C, HD]
        v_all = jnp.concatenate([vals_base, gv], axis=0)
        g_attn = _sdpa(gq, k_all, v_all, bias_g)
        outs.append(jnp.dot(g_attn.astype(WDTYPE), wo,
                            preferred_element_type=jnp.float32))

    carry = carry + jnp.concatenate(outs, axis=0)                     # residual

    # ------------------------- SwiGLU MLP block -------------------------
    normed2 = rmsnorm(carry, ln_w[1:2])
    gu = jnp.dot(normed2.astype(WDTYPE), wgu_ref[0],
                 preferred_element_type=jnp.float32)                  # [5C, 2I]
    g = gu[:, 0:INTER]
    u = gu[:, INTER:2 * INTER]
    hmid = (g * jax.nn.sigmoid(g)) * u                                # SiLU(g)*u
    down = jnp.dot(hmid.astype(WDTYPE), wdown_ref[0],
                   preferred_element_type=jnp.float32)                # [5C, H]

    carry_sc[...] = carry + down                  # carried to the next layer


# ----------------------------------------------------------------------------
# JAX wrapper: hoisted RoPE / bias tables + the single fused pallas_call
# ----------------------------------------------------------------------------
def _rope_tables():
    pos = jnp.arange(SK_G, dtype=jnp.float32)
    inv_freq = 1.0 / (ROPE_BASE ** (jnp.arange(0, HEAD_DIM, 2, dtype=jnp.float32)
                                    / HEAD_DIM))
    freqs = pos[:, None] * inv_freq[None, :]
    emb = jnp.concatenate([freqs, freqs], axis=-1)          # [3C, HEAD_DIM]
    cos, sin = jnp.cos(emb), jnp.sin(emb)
    # tile over the lane-concatenated heads -> [3C, HD] (lane-dense)
    return (jnp.concatenate([cos] * NUM_HEADS, axis=-1),
            jnp.concatenate([sin] * NUM_HEADS, axis=-1))


def _causal_biases():
    kpos_h = jnp.arange(SK_H)
    qpos_h = jnp.arange(CHUNK) + MEM
    bias_h = jnp.where(qpos_h[:, None] >= kpos_h[None, :], 0.0, -1e30)
    kpos_g = jnp.arange(SK_G)
    qpos_g = jnp.arange(CHUNK) + SK_H
    bias_g = jnp.where(qpos_g[:, None] >= kpos_g[None, :], 0.0, -1e30)
    return bias_h.astype(jnp.float32), bias_g.astype(jnp.float32)


def encoder_forward(params, input_ids, cells, state, i_gate, f_gate, o_gate, g_gate):
    """Mirror of Encoder.forward / model_forward / model_model_forward."""
    L, C, H = NUM_LAYERS, CHUNK, HIDDEN
    embeds = jnp.take(params["embed"], input_ids[0], axis=0)           # [C, H]
    init_carry = jnp.concatenate(
        [embeds, i_gate[0], f_gate[0], o_gate[0], g_gate[0]], axis=0)  # [5C, H]

    cos_t, sin_t = _rope_tables()          # layer-invariant, hoisted
    bias_h, bias_g = _causal_biases()

    layer_idx3 = lambda l: (l, 0, 0)
    const2 = lambda l: (0, 0)

    grid_spec = pltpu.PrefetchScalarGridSpec(
        num_scalar_prefetch=0,
        grid=(L,),
        in_specs=[
            pl.BlockSpec((5 * C, H), const2),                       # init carry
            pl.BlockSpec((1, C, H), layer_idx3),                    # memory (state)
            pl.BlockSpec((1, C, H), layer_idx3),                    # cells
            pl.BlockSpec((SK_G, HD), const2),                       # cos
            pl.BlockSpec((SK_G, HD), const2),                       # sin
            pl.BlockSpec((C, SK_H), const2),                        # bias (hidden)
            pl.BlockSpec((C, SK_G), const2),                        # bias (gates)
            pl.BlockSpec((1, 2, H), layer_idx3),                    # ln1 | ln2
            pl.BlockSpec((1, H, 3 * HD), layer_idx3),               # wq|wk|wv
            pl.BlockSpec((1, H, 2 * HD), layer_idx3),               # ProjectHead k|v
            pl.BlockSpec((1, HD, H), layer_idx3),                   # wo
            pl.BlockSpec((1, 4, H, 3 * HD), lambda l: (l, 0, 0, 0)),  # gate q|k|v
            pl.BlockSpec((1, H, 2 * INTER), layer_idx3),            # mlp gate|up
            pl.BlockSpec((1, INTER, H), layer_idx3),                # mlp down
        ],
        out_specs=[
            pl.BlockSpec((1, C, H), layer_idx3),                    # new cells
            pl.BlockSpec((1, C, H), layer_idx3),                    # new state
        ],
        scratch_shapes=[pltpu.VMEM((5 * C, H), jnp.float32)],       # carried streams
    )

    cells_new, state_new = pl.pallas_call(
        fused_encoder_kernel,
        grid_spec=grid_spec,
        out_shape=(jax.ShapeDtypeStruct((L, C, H), jnp.float32),
                   jax.ShapeDtypeStruct((L, C, H), jnp.float32)),
        # The layer axis carries state in VMEM scratch -> strictly sequential.
        compiler_params=pltpu.CompilerParams(dimension_semantics=("arbitrary",)),
    )(init_carry, state, cells, cos_t, sin_t, bias_h, bias_g,
      params["ln"], params["wqkv"], params["ph_kv"], params["wo"],
      params["gate_wqkv"], params["w_gu"], params["w_down"])
    return cells_new, state_new


# ----------------------------------------------------------------------------
# Deterministic parameter init (weights in bf16, fused along N where possible)
# ----------------------------------------------------------------------------
def init_params(key):
    def nrm(k, shape, scale=0.02, dtype=jnp.float32):
        return (jax.random.normal(k, shape, dtype=jnp.float32) * scale).astype(dtype)

    ks = jax.random.split(key, 8)
    L, H, I = NUM_LAYERS, HIDDEN, INTER
    return {
        "embed":     nrm(ks[0], (VOCAB, H)),
        "ln":        jnp.ones((L, 2, H), jnp.float32),             # ln1 | ln2
        "wqkv":      nrm(ks[1], (L, H, 3 * HD), dtype=WDTYPE),     # q|k|v fused
        "ph_kv":     nrm(ks[2], (L, H, 2 * HD), dtype=WDTYPE),     # ProjectHead k|v
        "wo":        nrm(ks[3], (L, HD, H), dtype=WDTYPE),
        "gate_wqkv": nrm(ks[4], (L, 4, H, 3 * HD), dtype=WDTYPE),  # i/f/o/g q|k|v
        "w_gu":      nrm(ks[5], (L, H, 2 * I), dtype=WDTYPE),      # mlp gate|up
        "w_down":    nrm(ks[6], (L, I, H), dtype=WDTYPE),
    }


# ----------------------------------------------------------------------------
# Main
# ----------------------------------------------------------------------------
if __name__ == "__main__":
    root = jax.random.PRNGKey(0)
    k_params, k_ids, k_cells, k_state, k_i, k_f, k_o, k_g = jax.random.split(root, 8)

    params = init_params(k_params)

    input_ids = jax.random.randint(k_ids, (1, CHUNK), 0, VOCAB, dtype=jnp.int32)
    cells = jax.random.normal(k_cells, (NUM_LAYERS, CHUNK, HIDDEN), jnp.float32) * 0.1
    state = jax.random.normal(k_state, (NUM_LAYERS, CHUNK, HIDDEN), jnp.float32) * 0.1
    i_gate = jax.random.normal(k_i, (1, CHUNK, HIDDEN), jnp.float32) * 0.1
    f_gate = jax.random.normal(k_f, (1, CHUNK, HIDDEN), jnp.float32) * 0.1
    o_gate = jax.random.normal(k_o, (1, CHUNK, HIDDEN), jnp.float32) * 0.1
    g_gate = jax.random.normal(k_g, (1, CHUNK, HIDDEN), jnp.float32) * 0.1

    # Encoder.forward asserts
    assert cells.ndim == 3 and cells.shape[0] == 32
    assert state.ndim == 3 and state.shape[0] == 32

    fwd = jax.jit(encoder_forward)
    cells_new, state_new = fwd(
        params, input_ids, cells, state, i_gate, f_gate, o_gate, g_gate
    )
    jax.block_until_ready((cells_new, state_new))

    assert cells_new.shape == (32, CHUNK, HIDDEN)
    assert state_new.shape == (32, CHUNK, HIDDEN)
    assert bool(jnp.isfinite(cells_new).all()) and bool(jnp.isfinite(state_new).all())
    print("KERNEL_OK")
</pallas_src>

<mosaic_0001>
module attributes {stable_mosaic.version = 11 : i64} {
  func.func @fused_encoder_kernel(%arg0: i32, %arg1: memref<40x128xf32, #tpu.memory_space<vmem>>, %arg2: memref<1x8x128xf32, #tpu.memory_space<vmem>>, %arg3: memref<1x8x128xf32, #tpu.memory_space<vmem>>, %arg4: memref<24x128xf32, #tpu.memory_space<vmem>>, %arg5: memref<24x128xf32, #tpu.memory_space<vmem>>, %arg6: memref<8x16xf32, #tpu.memory_space<vmem>>, %arg7: memref<8x24xf32, #tpu.memory_space<vmem>>, %arg8: memref<1x2x128xf32, #tpu.memory_space<vmem>>, %arg9: memref<1x128x384xbf16, #tpu.memory_space<vmem>>, %arg10: memref<1x128x256xbf16, #tpu.memory_space<vmem>>, %arg11: memref<1x128x128xbf16, #tpu.memory_space<vmem>>, %arg12: memref<1x4x128x384xbf16, #tpu.memory_space<vmem>>, %arg13: memref<1x128x512xbf16, #tpu.memory_space<vmem>>, %arg14: memref<1x256x128xbf16, #tpu.memory_space<vmem>>, %arg15: memref<1x8x128xf32, #tpu.memory_space<vmem>>, %arg16: memref<1x8x128xf32, #tpu.memory_space<vmem>>, %arg17: memref<40x128xf32, #tpu.memory_space<vmem>>) attributes {dimension_semantics = [#tpu.dimension_semantics<arbitrary>], iteration_bounds = array<i64: 32>, scalar_prefetch = 0 : i64, scratch_operands = 1 : i64, tpu.core_type = #tpu.core_type<tc>, window_params = [{pipeline_mode = #tpu.pipeline_mode<synchronous>, transform_indices = @transform_0, window_bounds = array<i64: 40, 128>}, {transform_indices = @transform_1, window_bounds = array<i64: 1, 8, 128>}, {transform_indices = @transform_2, window_bounds = array<i64: 1, 8, 128>}, {pipeline_mode = #tpu.pipeline_mode<synchronous>, transform_indices = @transform_3, window_bounds = array<i64: 24, 128>}, {pipeline_mode = #tpu.pipeline_mode<synchronous>, transform_indices = @transform_4, window_bounds = array<i64: 24, 128>}, {pipeline_mode = #tpu.pipeline_mode<synchronous>, transform_indices = @transform_5, window_bounds = array<i64: 8, 16>}, {pipeline_mode = #tpu.pipeline_mode<synchronous>, transform_indices = @transform_6, window_bounds = array<i64: 8, 24>}, {transform_indices = @transform_7, window_bounds = array<i64: 1, 2, 128>}, {transform_indices = @transform_8, window_bounds = array<i64: 1, 128, 384>}, {transform_indices = @transform_9, window_bounds = array<i64: 1, 128, 256>}, {transform_indices = @transform_10, window_bounds = array<i64: 1, 128, 128>}, {transform_indices = @transform_11, window_bounds = array<i64: 1, 4, 128, 384>}, {transform_indices = @transform_12, window_bounds = array<i64: 1, 128, 512>}, {transform_indices = @transform_13, window_bounds = array<i64: 1, 256, 128>}, {transform_indices = @transform_14, window_bounds = array<i64: 1, 8, 128>}, {transform_indices = @transform_15, window_bounds = array<i64: 1, 8, 128>}]} {
    %c0_i32 = arith.constant 0 : i32
    %0 = arith.cmpi eq, %arg0, %c0_i32 : i32
    %1 = arith.extui %0 : i1 to i32
    %c0_i32_0 = arith.constant 0 : i32
    %2 = arith.cmpi ne, %1, %c0_i32_0 : i32
    scf.if %2 {
      %c0_147 = arith.constant 0 : index
      %c0_148 = arith.constant 0 : index
      %485 = vector.load %arg1[%c0_147, %c0_148] : memref<40x128xf32, #tpu.memory_space<vmem>>, vector<40x128xf32>
      %c0_149 = arith.constant 0 : index
      %c0_150 = arith.constant 0 : index
      %486 = vector.load %arg17[%c0_149, %c0_150] : memref<40x128xf32, #tpu.memory_space<vmem>>, vector<40x128xf32>
      tpu.vector_store %arg17[%c0_149, %c0_150], %485 {strides = array<i32>} : memref<40x128xf32, #tpu.memory_space<vmem>>, vector<40x128xf32>,
    } else {
    }
    %c0 = arith.constant 0 : index
    %c0_1 = arith.constant 0 : index
    %3 = vector.load %arg17[%c0, %c0_1] : memref<40x128xf32, #tpu.memory_space<vmem>>, vector<40x128xf32>
    %4 = vector.extract_strided_slice %3 {offsets = [8, 0], sizes = [8, 128], strides = [1, 1]} : vector<40x128xf32> to vector<8x128xf32>
    %5 = vector.extract_strided_slice %3 {offsets = [16, 0], sizes = [8, 128], strides = [1, 1]} : vector<40x128xf32> to vector<8x128xf32>
    %6 = vector.extract_strided_slice %3 {offsets = [24, 0], sizes = [8, 128], strides = [1, 1]} : vector<40x128xf32> to vector<8x128xf32>
    %7 = vector.extract_strided_slice %3 {offsets = [32, 0], sizes = [8, 128], strides = [1, 1]} : vector<40x128xf32> to vector<8x128xf32>
    %8 = arith.negf %4 : vector<8x128xf32>
    %9 = math.exp %8 : vector<8x128xf32>
    %cst = arith.constant 1.000000e+00 : f32
    %10 = vector.broadcast %cst : f32 to vector<8x128xf32>
    %11 = arith.addf %10, %9 : vector<8x128xf32>
    %12 = arith.divf %10, %11 : vector<8x128xf32>
    %13 = math.tanh %7 : vector<8x128xf32>
    %14 = arith.mulf %12, %13 : vector<8x128xf32>
    %15 = arith.negf %5 : vector<8x128xf32>
    %16 = math.exp %15 : vector<8x128xf32>
    %cst_2 = arith.constant 1.000000e+00 : f32
    %17 = vector.broadcast %cst_2 : f32 to vector<8x128xf32>
    %18 = arith.addf %17, %16 : vector<8x128xf32>
    %19 = arith.divf %17, %18 : vector<8x128xf32>
    %c0_3 = arith.constant 0 : index
    %c0_4 = arith.constant 0 : index
    %c0_5 = arith.constant 0 : index
    %20 = vector.load %arg3[%c0_3, %c0_4, %c0_5] : memref<1x8x128xf32, #tpu.memory_space<vmem>>, vector<1x8x128xf32>
    %21 = vector.shape_cast %20 : vector<1x8x128xf32> to vector<8x128xf32>
    %22 = arith.mulf %19, %21 : vector<8x128xf32>
    %23 = arith.addf %14, %22 : vector<8x128xf32>
    %c0_6 = arith.constant 0 : index
    %c0_7 = arith.constant 0 : index
    %c0_8 = arith.constant 0 : index
    %24 = vector.load %arg15[%c0_6, %c0_7, %c0_8] : memref<1x8x128xf32, #tpu.memory_space<vmem>>, vector<1x8x128xf32>
    %25 = vector.shape_cast %24 : vector<1x8x128xf32> to vector<8x128xf32>
    %26 = vector.shape_cast %23 : vector<8x128xf32> to vector<1x8x128xf32>
    tpu.vector_store %arg15[%c0_6, %c0_7, %c0_8], %26 {strides = array<i32>} : memref<1x8x128xf32, #tpu.memory_space<vmem>>, vector<1x8x128xf32>,
    %27 = arith.negf %6 : vector<8x128xf32>
    %28 = math.exp %27 : vector<8x128xf32>
    %cst_9 = arith.constant 1.000000e+00 : f32
    %29 = vector.broadcast %cst_9 : f32 to vector<8x128xf32>
    %30 = arith.addf %29, %28 : vector<8x128xf32>
    %31 = arith.divf %29, %30 : vector<8x128xf32>
    %32 = math.tanh %23 : vector<8x128xf32>
    %33 = arith.mulf %31, %32 : vector<8x128xf32>
    %c0_10 = arith.constant 0 : index
    %c0_11 = arith.constant 0 : index
    %c0_12 = arith.constant 0 : index
    %34 = vector.load %arg16[%c0_10, %c0_11, %c0_12] : memref<1x8x128xf32, #tpu.memory_space<vmem>>, vector<1x8x128xf32>
    %35 = vector.shape_cast %34 : vector<1x8x128xf32> to vector<8x128xf32>
    %36 = vector.shape_cast %33 : vector<8x128xf32> to vector<1x8x128xf32>
    tpu.vector_store %arg16[%c0_10, %c0_11, %c0_12], %36 {strides = array<i32>} : memref<1x8x128xf32, #tpu.memory_space<vmem>>, vector<1x8x128xf32>,
    %c0_13 = arith.constant 0 : index
    %c0_14 = arith.constant 0 : index
    %c0_15 = arith.constant 0 : index
    %37 = vector.load %arg8[%c0_13, %c0_14, %c0_15] : memref<1x2x128xf32, #tpu.memory_space<vmem>>, vector<1x2x128xf32>
    %38 = vector.shape_cast %37 : vector<1x2x128xf32> to vector<2x128xf32>
    %39 = vector.extract_strided_slice %38 {offsets = [0, 0], sizes = [1, 128], strides = [1, 1]} : vector<2x128xf32> to vector<1x128xf32>
    %40 = arith.mulf %3, %3 : vector<40x128xf32>
    %cst_16 = arith.constant dense<0.000000e+00> : vector<40xf32>
    %41 = vector.multi_reduction <add>, %40, %cst_16 [1] : vector<40x128xf32> to vector<40xf32>
    %42 = vector.shape_cast %41 : vector<40xf32> to vector<40x1xf32>
    %cst_17 = arith.constant 1.280000e+02 : f32
    %43 = vector.broadcast %cst_17 : f32 to vector<40x1xf32>
    %44 = arith.divf %42, %43 : vector<40x1xf32>
    %cst_18 = arith.constant 9.99999997E-7 : f32
    %45 = vector.broadcast %cst_18 : f32 to vector<40x1xf32>
    %46 = arith.addf %44, %45 : vector<40x1xf32>
    %47 = math.rsqrt %46 : vector<40x1xf32>
    %48 = vector.broadcast %47 : vector<40x1xf32> to vector<40x128xf32>
    %49 = arith.mulf %3, %48 : vector<40x128xf32>
    %50 = vector.broadcast %39 : vector<1x128xf32> to vector<40x128xf32>
    %51 = arith.mulf %49, %50 : vector<40x128xf32>
    %52 = vector.extract_strided_slice %51 {offsets = [0, 0], sizes = [8, 128], strides = [1, 1]} : vector<40x128xf32> to vector<8x128xf32>
    %53 = vector.extract_strided_slice %51 {offsets = [8, 0], sizes = [8, 128], strides = [1, 1]} : vector<40x128xf32> to vector<8x128xf32>
    %54 = vector.extract_strided_slice %51 {offsets = [16, 0], sizes = [8, 128], strides = [1, 1]} : vector<40x128xf32> to vector<8x128xf32>
    %55 = vector.extract_strided_slice %51 {offsets = [24, 0], sizes = [8, 128], strides = [1, 1]} : vector<40x128xf32> to vector<8x128xf32>
    %56 = vector.extract_strided_slice %51 {offsets = [32, 0], sizes = [8, 128], strides = [1, 1]} : vector<40x128xf32> to vector<8x128xf32>
    %c0_19 = arith.constant 0 : index
    %c0_20 = arith.constant 0 : index
    %57 = vector.load %arg4[%c0_19, %c0_20] : memref<24x128xf32, #tpu.memory_space<vmem>>, vector<24x128xf32>
    %c0_21 = arith.constant 0 : index
    %c0_22 = arith.constant 0 : index
    %58 = vector.load %arg5[%c0_21, %c0_22] : memref<24x128xf32, #tpu.memory_space<vmem>>, vector<24x128xf32>
    %c0_23 = arith.constant 0 : index
    %c0_24 = arith.constant 0 : index
    %c0_25 = arith.constant 0 : index
    %59 = vector.load %arg2[%c0_23, %c0_24, %c0_25] : memref<1x8x128xf32, #tpu.memory_space<vmem>>, vector<1x8x128xf32>
    %60 = vector.shape_cast %59 : vector<1x8x128xf32> to vector<8x128xf32>
    %61 = arith.truncf %60 : vector<8x128xf32> to vector<8x128xbf16>
    %c0_26 = arith.constant 0 : index
    %c0_27 = arith.constant 0 : index
    %c0_28 = arith.constant 0 : index
    %62 = vector.load %arg10[%c0_26, %c0_27, %c0_28] : memref<1x128x256xbf16, #tpu.memory_space<vmem>>, vector<1x128x256xbf16>
    %63 = vector.shape_cast %62 : vector<1x128x256xbf16> to vector<128x256xbf16>
    %cst_29 = arith.constant dense<0.000000e+00> : vector<8x256xf32>
    %64 = tpu.matmul %61, %63, %cst_29 {dimension_numbers = #tpu.dot_dimension_numbers<[1], [0], [0], [1], [0, 0, 1, 1], [], []>} : vector<8x128xbf16>, vector<128x256xbf16>, vector<8x256xf32> -> vector<8x256xf32>
    %65 = vector.extract_strided_slice %64 {offsets = [0, 0], sizes = [8, 128], strides = [1, 1]} : vector<8x256xf32> to vector<8x128xf32>
    %66 = vector.extract_strided_slice %64 {offsets = [0, 128], sizes = [8, 128], strides = [1, 1]} : vector<8x256xf32> to vector<8x128xf32>
    %67 = arith.truncf %52 : vector<8x128xf32> to vector<8x128xbf16>
    %c0_30 = arith.constant 0 : index
    %c0_31 = arith.constant 0 : index
    %c0_32 = arith.constant 0 : index
    %68 = vector.load %arg9[%c0_30, %c0_31, %c0_32] : memref<1x128x384xbf16, #tpu.memory_space<vmem>>, vector<1x128x384xbf16>
    %69 = vector.shape_cast %68 : vector<1x128x384xbf16> to vector<128x384xbf16>
    %cst_33 = arith.constant dense<0.000000e+00> : vector<8x384xf32>
    %70 = tpu.matmul %67, %69, %cst_33 {dimension_numbers = #tpu.dot_dimension_numbers<[1], [0], [0], [1], [0, 0, 1, 1], [], []>} : vector<8x128xbf16>, vector<128x384xbf16>, vector<8x384xf32> -> vector<8x384xf32>
    %71 = vector.extract_strided_slice %70 {offsets = [0, 0], sizes = [8, 128], strides = [1, 1]} : vector<8x384xf32> to vector<8x128xf32>
    %72 = vector.extract_strided_slice %70 {offsets = [0, 128], sizes = [8, 128], strides = [1, 1]} : vector<8x384xf32> to vector<8x128xf32>
    %73 = vector.extract_strided_slice %70 {offsets = [0, 256], sizes = [8, 128], strides = [1, 1]} : vector<8x384xf32> to vector<8x128xf32>
    %74 = tpu.concatenate %65, %72 in 0 : vector<8x128xf32>, vector<8x128xf32> -> vector<16x128xf32>
    %75 = vector.extract_strided_slice %57 {offsets = [0, 0], sizes = [16, 128], strides = [1, 1]} : vector<24x128xf32> to vector<16x128xf32>
    %76 = arith.mulf %74, %75 : vector<16x128xf32>
    %77 = vector.extract_strided_slice %74 {offsets = [0, 0], sizes = [16, 32], strides = [1, 1]} : vector<16x128xf32> to vector<16x32xf32>
    %78 = vector.extract_strided_slice %74 {offsets = [0, 32], sizes = [16, 32], strides = [1, 1]} : vector<16x128xf32> to vector<16x32xf32>
    %cst_34 = arith.constant 0.000000e+00 : f32
    %79 = vector.broadcast %cst_34 : f32 to vector<16x32xf32>
    %80 = arith.subf %79, %78 : vector<16x32xf32>
    %81 = vector.extract_strided_slice %74 {offsets = [0, 64], sizes = [16, 32], strides = [1, 1]} : vector<16x128xf32> to vector<16x32xf32>
    %82 = vector.extract_strided_slice %74 {offsets = [0, 96], sizes = [16, 32], strides = [1, 1]} : vector<16x128xf32> to vector<16x32xf32>
    %cst_35 = arith.constant 0.000000e+00 : f32
    %83 = vector.broadcast %cst_35 : f32 to vector<16x32xf32>
    %84 = arith.subf %83, %82 : vector<16x32xf32>
    %85 = tpu.concatenate %80, %77, %84, %81 in 1 : vector<16x32xf32>, vector<16x32xf32>, vector<16x32xf32>, vector<16x32xf32> -> vector<16x128xf32>
    %86 = vector.extract_strided_slice %58 {offsets = [0, 0], sizes = [16, 128], strides = [1, 1]} : vector<24x128xf32> to vector<16x128xf32>
    %87 = arith.mulf %85, %86 : vector<16x128xf32>
    %88 = arith.addf %76, %87 : vector<16x128xf32>
    %89 = tpu.concatenate %66, %73 in 0 : vector<8x128xf32>, vector<8x128xf32> -> vector<16x128xf32>
    %90 = vector.extract_strided_slice %57 {offsets = [8, 0], sizes = [8, 128], strides = [1, 1]} : vector<24x128xf32> to vector<8x128xf32>
    %91 = arith.mulf %71, %90 : vector<8x128xf32>
    %92 = vector.extract_strided_slice %71 {offsets = [0, 0], sizes = [8, 32], strides = [1, 1]} : vector<8x128xf32> to vector<8x32xf32>
    %93 = vector.extract_strided_slice %71 {offsets = [0, 32], sizes = [8, 32], strides = [1, 1]} : vector<8x128xf32> to vector<8x32xf32>
    %cst_36 = arith.constant 0.000000e+00 : f32
    %94 = vector.broadcast %cst_36 : f32 to vector<8x32xf32>
    %95 = arith.subf %94, %93 : vector<8x32xf32>
    %96 = vector.extract_strided_slice %71 {offsets = [0, 64], sizes = [8, 32], strides = [1, 1]} : vector<8x128xf32> to vector<8x32xf32>
    %97 = vector.extract_strided_slice %71 {offsets = [0, 96], sizes = [8, 32], strides = [1, 1]} : vector<8x128xf32> to vector<8x32xf32>
    %cst_37 = arith.constant 0.000000e+00 : f32
    %98 = vector.broadcast %cst_37 : f32 to vector<8x32xf32>
    %99 = arith.subf %98, %97 : vector<8x32xf32>
    %100 = tpu.concatenate %95, %92, %99, %96 in 1 : vector<8x32xf32>, vector<8x32xf32>, vector<8x32xf32>, vector<8x32xf32> -> vector<8x128xf32>
    %101 = vector.extract_strided_slice %58 {offsets = [8, 0], sizes = [8, 128], strides = [1, 1]} : vector<24x128xf32> to vector<8x128xf32>
    %102 = arith.mulf %100, %101 : vector<8x128xf32>
    %103 = arith.addf %91, %102 : vector<8x128xf32>
    %c0_38 = arith.constant 0 : index
    %c0_39 = arith.constant 0 : index
    %c0_40 = arith.constant 0 : index
    %104 = vector.load %arg11[%c0_38, %c0_39, %c0_40] : memref<1x128x128xbf16, #tpu.memory_space<vmem>>, vector<1x128x128xbf16>
    %105 = vector.shape_cast %104 : vector<1x128x128xbf16> to vector<128x128xbf16>
    %c0_41 = arith.constant 0 : index
    %c0_42 = arith.constant 0 : index
    %106 = vector.load %arg6[%c0_41, %c0_42] : memref<8x16xf32, #tpu.memory_space<vmem>>, vector<8x16xf32>
    %c0_43 = arith.constant 0 : index
    %c0_44 = arith.constant 0 : index
    %107 = vector.load %arg7[%c0_43, %c0_44] : memref<8x24xf32, #tpu.memory_space<vmem>>, vector<8x24xf32>
    %108 = vector.extract_strided_slice %103 {offsets = [0, 0], sizes = [8, 64], strides = [1, 1]} : vector<8x128xf32> to vector<8x64xf32>
    %109 = vector.extract_strided_slice %88 {offsets = [0, 0], sizes = [16, 64], strides = [1, 1]} : vector<16x128xf32> to vector<16x64xf32>
    %110 = vector.extract_strided_slice %89 {offsets = [0, 0], sizes = [16, 64], strides = [1, 1]} : vector<16x128xf32> to vector<16x64xf32>
    %cst_45 = arith.constant dense<0.000000e+00> : vector<8x16xf32>
    %111 = tpu.matmul %108, %109, %cst_45 {dimension_numbers = #tpu.dot_dimension_numbers<[1], [1], [0], [0], [0, 0, 1, 0], [], []>} : vector<8x64xf32>, vector<16x64xf32>, vector<8x16xf32> -> vector<8x16xf32>
    %cst_46 = arith.constant 1.250000e-01 : f32
    %112 = vector.broadcast %cst_46 : f32 to vector<8x16xf32>
    %113 = arith.mulf %111, %112 : vector<8x16xf32>
    %114 = arith.addf %113, %106 : vector<8x16xf32>
    %cst_47 = arith.constant dense<0xFF800000> : vector<8xf32>
    %115 = vector.multi_reduction <maximumf>, %114, %cst_47 [1] : vector<8x16xf32> to vector<8xf32>
    %116 = vector.shape_cast %115 : vector<8xf32> to vector<8x1xf32>
    %117 = vector.broadcast %116 : vector<8x1xf32> to vector<8x16xf32>
    %118 = arith.subf %114, %117 : vector<8x16xf32>
    %119 = math.exp %118 : vector<8x16xf32>
    %cst_48 = arith.constant dense<0.000000e+00> : vector<8xf32>
    %120 = vector.multi_reduction <add>, %119, %cst_48 [1] : vector<8x16xf32> to vector<8xf32>
    %121 = vector.shape_cast %120 : vector<8xf32> to vector<8x1xf32>
    %122 = tpu.reciprocal %121 {approx = true} : vector<8x1xf32> -> vector<8x1xf32>
    %123 = vector.broadcast %122 : vector<8x1xf32> to vector<8x16xf32>
    %124 = arith.mulf %119, %123 : vector<8x16xf32>
    %cst_49 = arith.constant dense<0.000000e+00> : vector<8x64xf32>
    %125 = tpu.matmul %124, %110, %cst_49 {dimension_numbers = #tpu.dot_dimension_numbers<[1], [0], [0], [1], [0, 0, 1, 1], [], []>} : vector<8x16xf32>, vector<16x64xf32>, vector<8x64xf32> -> vector<8x64xf32>
    %126 = vector.extract_strided_slice %103 {offsets = [0, 64], sizes = [8, 64], strides = [1, 1]} : vector<8x128xf32> to vector<8x64xf32>
    %127 = vector.extract_strided_slice %88 {offsets = [0, 64], sizes = [16, 64], strides = [1, 1]} : vector<16x128xf32> to vector<16x64xf32>
    %128 = vector.extract_strided_slice %89 {offsets = [0, 64], sizes = [16, 64], strides = [1, 1]} : vector<16x128xf32> to vector<16x64xf32>
    %cst_50 = arith.constant dense<0.000000e+00> : vector<8x16xf32>
    %129 = tpu.matmul %126, %127, %cst_50 {dimension_numbers = #tpu.dot_dimension_numbers<[1], [1], [0], [0], [0, 0, 1, 0], [], []>} : vector<8x64xf32>, vector<16x64xf32>, vector<8x16xf32> -> vector<8x16xf32>
    %cst_51 = arith.constant 1.250000e-01 : f32
    %130 = vector.broadcast %cst_51 : f32 to vector<8x16xf32>
    %131 = arith.mulf %129, %130 : vector<8x16xf32>
    %132 = arith.addf %131, %106 : vector<8x16xf32>
    %cst_52 = arith.constant dense<0xFF800000> : vector<8xf32>
    %133 = vector.multi_reduction <maximumf>, %132, %cst_52 [1] : vector<8x16xf32> to vector<8xf32>
    %134 = vector.shape_cast %133 : vector<8xf32> to vector<8x1xf32>
    %135 = vector.broadcast %134 : vector<8x1xf32> to vector<8x16xf32>
    %136 = arith.subf %132, %135 : vector<8x16xf32>
    %137 = math.exp %136 : vector<8x16xf32>
    %cst_53 = arith.constant dense<0.000000e+00> : vector<8xf32>
    %138 = vector.multi_reduction <add>, %137, %cst_53 [1] : vector<8x16xf32> to vector<8xf32>
    %139 = vector.shape_cast %138 : vector<8xf32> to vector<8x1xf32>
    %140 = tpu.reciprocal %139 {approx = true} : vector<8x1xf32> -> vector<8x1xf32>
    %141 = vector.broadcast %140 : vector<8x1xf32> to vector<8x16xf32>
    %142 = arith.mulf %137, %141 : vector<8x16xf32>
    %cst_54 = arith.constant dense<0.000000e+00> : vector<8x64xf32>
    %143 = tpu.matmul %142, %128, %cst_54 {dimension_numbers = #tpu.dot_dimension_numbers<[1], [0], [0], [1], [0, 0, 1, 1], [], []>} : vector<8x16xf32>, vector<16x64xf32>, vector<8x64xf32> -> vector<8x64xf32>
    %144 = tpu.concatenate %125, %143 in 1 : vector<8x64xf32>, vector<8x64xf32> -> vector<8x128xf32>
    %145 = arith.truncf %144 : vector<8x128xf32> to vector<8x128xbf16>
    %cst_55 = arith.constant dense<0.000000e+00> : vector<8x128xf32>
    %146 = tpu.matmul %145, %105, %cst_55 {dimension_numbers = #tpu.dot_dimension_numbers<[1], [0], [0], [1], [0, 0, 1, 1], [], []>} : vector<8x128xbf16>, vector<128x128xbf16>, vector<8x128xf32> -> vector<8x128xf32>
    %147 = arith.truncf %53 : vector<8x128xf32> to vector<8x128xbf16>
    %c0_56 = arith.constant 0 : index
    %c0_57 = arith.constant 0 : index
    %c0_58 = arith.constant 0 : index
    %c0_59 = arith.constant 0 : index
    %148 = vector.load %arg12[%c0_56, %c0_57, %c0_58, %c0_59] : memref<1x4x128x384xbf16, #tpu.memory_space<vmem>>, vector<1x1x128x384xbf16>
    %149 = vector.shape_cast %148 : vector<1x1x128x384xbf16> to vector<128x384xbf16>
    %cst_60 = arith.constant dense<0.000000e+00> : vector<8x384xf32>
    %150 = tpu.matmul %147, %149, %cst_60 {dimension_numbers = #tpu.dot_dimension_numbers<[1], [0], [0], [1], [0, 0, 1, 1], [], []>} : vector<8x128xbf16>, vector<128x384xbf16>, vector<8x384xf32> -> vector<8x384xf32>
    %151 = vector.extract_strided_slice %150 {offsets = [0, 0], sizes = [8, 128], strides = [1, 1]} : vector<8x384xf32> to vector<8x128xf32>
    %152 = vector.extract_strided_slice %57 {offsets = [16, 0], sizes = [8, 128], strides = [1, 1]} : vector<24x128xf32> to vector<8x128xf32>
    %153 = arith.mulf %151, %152 : vector<8x128xf32>
    %154 = vector.extract_strided_slice %151 {offsets = [0, 0], sizes = [8, 32], strides = [1, 1]} : vector<8x128xf32> to vector<8x32xf32>
    %155 = vector.extract_strided_slice %151 {offsets = [0, 32], sizes = [8, 32], strides = [1, 1]} : vector<8x128xf32> to vector<8x32xf32>
    %cst_61 = arith.constant 0.000000e+00 : f32
    %156 = vector.broadcast %cst_61 : f32 to vector<8x32xf32>
    %157 = arith.subf %156, %155 : vector<8x32xf32>
    %158 = vector.extract_strided_slice %151 {offsets = [0, 64], sizes = [8, 32], strides = [1, 1]} : vector<8x128xf32> to vector<8x32xf32>
    %159 = vector.extract_strided_slice %151 {offsets = [0, 96], sizes = [8, 32], strides = [1, 1]} : vector<8x128xf32> to vector<8x32xf32>
    %cst_62 = arith.constant 0.000000e+00 : f32
    %160 = vector.broadcast %cst_62 : f32 to vector<8x32xf32>
    %161 = arith.subf %160, %159 : vector<8x32xf32>
    %162 = tpu.concatenate %157, %154, %161, %158 in 1 : vector<8x32xf32>, vector<8x32xf32>, vector<8x32xf32>, vector<8x32xf32> -> vector<8x128xf32>
    %163 = vector.extract_strided_slice %58 {offsets = [16, 0], sizes = [8, 128], strides = [1, 1]} : vector<24x128xf32> to vector<8x128xf32>
    %164 = arith.mulf %162, %163 : vector<8x128xf32>
    %165 = arith.addf %153, %164 : vector<8x128xf32>
    %166 = vector.extract_strided_slice %150 {offsets = [0, 128], sizes = [8, 128], strides = [1, 1]} : vector<8x384xf32> to vector<8x128xf32>
    %167 = vector.extract_strided_slice %57 {offsets = [16, 0], sizes = [8, 128], strides = [1, 1]} : vector<24x128xf32> to vector<8x128xf32>
    %168 = arith.mulf %166, %167 : vector<8x128xf32>
    %169 = vector.extract_strided_slice %166 {offsets = [0, 0], sizes = [8, 32], strides = [1, 1]} : vector<8x128xf32> to vector<8x32xf32>
    %170 = vector.extract_strided_slice %166 {offsets = [0, 32], sizes = [8, 32], strides = [1, 1]} : vector<8x128xf32> to vector<8x32xf32>
    %cst_63 = arith.constant 0.000000e+00 : f32
    %171 = vector.broadcast %cst_63 : f32 to vector<8x32xf32>
    %172 = arith.subf %171, %170 : vector<8x32xf32>
    %173 = vector.extract_strided_slice %166 {offsets = [0, 64], sizes = [8, 32], strides = [1, 1]} : vector<8x128xf32> to vector<8x32xf32>
    %174 = vector.extract_strided_slice %166 {offsets = [0, 96], sizes = [8, 32], strides = [1, 1]} : vector<8x128xf32> to vector<8x32xf32>
    %cst_64 = arith.constant 0.000000e+00 : f32
    %175 = vector.broadcast %cst_64 : f32 to vector<8x32xf32>
    %176 = arith.subf %175, %174 : vector<8x32xf32>
    %177 = tpu.concatenate %172, %169, %176, %173 in 1 : vector<8x32xf32>, vector<8x32xf32>, vector<8x32xf32>, vector<8x32xf32> -> vector<8x128xf32>
    %178 = vector.extract_strided_slice %58 {offsets = [16, 0], sizes = [8, 128], strides = [1, 1]} : vector<24x128xf32> to vector<8x128xf32>
    %179 = arith.mulf %177, %178 : vector<8x128xf32>
    %180 = arith.addf %168, %179 : vector<8x128xf32>
    %181 = vector.extract_strided_slice %150 {offsets = [0, 256], sizes = [8, 128], strides = [1, 1]} : vector<8x384xf32> to vector<8x128xf32>
    %182 = tpu.concatenate %88, %180 in 0 : vector<16x128xf32>, vector<8x128xf32> -> vector<24x128xf32>
    %183 = tpu.concatenate %89, %181 in 0 : vector<16x128xf32>, vector<8x128xf32> -> vector<24x128xf32>
    %184 = vector.extract_strided_slice %165 {offsets = [0, 0], sizes = [8, 64], strides = [1, 1]} : vector<8x128xf32> to vector<8x64xf32>
    %185 = vector.extract_strided_slice %182 {offsets = [0, 0], sizes = [24, 64], strides = [1, 1]} : vector<24x128xf32> to vector<24x64xf32>
    %186 = vector.extract_strided_slice %183 {offsets = [0, 0], sizes = [24, 64], strides = [1, 1]} : vector<24x128xf32> to vector<24x64xf32>
    %cst_65 = arith.constant dense<0.000000e+00> : vector<8x24xf32>
    %187 = tpu.matmul %184, %185, %cst_65 {dimension_numbers = #tpu.dot_dimension_numbers<[1], [1], [0], [0], [0, 0, 1, 0], [], []>} : vector<8x64xf32>, vector<24x64xf32>, vector<8x24xf32> -> vector<8x24xf32>
    %cst_66 = arith.constant 1.250000e-01 : f32
    %188 = vector.broadcast %cst_66 : f32 to vector<8x24xf32>
    %189 = arith.mulf %187, %188 : vector<8x24xf32>
    %190 = arith.addf %189, %107 : vector<8x24xf32>
    %cst_67 = arith.constant dense<0xFF800000> : vector<8xf32>
    %191 = vector.multi_reduction <maximumf>, %190, %cst_67 [1] : vector<8x24xf32> to vector<8xf32>
    %192 = vector.shape_cast %191 : vector<8xf32> to vector<8x1xf32>
    %193 = vector.broadcast %192 : vector<8x1xf32> to vector<8x24xf32>
    %194 = arith.subf %190, %193 : vector<8x24xf32>
    %195 = math.exp %194 : vector<8x24xf32>
    %cst_68 = arith.constant dense<0.000000e+00> : vector<8xf32>
    %196 = vector.multi_reduction <add>, %195, %cst_68 [1] : vector<8x24xf32> to vector<8xf32>
    %197 = vector.shape_cast %196 : vector<8xf32> to vector<8x1xf32>
    %198 = tpu.reciprocal %197 {approx = true} : vector<8x1xf32> -> vector<8x1xf32>
    %199 = vector.broadcast %198 : vector<8x1xf32> to vector<8x24xf32>
    %200 = arith.mulf %195, %199 : vector<8x24xf32>
    %cst_69 = arith.constant dense<0.000000e+00> : vector<8x64xf32>
    %201 = tpu.matmul %200, %186, %cst_69 {dimension_numbers = #tpu.dot_dimension_numbers<[1], [0], [0], [1], [0, 0, 1, 1], [], []>} : vector<8x24xf32>, vector<24x64xf32>, vector<8x64xf32> -> vector<8x64xf32>
    %202 = vector.extract_strided_slice %165 {offsets = [0, 64], sizes = [8, 64], strides = [1, 1]} : vector<8x128xf32> to vector<8x64xf32>
    %203 = vector.extract_strided_slice %182 {offsets = [0, 64], sizes = [24, 64], strides = [1, 1]} : vector<24x128xf32> to vector<24x64xf32>
    %204 = vector.extract_strided_slice %183 {offsets = [0, 64], sizes = [24, 64], strides = [1, 1]} : vector<24x128xf32> to vector<24x64xf32>
    %cst_70 = arith.constant dense<0.000000e+00> : vector<8x24xf32>
    %205 = tpu.matmul %202, %203, %cst_70 {dimension_numbers = #tpu.dot_dimension_numbers<[1], [1], [0], [0], [0, 0, 1, 0], [], []>} : vector<8x64xf32>, vector<24x64xf32>, vector<8x24xf32> -> vector<8x24xf32>
    %cst_71 = arith.constant 1.250000e-01 : f32
    %206 = vector.broadcast %cst_71 : f32 to vector<8x24xf32>
    %207 = arith.mulf %205, %206 : vector<8x24xf32>
    %208 = arith.addf %207, %107 : vector<8x24xf32>
    %cst_72 = arith.constant dense<0xFF800000> : vector<8xf32>
    %209 = vector.multi_reduction <maximumf>, %208, %cst_72 [1] : vector<8x24xf32> to vector<8xf32>
    %210 = vector.shape_cast %209 : vector<8xf32> to vector<8x1xf32>
    %211 = vector.broadcast %210 : vector<8x1xf32> to vector<8x24xf32>
    %212 = arith.subf %208, %211 : vector<8x24xf32>
    %213 = math.exp %212 : vector<8x24xf32>
    %cst_73 = arith.constant dense<0.000000e+00> : vector<8xf32>
    %214 = vector.multi_reduction <add>, %213, %cst_73 [1] : vector<8x24xf32> to vector<8xf32>
    %215 = vector.shape_cast %214 : vector<8xf32> to vector<8x1xf32>
    %216 = tpu.reciprocal %215 {approx = true} : vector<8x1xf32> -> vector<8x1xf32>
    %217 = vector.broadcast %216 : vector<8x1xf32> to vector<8x24xf32>
    %218 = arith.mulf %213, %217 : vector<8x24xf32>
    %cst_74 = arith.constant dense<0.000000e+00> : vector<8x64xf32>
    %219 = tpu.matmul %218, %204, %cst_74 {dimension_numbers = #tpu.dot_dimension_numbers<[1], [0], [0], [1], [0, 0, 1, 1], [], []>} : vector<8x24xf32>, vector<24x64xf32>, vector<8x64xf32> -> vector<8x64xf32>
    %220 = tpu.concatenate %201, %219 in 1 : vector<8x64xf32>, vector<8x64xf32> -> vector<8x128xf32>
    %221 = arith.truncf %220 : vector<8x128xf32> to vector<8x128xbf16>
    %cst_75 = arith.constant dense<0.000000e+00> : vector<8x128xf32>
    %222 = tpu.matmul %221, %105, %cst_75 {dimension_numbers = #tpu.dot_dimension_numbers<[1], [0], [0], [1], [0, 0, 1, 1], [], []>} : vector<8x128xbf16>, vector<128x128xbf16>, vector<8x128xf32> -> vector<8x128xf32>
    %223 = arith.truncf %54 : vector<8x128xf32> to vector<8x128xbf16>
    %c0_76 = arith.constant 0 : index
    %c1 = arith.constant 1 : index
    %c0_77 = arith.constant 0 : index
    %c0_78 = arith.constant 0 : index
    %224 = vector.load %arg12[%c0_76, %c1, %c0_77, %c0_78] : memref<1x4x128x384xbf16, #tpu.memory_space<vmem>>, vector<1x1x128x384xbf16>
    %225 = vector.shape_cast %224 : vector<1x1x128x384xbf16> to vector<128x384xbf16>
    %cst_79 = arith.constant dense<0.000000e+00> : vector<8x384xf32>
    %226 = tpu.matmul %223, %225, %cst_79 {dimension_numbers = #tpu.dot_dimension_numbers<[1], [0], [0], [1], [0, 0, 1, 1], [], []>} : vector<8x128xbf16>, vector<128x384xbf16>, vector<8x384xf32> -> vector<8x384xf32>
    %227 = vector.extract_strided_slice %226 {offsets = [0, 0], sizes = [8, 128], strides = [1, 1]} : vector<8x384xf32> to vector<8x128xf32>
    %228 = vector.extract_strided_slice %57 {offsets = [16, 0], sizes = [8, 128], strides = [1, 1]} : vector<24x128xf32> to vector<8x128xf32>
    %229 = arith.mulf %227, %228 : vector<8x128xf32>
    %230 = vector.extract_strided_slice %227 {offsets = [0, 0], sizes = [8, 32], strides = [1, 1]} : vector<8x128xf32> to vector<8x32xf32>
    %231 = vector.extract_strided_slice %227 {offsets = [0, 32], sizes = [8, 32], strides = [1, 1]} : vector<8x128xf32> to vector<8x32xf32>
    %cst_80 = arith.constant 0.000000e+00 : f32
    %232 = vector.broadcast %cst_80 : f32 to vector<8x32xf32>
    %233 = arith.subf %232, %231 : vector<8x32xf32>
    %234 = vector.extract_strided_slice %227 {offsets = [0, 64], sizes = [8, 32], strides = [1, 1]} : vector<8x128xf32> to vector<8x32xf32>
    %235 = vector.extract_strided_slice %227 {offsets = [0, 96], sizes = [8, 32], strides = [1, 1]} : vector<8x128xf32> to vector<8x32xf32>
    %cst_81 = arith.constant 0.000000e+00 : f32
    %236 = vector.broadcast %cst_81 : f32 to vector<8x32xf32>
    %237 = arith.subf %236, %235 : vector<8x32xf32>
    %238 = tpu.concatenate %233, %230, %237, %234 in 1 : vector<8x32xf32>, vector<8x32xf32>, vector<8x32xf32>, vector<8x32xf32> -> vector<8x128xf32>
    %239 = vector.extract_strided_slice %58 {offsets = [16, 0], sizes = [8, 128], strides = [1, 1]} : vector<24x128xf32> to vector<8x128xf32>
    %240 = arith.mulf %238, %239 : vector<8x128xf32>
    %241 = arith.addf %229, %240 : vector<8x128xf32>
    %242 = vector.extract_strided_slice %226 {offsets = [0, 128], sizes = [8, 128], strides = [1, 1]} : vector<8x384xf32> to vector<8x128xf32>
    %243 = vector.extract_strided_slice %57 {offsets = [16, 0], sizes = [8, 128], strides = [1, 1]} : vector<24x128xf32> to vector<8x128xf32>
    %244 = arith.mulf %242, %243 : vector<8x128xf32>
    %245 = vector.extract_strided_slice %242 {offsets = [0, 0], sizes = [8, 32], strides = [1, 1]} : vector<8x128xf32> to vector<8x32xf32>
    %246 = vector.extract_strided_slice %242 {offsets = [0, 32], sizes = [8, 32], strides = [1, 1]} : vector<8x128xf32> to vector<8x32xf32>
    %cst_82 = arith.constant 0.000000e+00 : f32
    %247 = vector.broadcast %cst_82 : f32 to vector<8x32xf32>
    %248 = arith.subf %247, %246 : vector<8x32xf32>
    %249 = vector.extract_strided_slice %242 {offsets = [0, 64], sizes = [8, 32], strides = [1, 1]} : vector<8x128xf32> to vector<8x32xf32>
    %250 = vector.extract_strided_slice %242 {offsets = [0, 96], sizes = [8, 32], strides = [1, 1]} : vector<8x128xf32> to vector<8x32xf32>
    %cst_83 = arith.constant 0.000000e+00 : f32
    %251 = vector.broadcast %cst_83 : f32 to vector<8x32xf32>
    %252 = arith.subf %251, %250 : vector<8x32xf32>
    %253 = tpu.concatenate %248, %245, %252, %249 in 1 : vector<8x32xf32>, vector<8x32xf32>, vector<8x32xf32>, vector<8x32xf32> -> vector<8x128xf32>
    %254 = vector.extract_strided_slice %58 {offsets = [16, 0], sizes = [8, 128], strides = [1, 1]} : vector<24x128xf32> to vector<8x128xf32>
    %255 = arith.mulf %253, %254 : vector<8x128xf32>
    %256 = arith.addf %244, %255 : vector<8x128xf32>
    %257 = vector.extract_strided_slice %226 {offsets = [0, 256], sizes = [8, 128], strides = [1, 1]} : vector<8x384xf32> to vector<8x128xf32>
    %258 = tpu.concatenate %88, %256 in 0 : vector<16x128xf32>, vector<8x128xf32> -> vector<24x128xf32>
    %259 = tpu.concatenate %89, %257 in 0 : vector<16x128xf32>, vector<8x128xf32> -> vector<24x128xf32>
    %260 = vector.extract_strided_slice %241 {offsets = [0, 0], sizes = [8, 64], strides = [1, 1]} : vector<8x128xf32> to vector<8x64xf32>
    %261 = vector.extract_strided_slice %258 {offsets = [0, 0], sizes = [24, 64], strides = [1, 1]} : vector<24x128xf32> to vector<24x64xf32>
    %262 = vector.extract_strided_slice %259 {offsets = [0, 0], sizes = [24, 64], strides = [1, 1]} : vector<24x128xf32> to vector<24x64xf32>
    %cst_84 = arith.constant dense<0.000000e+00> : vector<8x24xf32>
    %263 = tpu.matmul %260, %261, %cst_84 {dimension_numbers = #tpu.dot_dimension_numbers<[1], [1], [0], [0], [0, 0, 1, 0], [], []>} : vector<8x64xf32>, vector<24x64xf32>, vector<8x24xf32> -> vector<8x24xf32>
    %cst_85 = arith.constant 1.250000e-01 : f32
    %264 = vector.broadcast %cst_85 : f32 to vector<8x24xf32>
    %265 = arith.mulf %263, %264 : vector<8x24xf32>
    %266 = arith.addf %265, %107 : vector<8x24xf32>
    %cst_86 = arith.constant dense<0xFF800000> : vector<8xf32>
    %267 = vector.multi_reduction <maximumf>, %266, %cst_86 [1] : vector<8x24xf32> to vector<8xf32>
    %268 = vector.shape_cast %267 : vector<8xf32> to vector<8x1xf32>
    %269 = vector.broadcast %268 : vector<8x1xf32> to vector<8x24xf32>
    %270 = arith.subf %266, %269 : vector<8x24xf32>
    %271 = math.exp %270 : vector<8x24xf32>
    %cst_87 = arith.constant dense<0.000000e+00> : vector<8xf32>
    %272 = vector.multi_reduction <add>, %271, %cst_87 [1] : vector<8x24xf32> to vector<8xf32>
    %273 = vector.shape_cast %272 : vector<8xf32> to vector<8x1xf32>
    %274 = tpu.reciprocal %273 {approx = true} : vector<8x1xf32> -> vector<8x1xf32>
    %275 = vector.broadcast %274 : vector<8x1xf32> to vector<8x24xf32>
    %276 = arith.mulf %271, %275 : vector<8x24xf32>
    %cst_88 = arith.constant dense<0.000000e+00> : vector<8x64xf32>
    %277 = tpu.matmul %276, %262, %cst_88 {dimension_numbers = #tpu.dot_dimension_numbers<[1], [0], [0], [1], [0, 0, 1, 1], [], []>} : vector<8x24xf32>, vector<24x64xf32>, vector<8x64xf32> -> vector<8x64xf32>
    %278 = vector.extract_strided_slice %241 {offsets = [0, 64], sizes = [8, 64], strides = [1, 1]} : vector<8x128xf32> to vector<8x64xf32>
    %279 = vector.extract_strided_slice %258 {offsets = [0, 64], sizes = [24, 64], strides = [1, 1]} : vector<24x128xf32> to vector<24x64xf32>
    %280 = vector.extract_strided_slice %259 {offsets = [0, 64], sizes = [24, 64], strides = [1, 1]} : vector<24x128xf32> to vector<24x64xf32>
    %cst_89 = arith.constant dense<0.000000e+00> : vector<8x24xf32>
    %281 = tpu.matmul %278, %279, %cst_89 {dimension_numbers = #tpu.dot_dimension_numbers<[1], [1], [0], [0], [0, 0, 1, 0], [], []>} : vector<8x64xf32>, vector<24x64xf32>, vector<8x24xf32> -> vector<8x24xf32>
    %cst_90 = arith.constant 1.250000e-01 : f32
    %282 = vector.broadcast %cst_90 : f32 to vector<8x24xf32>
    %283 = arith.mulf %281, %282 : vector<8x24xf32>
    %284 = arith.addf %283, %107 : vector<8x24xf32>
    %cst_91 = arith.constant dense<0xFF800000> : vector<8xf32>
    %285 = vector.multi_reduction <maximumf>, %284, %cst_91 [1] : vector<8x24xf32> to vector<8xf32>
    %286 = vector.shape_cast %285 : vector<8xf32> to vector<8x1xf32>
    %287 = vector.broadcast %286 : vector<8x1xf32> to vector<8x24xf32>
    %288 = arith.subf %284, %287 : vector<8x24xf32>
    %289 = math.exp %288 : vector<8x24xf32>
    %cst_92 = arith.constant dense<0.000000e+00> : vector<8xf32>
    %290 = vector.multi_reduction <add>, %289, %cst_92 [1] : vector<8x24xf32> to vector<8xf32>
    %291 = vector.shape_cast %290 : vector<8xf32> to vector<8x1xf32>
    %292 = tpu.reciprocal %291 {approx = true} : vector<8x1xf32> -> vector<8x1xf32>
    %293 = vector.broadcast %292 : vector<8x1xf32> to vector<8x24xf32>
    %294 = arith.mulf %289, %293 : vector<8x24xf32>
    %cst_93 = arith.constant dense<0.000000e+00> : vector<8x64xf32>
    %295 = tpu.matmul %294, %280, %cst_93 {dimension_numbers = #tpu.dot_dimension_numbers<[1], [0], [0], [1], [0, 0, 1, 1], [], []>} : vector<8x24xf32>, vector<24x64xf32>, vector<8x64xf32> -> vector<8x64xf32>
    %296 = tpu.concatenate %277, %295 in 1 : vector<8x64xf32>, vector<8x64xf32> -> vector<8x128xf32>
    %297 = arith.truncf %296 : vector<8x128xf32> to vector<8x128xbf16>
    %cst_94 = arith.constant dense<0.000000e+00> : vector<8x128xf32>
    %298 = tpu.matmul %297, %105, %cst_94 {dimension_numbers = #tpu.dot_dimension_numbers<[1], [0], [0], [1], [0, 0, 1, 1], [], []>} : vector<8x128xbf16>, vector<128x128xbf16>, vector<8x128xf32> -> vector<8x128xf32>
    %299 = arith.truncf %55 : vector<8x128xf32> to vector<8x128xbf16>
    %c0_95 = arith.constant 0 : index
    %c2 = arith.constant 2 : index
    %c0_96 = arith.constant 0 : index
    %c0_97 = arith.constant 0 : index
    %300 = vector.load %arg12[%c0_95, %c2, %c0_96, %c0_97] : memref<1x4x128x384xbf16, #tpu.memory_space<vmem>>, vector<1x1x128x384xbf16>
    %301 = vector.shape_cast %300 : vector<1x1x128x384xbf16> to vector<128x384xbf16>
    %cst_98 = arith.constant dense<0.000000e+00> : vector<8x384xf32>
    %302 = tpu.matmul %299, %301, %cst_98 {dimension_numbers = #tpu.dot_dimension_numbers<[1], [0], [0], [1], [0, 0, 1, 1], [], []>} : vector<8x128xbf16>, vector<128x384xbf16>, vector<8x384xf32> -> vector<8x384xf32>
    %303 = vector.extract_strided_slice %302 {offsets = [0, 0], sizes = [8, 128], strides = [1, 1]} : vector<8x384xf32> to vector<8x128xf32>
    %304 = vector.extract_strided_slice %57 {offsets = [16, 0], sizes = [8, 128], strides = [1, 1]} : vector<24x128xf32> to vector<8x128xf32>
    %305 = arith.mulf %303, %304 : vector<8x128xf32>
    %306 = vector.extract_strided_slice %303 {offsets = [0, 0], sizes = [8, 32], strides = [1, 1]} : vector<8x128xf32> to vector<8x32xf32>
    %307 = vector.extract_strided_slice %303 {offsets = [0, 32], sizes = [8, 32], strides = [1, 1]} : vector<8x128xf32> to vector<8x32xf32>
    %cst_99 = arith.constant 0.000000e+00 : f32
    %308 = vector.broadcast %cst_99 : f32 to vector<8x32xf32>
    %309 = arith.subf %308, %307 : vector<8x32xf32>
    %310 = vector.extract_strided_slice %303 {offsets = [0, 64], sizes = [8, 32], strides = [1, 1]} : vector<8x128xf32> to vector<8x32xf32>
    %311 = vector.extract_strided_slice %303 {offsets = [0, 96], sizes = [8, 32], strides = [1, 1]} : vector<8x128xf32> to vector<8x32xf32>
    %cst_100 = arith.constant 0.000000e+00 : f32
    %312 = vector.broadcast %cst_100 : f32 to vector<8x32xf32>
    %313 = arith.subf %312, %311 : vector<8x32xf32>
    %314 = tpu.concatenate %309, %306, %313, %310 in 1 : vector<8x32xf32>, vector<8x32xf32>, vector<8x32xf32>, vector<8x32xf32> -> vector<8x128xf32>
    %315 = vector.extract_strided_slice %58 {offsets = [16, 0], sizes = [8, 128], strides = [1, 1]} : vector<24x128xf32> to vector<8x128xf32>
    %316 = arith.mulf %314, %315 : vector<8x128xf32>
    %317 = arith.addf %305, %316 : vector<8x128xf32>
    %318 = vector.extract_strided_slice %302 {offsets = [0, 128], sizes = [8, 128], strides = [1, 1]} : vector<8x384xf32> to vector<8x128xf32>
    %319 = vector.extract_strided_slice %57 {offsets = [16, 0], sizes = [8, 128], strides = [1, 1]} : vector<24x128xf32> to vector<8x128xf32>
    %320 = arith.mulf %318, %319 : vector<8x128xf32>
    %321 = vector.extract_strided_slice %318 {offsets = [0, 0], sizes = [8, 32], strides = [1, 1]} : vector<8x128xf32> to vector<8x32xf32>
    %322 = vector.extract_strided_slice %318 {offsets = [0, 32], sizes = [8, 32], strides = [1, 1]} : vector<8x128xf32> to vector<8x32xf32>
    %cst_101 = arith.constant 0.000000e+00 : f32
    %323 = vector.broadcast %cst_101 : f32 to vector<8x32xf32>
    %324 = arith.subf %323, %322 : vector<8x32xf32>
    %325 = vector.extract_strided_slice %318 {offsets = [0, 64], sizes = [8, 32], strides = [1, 1]} : vector<8x128xf32> to vector<8x32xf32>
    %326 = vector.extract_strided_slice %318 {offsets = [0, 96], sizes = [8, 32], strides = [1, 1]} : vector<8x128xf32> to vector<8x32xf32>
    %cst_102 = arith.constant 0.000000e+00 : f32
    %327 = vector.broadcast %cst_102 : f32 to vector<8x32xf32>
    %328 = arith.subf %327, %326 : vector<8x32xf32>
    %329 = tpu.concatenate %324, %321, %328, %325 in 1 : vector<8x32xf32>, vector<8x32xf32>, vector<8x32xf32>, vector<8x32xf32> -> vector<8x128xf32>
    %330 = vector.extract_strided_slice %58 {offsets = [16, 0], sizes = [8, 128], strides = [1, 1]} : vector<24x128xf32> to vector<8x128xf32>
    %331 = arith.mulf %329, %330 : vector<8x128xf32>
    %332 = arith.addf %320, %331 : vector<8x128xf32>
    %333 = vector.extract_strided_slice %302 {offsets = [0, 256], sizes = [8, 128], strides = [1, 1]} : vector<8x384xf32> to vector<8x128xf32>
    %334 = tpu.concatenate %88, %332 in 0 : vector<16x128xf32>, vector<8x128xf32> -> vector<24x128xf32>
    %335 = tpu.concatenate %89, %333 in 0 : vector<16x128xf32>, vector<8x128xf32> -> vector<24x128xf32>
    %336 = vector.extract_strided_slice %317 {offsets = [0, 0], sizes = [8, 64], strides = [1, 1]} : vector<8x128xf32> to vector<8x64xf32>
    %337 = vector.extract_strided_slice %334 {offsets = [0, 0], sizes = [24, 64], strides = [1, 1]} : vector<24x128xf32> to vector<24x64xf32>
    %338 = vector.extract_strided_slice %335 {offsets = [0, 0], sizes = [24, 64], strides = [1, 1]} : vector<24x128xf32> to vector<24x64xf32>
    %cst_103 = arith.constant dense<0.000000e+00> : vector<8x24xf32>
    %339 = tpu.matmul %336, %337, %cst_103 {dimension_numbers = #tpu.dot_dimension_numbers<[1], [1], [0], [0], [0, 0, 1, 0], [], []>} : vector<8x64xf32>, vector<24x64xf32>, vector<8x24xf32> -> vector<8x24xf32>
    %cst_104 = arith.constant 1.250000e-01 : f32
    %340 = vector.broadcast %cst_104 : f32 to vector<8x24xf32>
    %341 = arith.mulf %339, %340 : vector<8x24xf32>
    %342 = arith.addf %341, %107 : vector<8x24xf32>
    %cst_105 = arith.constant dense<0xFF800000> : vector<8xf32>
    %343 = vector.multi_reduction <maximumf>, %342, %cst_105 [1] : vector<8x24xf32> to vector<8xf32>
    %344 = vector.shape_cast %343 : vector<8xf32> to vector<8x1xf32>
    %345 = vector.broadcast %344 : vector<8x1xf32> to vector<8x24xf32>
    %346 = arith.subf %342, %345 : vector<8x24xf32>
    %347 = math.exp %346 : vector<8x24xf32>
    %cst_106 = arith.constant dense<0.000000e+00> : vector<8xf32>
    %348 = vector.multi_reduction <add>, %347, %cst_106 [1] : vector<8x24xf32> to vector<8xf32>
    %349 = vector.shape_cast %348 : vector<8xf32> to vector<8x1xf32>
    %350 = tpu.reciprocal %349 {approx = true} : vector<8x1xf32> -> vector<8x1xf32>
    %351 = vector.broadcast %350 : vector<8x1xf32> to vector<8x24xf32>
    %352 = arith.mulf %347, %351 : vector<8x24xf32>
    %cst_107 = arith.constant dense<0.000000e+00> : vector<8x64xf32>
    %353 = tpu.matmul %352, %338, %cst_107 {dimension_numbers = #tpu.dot_dimension_numbers<[1], [0], [0], [1], [0, 0, 1, 1], [], []>} : vector<8x24xf32>, vector<24x64xf32>, vector<8x64xf32> -> vector<8x64xf32>
    %354 = vector.extract_strided_slice %317 {offsets = [0, 64], sizes = [8, 64], strides = [1, 1]} : vector<8x128xf32> to vector<8x64xf32>
    %355 = vector.extract_strided_slice %334 {offsets = [0, 64], sizes = [24, 64], strides = [1, 1]} : vector<24x128xf32> to vector<24x64xf32>
    %356 = vector.extract_strided_slice %335 {offsets = [0, 64], sizes = [24, 64], strides = [1, 1]} : vector<24x128xf32> to vector<24x64xf32>
    %cst_108 = arith.constant dense<0.000000e+00> : vector<8x24xf32>
    %357 = tpu.matmul %354, %355, %cst_108 {dimension_numbers = #tpu.dot_dimension_numbers<[1], [1], [0], [0], [0, 0, 1, 0], [], []>} : vector<8x64xf32>, vector<24x64xf32>, vector<8x24xf32> -> vector<8x24xf32>
    %cst_109 = arith.constant 1.250000e-01 : f32
    %358 = vector.broadcast %cst_109 : f32 to vector<8x24xf32>
    %359 = arith.mulf %357, %358 : vector<8x24xf32>
    %360 = arith.addf %359, %107 : vector<8x24xf32>
    %cst_110 = arith.constant dense<0xFF800000> : vector<8xf32>
    %361 = vector.multi_reduction <maximumf>, %360, %cst_110 [1] : vector<8x24xf32> to vector<8xf32>
    %362 = vector.shape_cast %361 : vector<8xf32> to vector<8x1xf32>
    %363 = vector.broadcast %362 : vector<8x1xf32> to vector<8x24xf32>
    %364 = arith.subf %360, %363 : vector<8x24xf32>
    %365 = math.exp %364 : vector<8x24xf32>
    %cst_111 = arith.constant dense<0.000000e+00> : vector<8xf32>
    %366 = vector.multi_reduction <add>, %365, %cst_111 [1] : vector<8x24xf32> to vector<8xf32>
    %367 = vector.shape_cast %366 : vector<8xf32> to vector<8x1xf32>
    %368 = tpu.reciprocal %367 {approx = true} : vector<8x1xf32> -> vector<8x1xf32>
    %369 = vector.broadcast %368 : vector<8x1xf32> to vector<8x24xf32>
    %370 = arith.mulf %365, %369 : vector<8x24xf32>
    %cst_112 = arith.constant dense<0.000000e+00> : vector<8x64xf32>
    %371 = tpu.matmul %370, %356, %cst_112 {dimension_numbers = #tpu.dot_dimension_numbers<[1], [0], [0], [1], [0, 0, 1, 1], [], []>} : vector<8x24xf32>, vector<24x64xf32>, vector<8x64xf32> -> vector<8x64xf32>
    %372 = tpu.concatenate %353, %371 in 1 : vector<8x64xf32>, vector<8x64xf32> -> vector<8x128xf32>
    %373 = arith.truncf %372 : vector<8x128xf32> to vector<8x128xbf16>
    %cst_113 = arith.constant dense<0.000000e+00> : vector<8x128xf32>
    %374 = tpu.matmul %373, %105, %cst_113 {dimension_numbers = #tpu.dot_dimension_numbers<[1], [0], [0], [1], [0, 0, 1, 1], [], []>} : vector<8x128xbf16>, vector<128x128xbf16>, vector<8x128xf32> -> vector<8x128xf32>
    %375 = arith.truncf %56 : vector<8x128xf32> to vector<8x128xbf16>
    %c0_114 = arith.constant 0 : index
    %c3 = arith.constant 3 : index
    %c0_115 = arith.constant 0 : index
    %c0_116 = arith.constant 0 : index
    %376 = vector.load %arg12[%c0_114, %c3, %c0_115, %c0_116] : memref<1x4x128x384xbf16, #tpu.memory_space<vmem>>, vector<1x1x128x384xbf16>
    %377 = vector.shape_cast %376 : vector<1x1x128x384xbf16> to vector<128x384xbf16>
    %cst_117 = arith.constant dense<0.000000e+00> : vector<8x384xf32>
    %378 = tpu.matmul %375, %377, %cst_117 {dimension_numbers = #tpu.dot_dimension_numbers<[1], [0], [0], [1], [0, 0, 1, 1], [], []>} : vector<8x128xbf16>, vector<128x384xbf16>, vector<8x384xf32> -> vector<8x384xf32>
    %379 = vector.extract_strided_slice %378 {offsets = [0, 0], sizes = [8, 128], strides = [1, 1]} : vector<8x384xf32> to vector<8x128xf32>
    %380 = vector.extract_strided_slice %57 {offsets = [16, 0], sizes = [8, 128], strides = [1, 1]} : vector<24x128xf32> to vector<8x128xf32>
    %381 = arith.mulf %379, %380 : vector<8x128xf32>
    %382 = vector.extract_strided_slice %379 {offsets = [0, 0], sizes = [8, 32], strides = [1, 1]} : vector<8x128xf32> to vector<8x32xf32>
    %383 = vector.extract_strided_slice %379 {offsets = [0, 32], sizes = [8, 32], strides = [1, 1]} : vector<8x128xf32> to vector<8x32xf32>
    %cst_118 = arith.constant 0.000000e+00 : f32
    %384 = vector.broadcast %cst_118 : f32 to vector<8x32xf32>
    %385 = arith.subf %384, %383 : vector<8x32xf32>
    %386 = vector.extract_strided_slice %379 {offsets = [0, 64], sizes = [8, 32], strides = [1, 1]} : vector<8x128xf32> to vector<8x32xf32>
    %387 = vector.extract_strided_slice %379 {offsets = [0, 96], sizes = [8, 32], strides = [1, 1]} : vector<8x128xf32> to vector<8x32xf32>
    %cst_119 = arith.constant 0.000000e+00 : f32
    %388 = vector.broadcast %cst_119 : f32 to vector<8x32xf32>
    %389 = arith.subf %388, %387 : vector<8x32xf32>
    %390 = tpu.concatenate %385, %382, %389, %386 in 1 : vector<8x32xf32>, vector<8x32xf32>, vector<8x32xf32>, vector<8x32xf32> -> vector<8x128xf32>
    %391 = vector.extract_strided_slice %58 {offsets = [16, 0], sizes = [8, 128], strides = [1, 1]} : vector<24x128xf32> to vector<8x128xf32>
    %392 = arith.mulf %390, %391 : vector<8x128xf32>
    %393 = arith.addf %381, %392 : vector<8x128xf32>
    %394 = vector.extract_strided_slice %378 {offsets = [0, 128], sizes = [8, 128], strides = [1, 1]} : vector<8x384xf32> to vector<8x128xf32>
    %395 = vector.extract_strided_slice %57 {offsets = [16, 0], sizes = [8, 128], strides = [1, 1]} : vector<24x128xf32> to vector<8x128xf32>
    %396 = arith.mulf %394, %395 : vector<8x128xf32>
    %397 = vector.extract_strided_slice %394 {offsets = [0, 0], sizes = [8, 32], strides = [1, 1]} : vector<8x128xf32> to vector<8x32xf32>
    %398 = vector.extract_strided_slice %394 {offsets = [0, 32], sizes = [8, 32], strides = [1, 1]} : vector<8x128xf32> to vector<8x32xf32>
    %cst_120 = arith.constant 0.000000e+00 : f32
    %399 = vector.broadcast %cst_120 : f32 to vector<8x32xf32>
    %400 = arith.subf %399, %398 : vector<8x32xf32>
    %401 = vector.extract_strided_slice %394 {offsets = [0, 64], sizes = [8, 32], strides = [1, 1]} : vector<8x128xf32> to vector<8x32xf32>
    %402 = vector.extract_strided_slice %394 {offsets = [0, 96], sizes = [8, 32], strides = [1, 1]} : vector<8x128xf32> to vector<8x32xf32>
    %cst_121 = arith.constant 0.000000e+00 : f32
    %403 = vector.broadcast %cst_121 : f32 to vector<8x32xf32>
    %404 = arith.subf %403, %402 : vector<8x32xf32>
    %405 = tpu.concatenate %400, %397, %404, %401 in 1 : vector<8x32xf32>, vector<8x32xf32>, vector<8x32xf32>, vector<8x32xf32> -> vector<8x128xf32>
    %406 = vector.extract_strided_slice %58 {offsets = [16, 0], sizes = [8, 128], strides = [1, 1]} : vector<24x128xf32> to vector<8x128xf32>
    %407 = arith.mulf %405, %406 : vector<8x128xf32>
    %408 = arith.addf %396, %407 : vector<8x128xf32>
    %409 = vector.extract_strided_slice %378 {offsets = [0, 256], sizes = [8, 128], strides = [1, 1]} : vector<8x384xf32> to vector<8x128xf32>
    %410 = tpu.concatenate %88, %408 in 0 : vector<16x128xf32>, vector<8x128xf32> -> vector<24x128xf32>
    %411 = tpu.concatenate %89, %409 in 0 : vector<16x128xf32>, vector<8x128xf32> -> vector<24x128xf32>
    %412 = vector.extract_strided_slice %393 {offsets = [0, 0], sizes = [8, 64], strides = [1, 1]} : vector<8x128xf32> to vector<8x64xf32>
    %413 = vector.extract_strided_slice %410 {offsets = [0, 0], sizes = [24, 64], strides = [1, 1]} : vector<24x128xf32> to vector<24x64xf32>
    %414 = vector.extract_strided_slice %411 {offsets = [0, 0], sizes = [24, 64], strides = [1, 1]} : vector<24x128xf32> to vector<24x64xf32>
    %cst_122 = arith.constant dense<0.000000e+00> : vector<8x24xf32>
    %415 = tpu.matmul %412, %413, %cst_122 {dimension_numbers = #tpu.dot_dimension_numbers<[1], [1], [0], [0], [0, 0, 1, 0], [], []>} : vector<8x64xf32>, vector<24x64xf32>, vector<8x24xf32> -> vector<8x24xf32>
    %cst_123 = arith.constant 1.250000e-01 : f32
    %416 = vector.broadcast %cst_123 : f32 to vector<8x24xf32>
    %417 = arith.mulf %415, %416 : vector<8x24xf32>
    %418 = arith.addf %417, %107 : vector<8x24xf32>
    %cst_124 = arith.constant dense<0xFF800000> : vector<8xf32>
    %419 = vector.multi_reduction <maximumf>, %418, %cst_124 [1] : vector<8x24xf32> to vector<8xf32>
    %420 = vector.shape_cast %419 : vector<8xf32> to vector<8x1xf32>
    %421 = vector.broadcast %420 : vector<8x1xf32> to vector<8x24xf32>
    %422 = arith.subf %418, %421 : vector<8x24xf32>
    %423 = math.exp %422 : vector<8x24xf32>
    %cst_125 = arith.constant dense<0.000000e+00> : vector<8xf32>
    %424 = vector.multi_reduction <add>, %423, %cst_125 [1] : vector<8x24xf32> to vector<8xf32>
    %425 = vector.shape_cast %424 : vector<8xf32> to vector<8x1xf32>
    %426 = tpu.reciprocal %425 {approx = true} : vector<8x1xf32> -> vector<8x1xf32>
    %427 = vector.broadcast %426 : vector<8x1xf32> to vector<8x24xf32>
    %428 = arith.mulf %423, %427 : vector<8x24xf32>
    %cst_126 = arith.constant dense<0.000000e+00> : vector<8x64xf32>
    %429 = tpu.matmul %428, %414, %cst_126 {dimension_numbers = #tpu.dot_dimension_numbers<[1], [0], [0], [1], [0, 0, 1, 1], [], []>} : vector<8x24xf32>, vector<24x64xf32>, vector<8x64xf32> -> vector<8x64xf32>
    %430 = vector.extract_strided_slice %393 {offsets = [0, 64], sizes = [8, 64], strides = [1, 1]} : vector<8x128xf32> to vector<8x64xf32>
    %431 = vector.extract_strided_slice %410 {offsets = [0, 64], sizes = [24, 64], strides = [1, 1]} : vector<24x128xf32> to vector<24x64xf32>
    %432 = vector.extract_strided_slice %411 {offsets = [0, 64], sizes = [24, 64], strides = [1, 1]} : vector<24x128xf32> to vector<24x64xf32>
    %cst_127 = arith.constant dense<0.000000e+00> : vector<8x24xf32>
    %433 = tpu.matmul %430, %431, %cst_127 {dimension_numbers = #tpu.dot_dimension_numbers<[1], [1], [0], [0], [0, 0, 1, 0], [], []>} : vector<8x64xf32>, vector<24x64xf32>, vector<8x24xf32> -> vector<8x24xf32>
    %cst_128 = arith.constant 1.250000e-01 : f32
    %434 = vector.broadcast %cst_128 : f32 to vector<8x24xf32>
    %435 = arith.mulf %433, %434 : vector<8x24xf32>
    %436 = arith.addf %435, %107 : vector<8x24xf32>
    %cst_129 = arith.constant dense<0xFF800000> : vector<8xf32>
    %437 = vector.multi_reduction <maximumf>, %436, %cst_129 [1] : vector<8x24xf32> to vector<8xf32>
    %438 = vector.shape_cast %437 : vector<8xf32> to vector<8x1xf32>
    %439 = vector.broadcast %438 : vector<8x1xf32> to vector<8x24xf32>
    %440 = arith.subf %436, %439 : vector<8x24xf32>
    %441 = math.exp %440 : vector<8x24xf32>
    %cst_130 = arith.constant dense<0.000000e+00> : vector<8xf32>
    %442 = vector.multi_reduction <add>, %441, %cst_130 [1] : vector<8x24xf32> to vector<8xf32>
    %443 = vector.shape_cast %442 : vector<8xf32> to vector<8x1xf32>
    %444 = tpu.reciprocal %443 {approx = true} : vector<8x1xf32> -> vector<8x1xf32>
    %445 = vector.broadcast %444 : vector<8x1xf32> to vector<8x24xf32>
    %446 = arith.mulf %441, %445 : vector<8x24xf32>
    %cst_131 = arith.constant dense<0.000000e+00> : vector<8x64xf32>
    %447 = tpu.matmul %446, %432, %cst_131 {dimension_numbers = #tpu.dot_dimension_numbers<[1], [0], [0], [1], [0, 0, 1, 1], [], []>} : vector<8x24xf32>, vector<24x64xf32>, vector<8x64xf32> -> vector<8x64xf32>
    %448 = tpu.concatenate %429, %447 in 1 : vector<8x64xf32>, vector<8x64xf32> -> vector<8x128xf32>
    %449 = arith.truncf %448 : vector<8x128xf32> to vector<8x128xbf16>
    %cst_132 = arith.constant dense<0.000000e+00> : vector<8x128xf32>
    %450 = tpu.matmul %449, %105, %cst_132 {dimension_numbers = #tpu.dot_dimension_numbers<[1], [0], [0], [1], [0, 0, 1, 1], [], []>} : vector<8x128xbf16>, vector<128x128xbf16>, vector<8x128xf32> -> vector<8x128xf32>
    %451 = tpu.concatenate %146, %222, %298, %374, %450 in 0 : vector<8x128xf32>, vector<8x128xf32>, vector<8x128xf32>, vector<8x128xf32>, vector<8x128xf32> -> vector<40x128xf32>
    %452 = arith.addf %3, %451 : vector<40x128xf32>
    %453 = vector.extract_strided_slice %38 {offsets = [1, 0], sizes = [1, 128], strides = [1, 1]} : vector<2x128xf32> to vector<1x128xf32>
    %454 = arith.mulf %452, %452 : vector<40x128xf32>
    %cst_133 = arith.constant dense<0.000000e+00> : vector<40xf32>
    %455 = vector.multi_reduction <add>, %454, %cst_133 [1] : vector<40x128xf32> to vector<40xf32>
    %456 = vector.shape_cast %455 : vector<40xf32> to vector<40x1xf32>
    %cst_134 = arith.constant 1.280000e+02 : f32
    %457 = vector.broadcast %cst_134 : f32 to vector<40x1xf32>
    %458 = arith.divf %456, %457 : vector<40x1xf32>
    %cst_135 = arith.constant 9.99999997E-7 : f32
    %459 = vector.broadcast %cst_135 : f32 to vector<40x1xf32>
    %460 = arith.addf %458, %459 : vector<40x1xf32>
    %461 = math.rsqrt %460 : vector<40x1xf32>
    %462 = vector.broadcast %461 : vector<40x1xf32> to vector<40x128xf32>
    %463 = arith.mulf %452, %462 : vector<40x128xf32>
    %464 = vector.broadcast %453 : vector<1x128xf32> to vector<40x128xf32>
    %465 = arith.mulf %463, %464 : vector<40x128xf32>
    %466 = arith.truncf %465 : vector<40x128xf32> to vector<40x128xbf16>
    %c0_136 = arith.constant 0 : index
    %c0_137 = arith.constant 0 : index
    %c0_138 = arith.constant 0 : index
    %467 = vector.load %arg13[%c0_136, %c0_137, %c0_138] : memref<1x128x512xbf16, #tpu.memory_space<vmem>>, vector<1x128x512xbf16>
    %468 = vector.shape_cast %467 : vector<1x128x512xbf16> to vector<128x512xbf16>
    %cst_139 = arith.constant dense<0.000000e+00> : vector<40x512xf32>
    %469 = tpu.matmul %466, %468, %cst_139 {dimension_numbers = #tpu.dot_dimension_numbers<[1], [0], [0], [1], [0, 0, 1, 1], [], []>} : vector<40x128xbf16>, vector<128x512xbf16>, vector<40x512xf32> -> vector<40x512xf32>
    %470 = vector.extract_strided_slice %469 {offsets = [0, 0], sizes = [40, 256], strides = [1, 1]} : vector<40x512xf32> to vector<40x256xf32>
    %471 = vector.extract_strided_slice %469 {offsets = [0, 256], sizes = [40, 256], strides = [1, 1]} : vector<40x512xf32> to vector<40x256xf32>
    %472 = arith.negf %470 : vector<40x256xf32>
    %473 = math.exp %472 : vector<40x256xf32>
    %cst_140 = arith.constant 1.000000e+00 : f32
    %474 = vector.broadcast %cst_140 : f32 to vector<40x256xf32>
    %475 = arith.addf %474, %473 : vector<40x256xf32>
    %476 = arith.divf %474, %475 : vector<40x256xf32>
    %477 = arith.mulf %470, %476 : vector<40x256xf32>
    %478 = arith.mulf %477, %471 : vector<40x256xf32>
    %479 = arith.truncf %478 : vector<40x256xf32> to vector<40x256xbf16>
    %c0_141 = arith.constant 0 : index
    %c0_142 = arith.constant 0 : index
    %c0_143 = arith.constant 0 : index
    %480 = vector.load %arg14[%c0_141, %c0_142, %c0_143] : memref<1x256x128xbf16, #tpu.memory_space<vmem>>, vector<1x256x128xbf16>
    %481 = vector.shape_cast %480 : vector<1x256x128xbf16> to vector<256x128xbf16>
    %cst_144 = arith.constant dense<0.000000e+00> : vector<40x128xf32>
    %482 = tpu.matmul %479, %481, %cst_144 {dimension_numbers = #tpu.dot_dimension_numbers<[1], [0], [0], [1], [0, 0, 1, 1], [], []>} : vector<40x256xbf16>, vector<256x128xbf16>, vector<40x128xf32> -> vector<40x128xf32>
    %483 = arith.addf %452, %482 : vector<40x128xf32>
    %c0_145 = arith.constant 0 : index
    %c0_146 = arith.constant 0 : index
    %484 = vector.load %arg17[%c0_145, %c0_146] : memref<40x128xf32, #tpu.memory_space<vmem>>, vector<40x128xf32>
    tpu.vector_store %arg17[%c0_145, %c0_146], %483 {strides = array<i32>} : memref<40x128xf32, #tpu.memory_space<vmem>>, vector<40x128xf32>,
    return
  }
  func.func @transform_0(%arg0: i32) -> (i32, i32) {
    %c0_i32 = arith.constant 0 : i32
    %c0_i32_0 = arith.constant 0 : i32
    %c0_i32_1 = arith.constant 0 : i32
    return %c0_i32, %c0_i32_0 : i32, i32
  }
  func.func @transform_1(%arg0: i32) -> (i32, i32, i32) {
    %c0_i32 = arith.constant 0 : i32
    %c0_i32_0 = arith.constant 0 : i32
    %c0_i32_1 = arith.constant 0 : i32
    return %arg0, %c0_i32, %c0_i32_0 : i32, i32, i32
  }
  func.func @transform_2(%arg0: i32) -> (i32, i32, i32) {
    %c0_i32 = arith.constant 0 : i32
    %c0_i32_0 = arith.constant 0 : i32
    %c0_i32_1 = arith.constant 0 : i32
    return %arg0, %c0_i32, %c0_i32_0 : i32, i32, i32
  }
  func.func @transform_3(%arg0: i32) -> (i32, i32) {
    %c0_i32 = arith.constant 0 : i32
    %c0_i32_0 = arith.constant 0 : i32
    %c0_i32_1 = arith.constant 0 : i32
    return %c0_i32, %c0_i32_0 : i32, i32
  }
  func.func @transform_4(%arg0: i32) -> (i32, i32) {
    %c0_i32 = arith.constant 0 : i32
    %c0_i32_0 = arith.constant 0 : i32
    %c0_i32_1 = arith.constant 0 : i32
    return %c0_i32, %c0_i32_0 : i32, i32
  }
  func.func @transform_5(%arg0: i32) -> (i32, i32) {
    %c0_i32 = arith.constant 0 : i32
    %c0_i32_0 = arith.constant 0 : i32
    %c0_i32_1 = arith.constant 0 : i32
    return %c0_i32, %c0_i32_0 : i32, i32
  }
  func.func @transform_6(%arg0: i32) -> (i32, i32) {
    %c0_i32 = arith.constant 0 : i32
    %c0_i32_0 = arith.constant 0 : i32
    %c0_i32_1 = arith.constant 0 : i32
    return %c0_i32, %c0_i32_0 : i32, i32
  }
  func.func @transform_7(%arg0: i32) -> (i32, i32, i32) {
    %c0_i32 = arith.constant 0 : i32
    %c0_i32_0 = arith.constant 0 : i32
    %c0_i32_1 = arith.constant 0 : i32
    return %arg0, %c0_i32, %c0_i32_0 : i32, i32, i32
  }
  func.func @transform_8(%arg0: i32) -> (i32, i32, i32) {
    %c0_i32 = arith.constant 0 : i32
    %c0_i32_0 = arith.constant 0 : i32
    %c0_i32_1 = arith.constant 0 : i32
    return %arg0, %c0_i32, %c0_i32_0 : i32, i32, i32
  }
  func.func @transform_9(%arg0: i32) -> (i32, i32, i32) {
    %c0_i32 = arith.constant 0 : i32
    %c0_i32_0 = arith.constant 0 : i32
    %c0_i32_1 = arith.constant 0 : i32
    return %arg0, %c0_i32, %c0_i32_0 : i32, i32, i32
  }
  func.func @transform_10(%arg0: i32) -> (i32, i32, i32) {
    %c0_i32 = arith.constant 0 : i32
    %c0_i32_0 = arith.constant 0 : i32
    %c0_i32_1 = arith.constant 0 : i32
    return %arg0, %c0_i32, %c0_i32_0 : i32, i32, i32
  }
  func.func @transform_11(%arg0: i32) -> (i32, i32, i32, i32) {
    %c0_i32 = arith.constant 0 : i32
    %c0_i32_0 = arith.constant 0 : i32
    %c0_i32_1 = arith.constant 0 : i32
    %c0_i32_2 = arith.constant 0 : i32
    return %arg0, %c0_i32, %c0_i32_0, %c0_i32_1 : i32, i32, i32, i32
  }
  func.func @transform_12(%arg0: i32) -> (i32, i32, i32) {
    %c0_i32 = arith.constant 0 : i32
    %c0_i32_0 = arith.constant 0 : i32
    %c0_i32_1 = arith.constant 0 : i32
    return %arg0, %c0_i32, %c0_i32_0 : i32, i32, i32
  }
  func.func @transform_13(%arg0: i32) -> (i32, i32, i32) {
    %c0_i32 = arith.constant 0 : i32
    %c0_i32_0 = arith.constant 0 : i32
    %c0_i32_1 = arith.constant 0 : i32
    return %arg0, %c0_i32, %c0_i32_0 : i32, i32, i32
  }
  func.func @transform_14(%arg0: i32) -> (i32, i32, i32) {
    %c0_i32 = arith.constant 0 : i32
    %c0_i32_0 = arith.constant 0 : i32
    %c0_i32_1 = arith.constant 0 : i32
    return %arg0, %c0_i32, %c0_i32_0 : i32, i32, i32
  }
  func.func @transform_15(%arg0: i32) -> (i32, i32, i32) {
    %c0_i32 = arith.constant 0 : i32
    %c0_i32_0 = arith.constant 0 : i32
    %c0_i32_1 = arith.constant 0 : i32
    return %arg0, %c0_i32, %c0_i32_0 : i32, i32, i32
  }
}

</mosaic_0001>

<bundles_post_ra>
// kernel: encoder_forward.1
= control target key start
LH: loop header
LB: loop body
LE: loop exit
PB: predicated region body
PF: predicated region fallthrough
CT: control target
= control target key end

     0   :  { %s7590_s0 = inlined_call_operand.vmem [shape: f32[40,128], index: 0, kind: input, shape index: {}]   ;;  %s7591_s1 = inlined_call_operand.hbm [shape: f32[32,8,128], index: 1, kind: input, shape index: {}]   ;;  %s7592_s2 = inlined_call_operand.hbm [shape: f32[32,8,128], index: 2, kind: input, shape index: {}]   ;;  %s7593_s3 = inlined_call_operand.vmem [shape: f32[24,128], index: 3, kind: input, shape index: {}]   ;;  %s7594_s4 = inlined_call_operand.vmem [shape: f32[24,128], index: 4, kind: input, shape index: {}]   ;;  %s7595_s5 = inlined_call_operand.vmem [shape: f32[8,16], index: 5, kind: input, shape index: {}]   ;;  %s7596_s6 = inlined_call_operand.vmem [shape: f32[8,24], index: 6, kind: input, shape index: {}]   ;;  %s7597_s7 = inlined_call_operand.hbm [shape: f32[32,2,128], index: 7, kind: input, shape index: {}]   ;;  %s7598_s8 = inlined_call_operand.hbm [shape: bf16[32,128,384], index: 8, kind: input, shape index: {}]   ;;  %s7599_s9 = inlined_call_operand.hbm [shape: bf16[32,128,256], index: 9, kind: input, shape index: {}]   ;;  %s7600_s10 = inlined_call_operand.hbm [shape: bf16[32,128,128], index: 10, kind: input, shape index: {}]   ;;  %s7601_s11 = inlined_call_operand.hbm [shape: bf16[32,4,128,384], index: 11, kind: input, shape index: {}]   ;;  %s7602_s12 = inlined_call_operand.hbm [shape: bf16[32,128,512], index: 12, kind: input, shape index: {}]   ;;  %s7603_s13 = inlined_call_operand.hbm [shape: bf16[32,256,128], index: 13, kind: input, shape index: {}]   ;;  %s7604_s14 = inlined_call_operand.hbm [shape: f32[32,8,128], index: 14, kind: output, shape index: {0}]   ;;  %s7605_s15 = inlined_call_operand.hbm [shape: f32[32,8,128], index: 15, kind: output, shape index: {1}]  }
   0x1   :  { %7633 = sst [smem:[#allocation35_spill]] %s7590_s0 }
   0x2   :  { %7634 = sst [smem:[#allocation36_spill]] %s7591_s1 }
   0x3   :  { %7635 = sst [smem:[#allocation37_spill]] %s7592_s2 }
   0x4   :  { %7636 = sst [smem:[#allocation38_spill]] %s7593_s3 }
   0x5   :  { %7637 = sst [smem:[#allocation39_spill]] %s7594_s4 }
   0x6   :  { %7638 = sst [smem:[#allocation40_spill]] %s7595_s5 }
   0x7   :  { %7639 = sst [smem:[#allocation41_spill]] %s7596_s6 }
   0x8   :  { %7640 = sst [smem:[#allocation42_spill]] %s7597_s7 }
   0x9   :  { %7641 = sst [smem:[#allocation43_spill]] %s7598_s8 }
   0xa   :  { %7642 = sst [smem:[#allocation44_spill]] %s7604_s14 }
   0xb   :  { %7643 = sst [smem:[#allocation45_spill]] %s7605_s15 }
   0xc   :  { %21 = vsyncpa [#allocation4], 0 }
   0xd   :  { %23 = vsyncpa [#allocation4 + $0x1], 0 }
   0xe   :  { %24 = vsyncpa [#allocation7], 0 }
   0xf   :  { %26 = vsyncpa [#allocation7 + $0x1], 0 }
  0x10   :  { %27 = vsyncpa [#allocation10], 0 }
  0x11   :  { %29 = vsyncpa [#allocation10 + $0x1], 0 }
  0x12   :  { %30 = vsyncpa [#allocation13], 0 }
  0x13   :  { %32 = vsyncpa [#allocation13 + $0x1], 0 }
  0x14   :  { %33 = vsyncpa [#allocation16], 0 }
  0x15   :  { %35 = vsyncpa [#allocation16 + $0x1], 0 }
  0x16   :  { %36 = vsyncpa [#allocation5], 0 }
  0x17   :  { %38 = vsyncpa [#allocation5 + $0x1], 0 }
  0x18   :  { %39 = vsyncpa [#allocation20], 0 }
  0x19   :  { %41 = vsyncpa [#allocation20 + $0x1], 0  ;;  %s6120_s18 = smov 0   ;;  %s6122_s19 = smov 0  }
  0x1a   :  { %s6124_s20 = smov 0   ;;  %s6126_s21 = smov 0  }
  0x1b LB: > { %7644 = sst [smem:[#allocation28_spill]] %s6014_s18  ;;  %s6141_s22 = sadd.s32 4294967295, %s6026_s21   ;;  %s6026_s21 = sphi %s6126_s21, %s7703_s21   ;;  %s6022_s20 = sphi %s6124_s20, %s7708_s20   ;;  %s6018_s19 = sphi %s6122_s19, %s7707_s19   ;;  %s6014_s18 = sphi %s6120_s18, %s7706_s18  }
  0x1c   : > { %7645 = sst [smem:[#allocation29_spill]] %s6022_s20  ;;  %s4233_s23 = sadd.s32 4294967294, %s6026_s21  }
  0x1d   : > { %7646 = sst [smem:[#allocation30_spill]] %s6141_s22  ;;  %s6145_s24 = sadd.s32 1, %s6026_s21  }
  0x1e   : > { %7647 = sst [smem:[#allocation31_spill]] %s6145_s24  ;;  %s75_s25 = sadd.s32 1, %s6022_s20 }
  0x1f   : > { %s72_s26 = ssub.s32 %s6026_s21, %s6145_s24  ;;  %p82_p0 = scmp.ne.s32.totalorder %s6022_s20, %s6018_s19 }
  0x20   : > { %p73_p1 = scmp.eq.s32.totalorder %s72_s26, 0  ;;  %p83_p2 = scmp.eq.s32.totalorder %s6026_s21, 0 }
  0x21   : > { %p88_p3 = scmp.ne.s32.totalorder %s6018_s19, %s6014_s18  ;;  %p89_p4 = scmp.eq.s32.totalorder %s6141_s22, 0 }
  0x22   : > { %s6157_s27 = scalar_select %p73_p1, %s6022_s20, %s75_s25  }
  0x23   : > { %p84_p5 = por %p83_p2, %p82_p0  ;;  %p6159_p6 = por %p89_p4, %p88_p3 }
  0x24   : > { %7648 = sst [smem:[#allocation32_spill]] %s6157_s27  ;;  %p404_p7 = scmp.eq.s32.totalorder %s6141_s22, 31 }
  0x25   : > { %p410_p8 = scmp.eq.s32.totalorder %s4233_s23, 31  ;;  %p5457_p9 = scmp.lt.s32.totalorder %s6026_s21, 32 }
  0x26   : > { %p6165_p10 = por %p404_p7, %p82_p0  ;;  %s6174_s16 = sand.u32 1, %s6022_s20  }
  0x27   : > { %p6169_p11 = por %p410_p8, %p88_p3  ;;  %s7617_s17 = sshll.u32 %s6026_s21, 3 }
  0x28   : > { %s7650_s29 = scalar_select %p6165_p10, 1, 0 }
  0x29   : > { %s7652_s30 = scalar_select %p6169_p11, 1, 0 }
  0x2a   : > { %7651 = sst [smem:[#allocation33_spill]] %s7650_s29  ;;  %s7616_s25 = sshll.u32 %s6174_s16, 3 }
  0x2b   : > { %7653 = sst [smem:[#allocation34_spill]] %s7652_s30  ;;  %p6178_p12 = pnand %p5457_p9, %p84_p5 }
  0x2c   : > { %s6183_s23 = sand.u32 1, %s6026_s21   ;;  %s7655_s2 = sld [smem:[#allocation37_spill]] }
  0x2d   : > { %s494_s20 = scalar_lea.vmem [#allocation6], %s7616_s25  ;;  %p4256_p13 = scmp.ge.s32.totalorder %s6026_s21, 1 }
  0x2e   : > { %s502_s30 = sshll.u32 %s494_s20, 4  ;;  %s7619_s29 = scalar_lea.sflag [#allocation7], %s6183_s23  ;;  %s503_s30 = int_to_ptr.vmem [resolvable:$true] %s502_s30 }
  0x2f   : > { %p6196_p1 = pneg %p6178_p12 }
  0x32   : > { %s498_s18 = scalar_lea.hbm %s7655_s2, %s7617_s17 }
  0x33   : > { %s500_s15 = sshll.u32 %s498_s18, 4  ;;  %s5649_s18 = scalar_lea.hbm %s7655_s2, 256  ;;  %s501_s15 = int_to_ptr.hbm [resolvable:$true] %s500_s15 }
  0x34   : > { %s5642_s14 = sshra.s32 %s501_s15, 4  ;;  %s5643_s14 = int_to_ptr.hbm [resolvable:$true] %s5642_s14 }
  0x35   : > { %s5644_s6 = scalar_lea.hbm %s5643_s14, 8  ;;  %p5650_p4 = scmp.lt.s32.totalorder %s5643_s14, %s7655_s2 }
  0x36   : > { %p5645_p0 = scmp.ne.s32.totalorder %s5643_s14, %s5644_s6  ;;  %p5651_p5 = scmp.lt.s32.totalorder %s5649_s18, %s5644_s6 }
  0x38   : > { %p5647_p2 = pnand %p6196_p1, %p5645_p0  ;;  %p5652_p7 = por %p5651_p5, %p5650_p4 }
  0x3a   : > { %p5648_p3 = pneg %p5647_p2 }
  0x3c   : > { %p5653_p8 = pnand %p5652_p7, %p5648_p3 }
  0x3e   : > { %5656 = shalt.err (!%p5653_p8)
}
  0x3f   : > { %5428 = dma.hbm_to_vmem [thread:$0]  (!%p6178_p12), %s501_s15, 128, %s503_s30, %s7619_s29  }
  0x40   : > { %p658_p9 = scmp.lt.s32.totalorder %s6026_s21, 33  ;;  %s5394_s24 = smul.u32 192, %s6174_s16 }
  0x41   : > { %s5395_s6 = smul.u32 192, %s6026_s21  ;;  %s7658_s8 = sld [smem:[#allocation43_spill]] }
  0x42   : > { %p6216_p0 = pnand %p4256_p13, %p658_p9  ;;  %s532_s27 = scalar_lea.vmem [#allocation9], %s5394_s24 }
  0x43   : > { %s540_s17 = sshll.u32 %s532_s27, 4  ;;  %s7627_s4 = scalar_lea.sflag [#allocation10], %s6183_s23  ;;  %s541_s17 = int_to_ptr.vmem [resolvable:$true] %s540_s17 }
  0x47   : > { %s537_s18 = scalar_lea.hbm %s7658_s8, %s5395_s6  ;;  %s5679_s0 = scalar_lea.hbm %s7658_s8, 6144 }
  0x48   : > { %s538_s2 = sshll.u32 %s537_s18, 4  ;;  %s539_s2 = int_to_ptr.hbm [resolvable:$true] %s538_s2 }
  0x49   : > { %s5672_s15 = sshra.s32 %s539_s2, 4  ;;  %s5673_s15 = int_to_ptr.hbm [resolvable:$true] %s5672_s15 }
  0x4a   : > { %s5674_s30 = scalar_lea.hbm %s5673_s15, 192  ;;  %p5680_p4 = scmp.lt.s32.totalorder %s5673_s15, %s7658_s8 }
  0x4b   : > { %p5675_p2 = scmp.ne.s32.totalorder %s5673_s15, %s5674_s30  ;;  %p5681_p5 = scmp.lt.s32.totalorder %s5679_s0, %s5674_s30 }
  0x4d   : > { %p5677_p13 = pnand %p5675_p2, %p6196_p1  ;;  %p5682_p7 = por %p5681_p5, %p5680_p4 }
  0x4f   : > { %p5678_p3 = pneg %p5677_p13 }
  0x51   : > { %p5683_p8 = pnand %p5682_p7, %p5678_p3 }
  0x53   : > { %5686 = shalt.err (!%p5683_p8)
}
  0x54   : > { %s7625_s24 = smov 192   ;;  %s7626_s6 = smov 12  }
  0x55   : > { %5434 = dma.hbm_to_vmem [thread:$0]  (!%p6178_p12), %s539_s2, 3072, %s541_s17, %s7627_s4, %s7625_s24, %s7625_s24, %s7626_s6  }
  0x56   : > { %s4246_s3 = sshll.u32 %s6174_s16, 6  ;;  %s5199_s22 = sshll.u32 %s6026_s21, 6 }
  0x57   : > { %s581_s20 = scalar_lea.hbm %s7600_s10, %s5199_s22  ;;  %s576_s27 = scalar_lea.vmem [#allocation12], %s4246_s3 }
  0x58   : > { %s582_s18 = sshll.u32 %s581_s20, 4  ;;  %s584_s15 = sshll.u32 %s576_s27, 4  ;;  %s583_s18 = int_to_ptr.hbm [resolvable:$true] %s582_s18  ;;  %s585_s15 = int_to_ptr.vmem [resolvable:$true] %s584_s15 }
  0x59   : > { %s7630_s30 = scalar_lea.sflag [#allocation13], %s6183_s23  ;;  %s5702_s25 = sshra.s32 %s583_s18, 4  ;;  %s5703_s25 = int_to_ptr.hbm [resolvable:$true] %s5702_s25 }
  0x5a   : > { %s5704_s8 = scalar_lea.hbm %s5703_s25, 64  ;;  %s5709_s24 = scalar_lea.hbm %s7600_s10, 2048 }
  0x5b   : > { %p5705_p9 = scmp.ne.s32.totalorder %s5703_s25, %s5704_s8  ;;  %p5710_p3 = scmp.lt.s32.totalorder %s5703_s25, %s7600_s10 }
  0x5c   : > { %p5711_p4 = scmp.lt.s32.totalorder %s5709_s24, %s5704_s8 }
  0x5d   : > { %p5707_p2 = pnand %p5705_p9, %p6196_p1 }
  0x5e   : > { %p5712_p5 = por %p5711_p4, %p5710_p3 }
  0x5f   : > { %p5708_p13 = pneg %p5707_p2 }
  0x61   : > { %p5713_p7 = pnand %p5712_p5, %p5708_p13 }
  0x63   : > { %5716 = shalt.err (!%p5713_p7)
}
  0x64   : > { %s7628_s3 = smov 64   ;;  %s7629_s22 = smov 4  }
  0x65   : > { %5440 = dma.hbm_to_vmem [thread:$0]  (!%p6178_p12), %s583_s18, 1024, %s585_s15, %s7630_s30, %s7628_s3, %s7628_s3, %s7629_s22  }
  0x66   : > { %s4250_s6 = sshll.u32 %s6174_s16, 8  ;;  %s5200_s29 = sshll.u32 %s6026_s21, 8 }
  0x67   : > { %s625_s20 = scalar_lea.hbm %s7602_s12, %s5200_s29  ;;  %s620_s27 = scalar_lea.vmem [#allocation15], %s4250_s6 }
  0x68   : > { %s628_s25 = sshll.u32 %s620_s27, 4  ;;  %s626_s2 = sshll.u32 %s625_s20, 4  ;;  %s629_s25 = int_to_ptr.vmem [resolvable:$true] %s628_s25  ;;  %s627_s2 = int_to_ptr.hbm [resolvable:$true] %s626_s2 }
  0x69   : > { %s7631_s17 = scalar_lea.sflag [#allocation16], %s6183_s23  ;;  %s5732_s0 = sshra.s32 %s627_s2, 4  ;;  %s5733_s0 = int_to_ptr.hbm [resolvable:$true] %s5732_s0 }
  0x6a   : > { %s5734_s4 = scalar_lea.hbm %s5733_s0, 256  ;;  %s5739_s3 = scalar_lea.hbm %s7602_s12, 8192 }
  0x6b   : > { %p5735_p8 = scmp.ne.s32.totalorder %s5733_s0, %s5734_s4  ;;  %p5740_p13 = scmp.lt.s32.totalorder %s5733_s0, %s7602_s12 }
  0x6c   : > { %p5741_p3 = scmp.lt.s32.totalorder %s5739_s3, %s5734_s4 }
  0x6d   : > { %p5737_p9 = pnand %p5735_p8, %p6196_p1 }
  0x6e   : > { %p5742_p4 = por %p5741_p3, %p5740_p13 }
  0x6f   : > { %p5738_p2 = pneg %p5737_p9 }
  0x71   : > { %p5743_p5 = pnand %p5742_p4, %p5738_p2 }
  0x73   : > { %5746 = shalt.err (!%p5743_p5)
}
  0x74   : > { %s6032_s6 = smov 256   ;;  %s6033_s29 = smov 16  }
  0x75   : > { %5446 = dma.hbm_to_vmem [thread:$0]  (!%p6178_p12), %s627_s2, 4096, %s629_s25, %s7631_s17, %s6032_s6, %s6032_s6, %s6033_s29  }
  0x76   : > { %s7659_s24 = sshll.u32 %s6026_s21, 3  ;;  %s7660_s1 = sld [smem:[#allocation36_spill]] }
  0x77   : > { %s7661_s3 = sshll.u32 %s6174_s16, 3  ;;  %s472_s15 = scalar_lea.sflag [#allocation4], %s6174_s16 }
  0x78   : > { %s475_s0 = scalar_lea.vmem [#allocation3], %s7661_s3 }
  0x79   : > { %s483_s18 = sshll.u32 %s475_s0, 4  ;;  %s484_s18 = int_to_ptr.vmem [resolvable:$true] %s483_s18 }
  0x7c   : > { %s479_s22 = scalar_lea.hbm %s7660_s1, %s7659_s24  ;;  %s5769_s6 = scalar_lea.hbm %s7660_s1, 256 }
  0x7d   : > { %s481_s4 = sshll.u32 %s479_s22, 4  ;;  %s482_s4 = int_to_ptr.hbm [resolvable:$true] %s481_s4 }
  0x7e   : > { %s5762_s8 = sshra.s32 %s482_s4, 4  ;;  %s5763_s8 = int_to_ptr.hbm [resolvable:$true] %s5762_s8 }
  0x7f   : > { %s5764_s30 = scalar_lea.hbm %s5763_s8, 8  ;;  %p5770_p2 = scmp.lt.s32.totalorder %s5763_s8, %s7660_s1 }
  0x80   : > { %p5765_p7 = scmp.ne.s32.totalorder %s5763_s8, %s5764_s30  ;;  %p5771_p13 = scmp.lt.s32.totalorder %s5769_s6, %s5764_s30 }
  0x82   : > { %p5767_p8 = pnand %p5765_p7, %p6196_p1  ;;  %p5772_p3 = por %p5771_p13, %p5770_p2 }
  0x84   : > { %p5768_p9 = pneg %p5767_p8 }
  0x86   : > { %p5773_p4 = pnand %p5772_p3, %p5768_p9 }
  0x88   : > { %5776 = shalt.err (!%p5773_p4)
}
  0x89   : > { %5425 = dma.hbm_to_vmem [thread:$0]  (!%p6178_p12), %s482_s4, 128, %s484_s18, %s472_s15  }
  0x8a   : > { %s4240_s20 = sshll.u32 %s6174_s16, 1  ;;  %s4241_s27 = sshll.u32 %s6026_s21, 1 }
  0x8b   : > { %s7662_s7 = sld [smem:[#allocation42_spill]]  ;;  %s513_s2 = scalar_lea.vmem [#allocation8], %s4240_s20 }
  0x8c   : > { %s521_s29 = sshll.u32 %s513_s2, 4  ;;  %s522_s29 = int_to_ptr.vmem [resolvable:$true] %s521_s29 }
  0x91   : > { %s517_s0 = scalar_lea.hbm %s7662_s7, %s4241_s27  ;;  %s5799_s18 = scalar_lea.hbm %s7662_s7, 64 }
  0x92   : > { %s519_s25 = sshll.u32 %s517_s0, 4  ;;  %s520_s25 = int_to_ptr.hbm [resolvable:$true] %s519_s25 }
  0x93   : > { %s5792_s30 = sshra.s32 %s520_s25, 4  ;;  %s5793_s30 = int_to_ptr.hbm [resolvable:$true] %s5792_s30 }
  0x94   : > { %s5794_s8 = scalar_lea.hbm %s5793_s30, 2  ;;  %p5800_p9 = scmp.lt.s32.totalorder %s5793_s30, %s7662_s7 }
  0x95   : > { %p5795_p5 = scmp.ne.s32.totalorder %s5793_s30, %s5794_s8  ;;  %p5801_p2 = scmp.lt.s32.totalorder %s5799_s18, %s5794_s8 }
  0x97   : > { %p5797_p7 = pnand %p5795_p5, %p6196_p1  ;;  %p5802_p13 = por %p5801_p2, %p5800_p9 }
  0x99   : > { %p5798_p8 = pneg %p5797_p7 }
  0x9b   : > { %p5803_p3 = pnand %p5802_p13, %p5798_p8 }
  0x9d   : > { %5806 = shalt.err (!%p5803_p3)
}
  0x9e   : > { %s7663_s20 = scalar_lea.sflag [#allocation7], %s6183_s23  ;;  %s7632_s27 = sshll.u32 %s6174_s16, 7 }
  0x9f   : > { %5431 = dma.hbm_to_vmem [thread:$0]  (!%p6178_p12), %s520_s25, 32, %s522_s29, %s7663_s20  }
  0xa0   : > { %s5198_s22 = sshll.u32 %s6026_s21, 7  ;;  %s554_s8 = scalar_lea.vmem [#allocation11], %s7632_s27 }
  0xa1   : > { %s559_s2 = scalar_lea.hbm %s7599_s9, %s5198_s22  ;;  %s562_s6 = sshll.u32 %s554_s8, 4  ;;  %s563_s6 = int_to_ptr.vmem [resolvable:$true] %s562_s6 }
  0xa2   : > { %s560_s30 = sshll.u32 %s559_s2, 4  ;;  %s5829_s15 = scalar_lea.hbm %s7599_s9, 4096  ;;  %s561_s30 = int_to_ptr.hbm [resolvable:$true] %s560_s30 }
  0xa3   : > { %s5822_s4 = sshra.s32 %s561_s30, 4  ;;  %s5823_s4 = int_to_ptr.hbm [resolvable:$true] %s5822_s4 }
  0xa4   : > { %s5824_s18 = scalar_lea.hbm %s5823_s4, 128  ;;  %p5830_p8 = scmp.lt.s32.totalorder %s5823_s4, %s7599_s9 }
  0xa5   : > { %p5825_p4 = scmp.ne.s32.totalorder %s5823_s4, %s5824_s18  ;;  %p5831_p9 = scmp.lt.s32.totalorder %s5829_s15, %s5824_s18 }
  0xa7   : > { %p5827_p5 = pnand %p5825_p4, %p6196_p1  ;;  %p5832_p2 = por %p5831_p9, %p5830_p8 }
  0xa9   : > { %p5828_p7 = pneg %p5827_p5 }
  0xab   : > { %p5833_p13 = pnand %p5832_p2, %p5828_p7 }
  0xad   : > { %5836 = shalt.err (!%p5833_p13)
}
  0xae   : > { %s6034_s3 = smov 128   ;;  %s6035_s0 = smov 8  }
  0xaf   : > { %s7664_s2 = scalar_lea.sflag [#allocation10], %s6183_s23  ;;  %s5396_s8 = smul.u32 768, %s6174_s16 }
  0xb0   : > { %5437 = dma.hbm_to_vmem [thread:$0]  (!%p6178_p12), %s561_s30, 2048, %s563_s6, %s7664_s2, %s6034_s3, %s6034_s3, %s6035_s0  }
  0xb1   : > { %s5397_s25 = smul.u32 768, %s6026_s21  ;;  %s647_s4 = scalar_lea.hbm %s7603_s13, %s5198_s22 }
  0xb2   : > { %s648_s18 = sshll.u32 %s647_s4, 4  ;;  %s598_s27 = scalar_lea.vmem [#allocation14], %s5396_s8  ;;  %s6341_s18 = int_to_ptr.hbm [resolvable:$true] %s648_s18 }
  0xb3   : > { %s603_s20 = scalar_lea.hbm %s7601_s11, %s5397_s25  ;;  %s606_s1 = sshll.u32 %s598_s27, 4  ;;  %s607_s1 = int_to_ptr.vmem [resolvable:$true] %s606_s1 }
  0xb4   : > { %s604_s7 = sshll.u32 %s603_s20, 4  ;;  %s5859_s3 = scalar_lea.hbm %s7601_s11, 24576  ;;  %s605_s7 = int_to_ptr.hbm [resolvable:$true] %s604_s7 }
  0xb5   : > { %s5852_s30 = sshra.s32 %s605_s7, 4  ;;  %s5853_s30 = int_to_ptr.hbm [resolvable:$true] %s5852_s30 }
  0xb6   : > { %s5854_s6 = scalar_lea.hbm %s5853_s30, 768  ;;  %p5860_p7 = scmp.lt.s32.totalorder %s5853_s30, %s7601_s11 }
  0xb7   : > { %p5855_p3 = scmp.ne.s32.totalorder %s5853_s30, %s5854_s6  ;;  %p5861_p8 = scmp.lt.s32.totalorder %s5859_s3, %s5854_s6 }
  0xb9   : > { %p5857_p4 = pnand %p5855_p3, %p6196_p1  ;;  %p5862_p9 = por %p5861_p8, %p5860_p7 }
  0xbb   : > { %p5858_p5 = pneg %p5857_p4 }
  0xbd   : > { %p5863_p2 = pnand %p5862_p9, %p5858_p5 }
  0xbf   : > { %5866 = shalt.err (!%p5863_p2)
}
  0xc0   : > { %s7665_s27 = smov 12   ;;  %s7666_s8 = smov 192  }
  0xc1   : > { %s7667_s25 = scalar_lea.sflag [#allocation13], %s6183_s23  ;;  %s7668_s29 = sshll.u32 %s6174_s16, 7 }
  0xc2   : > { %5443 = dma.hbm_to_vmem [thread:$0]  (!%p6178_p12), %s605_s7, 12288, %s607_s1, %s7667_s25, %s7666_s8, %s7666_s8, %s7665_s27  }
  0xc3   : > { %s642_s4 = scalar_lea.vmem [#allocation17], %s7668_s29  ;;  %s5882_s24 = sshra.s32 %s6341_s18, 4  ;;  %s5883_s24 = int_to_ptr.hbm [resolvable:$true] %s5882_s24 }
  0xc4   : > { %s650_s15 = sshll.u32 %s642_s4, 4  ;;  %s5884_s20 = scalar_lea.hbm %s5883_s24, 128  ;;  %s651_s15 = int_to_ptr.vmem [resolvable:$true] %s650_s15 }
  0xc5   : > { %p5885_p13 = scmp.ne.s32.totalorder %s5883_s24, %s5884_s20  ;;  %s5889_s17 = scalar_lea.hbm %s7603_s13, 4096 }
  0xc6   : > { %p5890_p5 = scmp.lt.s32.totalorder %s5883_s24, %s7603_s13  ;;  %p5891_p7 = scmp.lt.s32.totalorder %s5889_s17, %s5884_s20 }
  0xc7   : > { %p5887_p3 = pnand %p5885_p13, %p6196_p1 }
  0xc8   : > { %p5892_p8 = por %p5891_p7, %p5890_p5 }
  0xc9   : > { %p5888_p4 = pneg %p5887_p3 }
  0xcb   : > { %p5893_p9 = pnand %p5892_p8, %p5888_p4 }
  0xcd   : > { %5896 = shalt.err (!%p5893_p9)
}
  0xce   : > { %s7669_s1 = smov 4   ;;  %s7670_s7 = smov 64  }
  0xcf   : > { %s7671_s5 = scalar_lea.sflag [#allocation16], %s6183_s23  ;;  %662 = sbr.rel (%p6216_p0) target bundleno = 4963 (0x1363), region = 76 }
  0xd0   : > { %5449 = dma.hbm_to_vmem [thread:$0]  (!%p6178_p12), %s6341_s18, 2048, %s651_s15, %s7671_s5, %s7670_s7, %s7670_s7, %s7669_s1  }
  0xd1   : > { %s6380_s16 = sand.u32 (!%p6216_p0), 1, %s6018_s19  }
  0xd2   : > { %s6383_s0 = sshll.u32 (!%p6216_p0), %s6380_s16, 3  ;;  %s665_s26 = scalar_lea.sflag (!%p6216_p0), [#allocation4], %s6380_s16 }
  0xd3   : > { %s668_s2 = scalar_lea.vmem (!%p6216_p0), [#allocation3], %s6383_s0 }
  0xd4   : > { %5985 = dma.done.wait (%p6159_p6), %s665_s26, 128  }
  0xd5   : > { %5987 = vsyncadd (%p6159_p6), %s665_s26, 4294967168  ;;  %s7672_s23 = sld [smem:[#allocation30_spill]]  ;;  %s678_s27 = scalar_lea.vmem [#allocation6], %s6383_s0 }
  0xdb   : > { %s674_s14 = sand.u32 1, %s7672_s23  }
  0xdc   : > { %s675_s18 = scalar_lea.sflag [#allocation7], %s674_s14 }
  0xdd   : > { %5989 = dma.done.wait (%p6159_p6), %s675_s18, 160  }
  0xde   : > { %5991 = vsyncadd (%p6159_p6), %s675_s18, 4294967136  ;;  %s4259_s8 = sshll.u32 %s6380_s16, 1  ;;  %s5398_s25 = smul.u32 192, %s6380_s16 }
  0xdf   : > { %s6399_s29 = scalar_lea.vmem [#allocation8], %s4259_s8  ;;  %s695_s4 = scalar_lea.sflag [#allocation10], %s674_s14 }
  0xe0   : > { %s6401_s15 = scalar_lea.vmem [#allocation9], %s5398_s25 }
  0xe1   : > { %5993 = dma.done.wait (%p6159_p6), %s695_s4, 5120  }
  0xe2   : > { %5995 = vsyncadd (%p6159_p6), %s695_s4, 4294962176  ;;  %s4260_s24 = sshll.u32 %s6380_s16, 7  ;;  %s4261_s20 = sshll.u32 %s6380_s16, 6 }
  0xe3   : > { %s6409_s30 = scalar_lea.vmem [#allocation11], %s4260_s24  ;;  %s715_s6 = scalar_lea.sflag [#allocation13], %s674_s14 }
  0xe4   : > { %s6411_s17 = scalar_lea.vmem [#allocation12], %s4261_s20 }
  0xe5   : > { %5997 = dma.done.wait (%p6159_p6), %s715_s6, 13312  }
  0xe6   : > { %5999 = vsyncadd (%p6159_p6), %s715_s6, 4294953984  ;;  %s5399_s22 = smul.u32 768, %s6380_s16  ;;  %s4262_s3 = sshll.u32 %s6380_s16, 8 }
  0xe7   : > { %s735_s7 = scalar_lea.sflag [#allocation16], %s674_s14  ;;  %s6421_s5 = scalar_lea.vmem [#allocation15], %s4262_s3 }
  0xe8   : > { %s6419_s1 = scalar_lea.vmem [#allocation14], %s5399_s22 }
  0xe9   : > { %6001 = dma.done.wait (%p6159_p6), %s735_s7, 6144  }
  0xea   : > { %6003 = vsyncadd (%p6159_p6), %s735_s7, 4294961152  ;;  %s6427_s26 = scalar_lea.vmem [#allocation17], %s4260_s24  ;;  %s833_s18 = scalar_lea.vmem [#allocation18], %s6383_s0 }
  0xeb   : > { %p4266_p12 = scmp.ne.s32.totalorder %s7672_s23, 0 }
  0xec   : > { %s7673_s20 = sld [smem:[#allocation35_spill]] (!%p4266_p12) }
  0xed   : > { %844 = sbr.rel (%p4266_p12) target bundleno = 248 (0xf8), region = 116 }
  0xf2   : > { %s7674_s6 = smov %s7673_s20  ;;  %v845_v0 = vld [vmem:[%s7673_s20] sm:$0xff] }
  0xf3   : > { %v846_v1 = vld [vmem:[%s7674_s6 + $0x8] sm:$0xff]  ;;  %v847_v2 = vld [vmem:[%s7674_s6 + $0x10] sm:$0xff]  ;;  %850 = vst [vmem:[#allocation2 + $0x8] sm:$0xff] %v845_v0  ;;  %v848_v3 = vld [vmem:[%s7674_s6 + $0x18] sm:$0xff] }
  0xf4   : > { %851 = vst [vmem:[#allocation2] sm:$0xff] %v846_v1  ;;  %v849_v4 = vld [vmem:[%s7674_s6 + $0x20] sm:$0xff] }
  0xf5   : > { %852 = vst [vmem:[#allocation2 + $0x20] sm:$0xff] %v847_v2 }
  0xf6   : > { %853 = vst [vmem:[#allocation2 + $0x10] sm:$0xff] %v848_v3 }
  0xf7   : > { %854 = vst [vmem:[#allocation2 + $0x18] sm:$0xff] %v849_v4 }
  0xf8 PF: > { %v4328_v6 = vld [vmem:[%s6409_s30 + $0x70] sm:$0xf]  ;;  %v5217_v7 = vld [vmem:[%s6409_s30 + $0x74] sm:$0xf0]  ;;  %v5216_v10 = vld [vmem:[%s6409_s30 + $0x74] sm:$0xf] }
  0xf9   : > { %v4329_v9 = vor.u32 %v5217_v7, %v4328_v6  ;;  %v4330_v11 = vld [vmem:[%s6409_s30 + $0x78] sm:$0xf0]  ;;  %v4320_v12 = vld [vmem:[%s6409_s30 + $0x60] sm:$0xf]  ;;  %v5215_v14 = vld [vmem:[%s6409_s30 + $0x64] sm:$0xf0] }
  0xfa   : > { %v6447_v5 = vld [vmem:[#allocation2 + $0x8] sm:$0xff]  ;;  %v4333_v13 = vor.u32 %v5216_v10, %v4330_v11  ;;  %v5214_v15 = vld [vmem:[%s6409_s30 + $0x64] sm:$0xf]  ;;  %v4322_v16 = vld [vmem:[%s6409_s30 + $0x68] sm:$0xf0]  ;;  %v4321_v17 = vor.u32 %v5215_v14, %v4320_v12  ;;  %vm1370_vm4 = vcmask 261120  }
  0xfb   : > { %v927_v8 = vmul.f32 %v6447_v5, %v6447_v5  ;;  %1124 = vmatpush.bf16.msra.mxu0 %v4329_v9  ;;  %v4325_v18 = vor.u32 %v5214_v15, %v4322_v16  ;;  %v4312_v19 = vld [vmem:[%s6409_s30 + $0x50] sm:$0xf]  ;;  %v5213_v20 = vld [vmem:[%s6409_s30 + $0x54] sm:$0xf0]  ;;  %v5212_v21 = vld [vmem:[%s6409_s30 + $0x54] sm:$0xf] }
  0xfc   : > { %1137 = vmatpush.bf16.msra.mxu3 %v4333_v13  ;;  %v4314_v22 = vld [vmem:[%s6409_s30 + $0x58] sm:$0xf0]  ;;  %v4313_v23 = vor.u32 %v5213_v20, %v4312_v19  ;;  %v4304_v25 = vld [vmem:[%s6409_s30 + $0x40] sm:$0xf]  ;;  %v5211_v26 = vld [vmem:[%s6409_s30 + $0x44] sm:$0xf0] }
  0xfd   : > { %932 = vadd.xlane.f32.xlu0 %v927_v8  ;;  %v4317_v24 = vor.u32 %v5212_v21, %v4314_v22  ;;  %v5210_v27 = vld [vmem:[%s6409_s30 + $0x44] sm:$0xf]  ;;  %v4306_v28 = vld [vmem:[%s6409_s30 + $0x48] sm:$0xf0]  ;;  %v4305_v29 = vor.u32 %v5211_v26, %v4304_v25  ;;  %v4420_v30 = vld [vmem:[%s6401_s15 + $0xa8] sm:$0xf] }
  0xfe   : > { %v5240_v31 = vld [vmem:[%s6401_s15 + $0xb0] sm:$0xf0]  ;;  %v4309_v32 = vor.u32 %v5210_v27, %v4306_v28  ;;  %v4296_v33 = vld [vmem:[%s6409_s30 + $0x30] sm:$0xf]  ;;  %v5209_v34 = vld [vmem:[%s6409_s30 + $0x34] sm:$0xf0] }
  0xff   : > { %1125 = vmatpush.bf16.msra.mxu0 %v4321_v17  ;;  %v4421_v35 = vor.u32 %v5240_v31, %v4420_v30  ;;  %v5208_v36 = vld [vmem:[%s6409_s30 + $0x34] sm:$0xf]  ;;  %v4298_v37 = vld [vmem:[%s6409_s30 + $0x38] sm:$0xf0]  ;;  %v4297_v38 = vor.u32 %v5209_v34, %v4296_v33  ;;  %v4288_v40 = vld [vmem:[%s6409_s30 + $0x20] sm:$0xf] }
 0x100   : > { %1138 = vmatpush.bf16.msra.mxu3 %v4325_v18  ;;  %v4301_v39 = vor.u32 %v5208_v36, %v4298_v37  ;;  %v5207_v41 = vld [vmem:[%s6409_s30 + $0x24] sm:$0xf0]  ;;  %v5206_v42 = vld [vmem:[%s6409_s30 + $0x24] sm:$0xf]  ;;  %v4290_v43 = vld [vmem:[%s6409_s30 + $0x28] sm:$0xf0] }
 0x101   : > { %1311 = vmatpush.bf16.msra.mxu2 %v4421_v35  ;;  %v4289_v44 = vor.u32 %v5207_v41, %v4288_v40  ;;  %v4293_v45 = vor.u32 %v5206_v42, %v4290_v43  ;;  %v4280_v46 = vld [vmem:[%s6409_s30 + $0x10] sm:$0xf]  ;;  %v5205_v47 = vld [vmem:[%s6409_s30 + $0x14] sm:$0xf0]  ;;  %v5204_v48 = vld [vmem:[%s6409_s30 + $0x14] sm:$0xf] }
 0x102   : > { %v4282_v49 = vld [vmem:[%s6409_s30 + $0x18] sm:$0xf0]  ;;  %v4281_v50 = vor.u32 %v5205_v47, %v4280_v46  ;;  %v4272_v52 = vld [vmem:[%s6409_s30] sm:$0xf]  ;;  %v5203_v53 = vld [vmem:[%s6409_s30 + $0x4] sm:$0xf0] }
 0x103   : > { %1126 = vmatpush.bf16.msra.mxu0 %v4313_v23  ;;  %v4285_v51 = vor.u32 %v5204_v48, %v4282_v49  ;;  %v5202_v54 = vld [vmem:[%s6409_s30 + $0x4] sm:$0xf]  ;;  %v4274_v55 = vld [vmem:[%s6409_s30 + $0x8] sm:$0xf0]  ;;  %v4428_v56 = vld [vmem:[%s6401_s15 + $0xb0] sm:$0xf]  ;;  %v4273_v60 = vor.u32 %v5203_v53, %v4272_v52 }
 0x104   : > { %1139 = vmatpush.bf16.msra.mxu3 %v4317_v24  ;;  %v5241_v57 = vld [vmem:[%s6401_s15 + $0xb8] sm:$0xf0]  ;;  %v5239_v58 = vld [vmem:[%s6401_s15 + $0xac] sm:$0xf]  ;;  %v4422_v59 = vld [vmem:[%s6401_s15 + $0xb4] sm:$0xf0]  ;;  %v4277_v61 = vor.u32 %v5202_v54, %v4274_v55 }
 0x105   : > { %v4429_v62 = vor.u32 %v5241_v57, %v4428_v56  ;;  %v4425_v63 = vor.u32 %v5239_v58, %v4422_v59  ;;  %v4408_v0 = vld [vmem:[%s6401_s15 + $0x90] sm:$0xf]  ;;  %v5237_v1 = vld [vmem:[%s6401_s15 + $0x98] sm:$0xf0]  ;;  %v5236_v2 = vld [vmem:[%s6401_s15 + $0x94] sm:$0xf] }
 0x106   : > { %v4409_v3 = vor.u32 %v5237_v1, %v4408_v0  ;;  %v4410_v4 = vld [vmem:[%s6401_s15 + $0x9c] sm:$0xf0]  ;;  %v4416_v6 = vld [vmem:[%s6401_s15 + $0x98] sm:$0xf]  ;;  %v5238_v7 = vld [vmem:[%s6401_s15 + $0xa0] sm:$0xf0] }
 0x107   : > { %1127 = vmatpush.bf16.msra.mxu0 %v4305_v29  ;;  %v4413_v8 = vor.u32 %v5236_v2, %v4410_v4  ;;  %v4417_v9 = vor.u32 %v5238_v7, %v4416_v6  ;;  %v1026_v10 = vld [vmem:[%s668_s2] sm:$0xff]  ;;  %v4396_v12 = vld [vmem:[%s6401_s15 + $0x78] sm:$0xf]  ;;  %v5235_v18 = vld [vmem:[%s6401_s15 + $0x88] sm:$0xf0]  ;;  %v6036_v19 = vmov 128.0  }
 0x108   : > { %1140 = vmatpush.bf16.msra.mxu3 %v4309_v32  ;;  %1312 = vmatpush.bf16.msra.mxu2 %v4409_v3  ;;  %v1027_v11 = vpack.c.bf16 %v1026_v10, %v1026_v10  ;;  %v5234_v13 = vld [vmem:[%s6401_s15 + $0x80] sm:$0xf0]  ;;  %v5233_v14 = vld [vmem:[%s6401_s15 + $0x7c] sm:$0xf]  ;;  %v4398_v16 = vld [vmem:[%s6401_s15 + $0x84] sm:$0xf0]  ;;  %5508 = vrcp.f32 %v6036_v19 }
 0x109   : > { %v4397_v15 = vor.u32 %v5234_v13, %v4396_v12  ;;  %v4404_v17 = vld [vmem:[%s6401_s15 + $0x80] sm:$0xf]  ;;  %v4401_v20 = vor.u32 %v5233_v14, %v4398_v16  ;;  %v5231_v23 = vld [vmem:[%s6401_s15 + $0x68] sm:$0xf0]  ;;  %v5230_v24 = vld [vmem:[%s6401_s15 + $0x64] sm:$0xf] }
 0x10a   : > { %v4405_v21 = vor.u32 %v5235_v18, %v4404_v17  ;;  %v4384_v22 = vld [vmem:[%s6401_s15 + $0x60] sm:$0xf]  ;;  %v4386_v26 = vld [vmem:[%s6401_s15 + $0x6c] sm:$0xf0]  ;;  %v4392_v27 = vld [vmem:[%s6401_s15 + $0x68] sm:$0xf] }
 0x10b   : > { %1128 = vmatpush.bf16.msra.mxu0 %v4297_v38  ;;  %v4385_v25 = vor.u32 %v5231_v23, %v4384_v22  ;;  %v5232_v28 = vld [vmem:[%s6401_s15 + $0x70] sm:$0xf0]  ;;  %v4389_v29 = vor.u32 %v5230_v24, %v4386_v26  ;;  %v4372_v32 = vld [vmem:[%s6401_s15 + $0x48] sm:$0xf]  ;;  %v5227_v34 = vld [vmem:[%s6401_s15 + $0x4c] sm:$0xf] }
 0x10c   : > { %1141 = vmatpush.bf16.msra.mxu3 %v4301_v39  ;;  %1313 = vmatpush.bf16.msra.mxu2 %v4397_v15  ;;  %v4393_v30 = vor.u32 %v5232_v28, %v4392_v27  ;;  %v5228_v33 = vld [vmem:[%s6401_s15 + $0x50] sm:$0xf0]  ;;  %v4374_v36 = vld [vmem:[%s6401_s15 + $0x54] sm:$0xf0]  ;;  %v4380_v37 = vld [vmem:[%s6401_s15 + $0x50] sm:$0xf] }
 0x10d   : > { %v4373_v35 = vor.u32 %v5228_v33, %v4372_v32  ;;  %v5229_v38 = vld [vmem:[%s6401_s15 + $0x58] sm:$0xf0]  ;;  %v4377_v39 = vor.u32 %v5227_v34, %v4374_v36  ;;  %v4360_v42 = vld [vmem:[%s6401_s15 + $0x30] sm:$0xf]  ;;  %v4362_v46 = vld [vmem:[%s6401_s15 + $0x3c] sm:$0xf0] }
 0x10e   : > { %v5509_v31 = vpop.eup %5508  ;;  %v4381_v40 = vor.u32 %v5229_v38, %v4380_v37  ;;  %v5225_v43 = vld [vmem:[%s6401_s15 + $0x38] sm:$0xf0]  ;;  %v4368_v47 = vld [vmem:[%s6401_s15 + $0x38] sm:$0xf]  ;;  %v5226_v48 = vld [vmem:[%s6401_s15 + $0x40] sm:$0xf0] }
 0x10f   : > { %1129 = vmatpush.bf16.msra.mxu0 %v4289_v44  ;;  %v943_v41 = vmul.f32 128.0, %v5509_v31  ;;  %v5224_v44 = vld [vmem:[%s6401_s15 + $0x34] sm:$0xf]  ;;  %v4348_v52 = vld [vmem:[%s6401_s15 + $0x18] sm:$0xf]  ;;  %vm947_vm0 = vweird.f32 %v5509_v31  ;;  %s6037_s2 = smov 32  }
 0x110   : > { %1142 = vmatpush.bf16.msra.mxu3 %v4293_v45  ;;  %1314 = vmatpush.bf16.msra.mxu2 %v4385_v25  ;;  %v4361_v45 = vor.u32 %v5225_v43, %v4360_v42  ;;  %v4365_v49 = vor.u32 %v5224_v44, %v4362_v46  ;;  %v5222_v53 = vld [vmem:[%s6401_s15 + $0x20] sm:$0xf0]  ;;  %v5221_v54 = vld [vmem:[%s6401_s15 + $0x1c] sm:$0xf]  ;;  %v4350_v56 = vld [vmem:[%s6401_s15 + $0x24] sm:$0xf0] }
 0x111   : > { %v4349_v55 = vor.u32 %v5222_v53, %v4348_v52  ;;  %v4356_v57 = vld [vmem:[%s6401_s15 + $0x20] sm:$0xf]  ;;  %v5223_v58 = vld [vmem:[%s6401_s15 + $0x28] sm:$0xf0]  ;;  %v4353_v59 = vor.u32 %v5221_v54, %v4350_v56  ;;  %v4338_v2 = vld [vmem:[%s6401_s15 + $0xc] sm:$0xf0] }
 0x112   : > { %v4344_v3 = vld [vmem:[%s6401_s15 + $0x8] sm:$0xf]  ;;  %v5220_v4 = vld [vmem:[%s6401_s15 + $0x10] sm:$0xf0]  ;;  %v926_v18 = vld [vmem:[%s6399_s29] sm:$0x3] }
 0x113   : > { %1130 = vmatpush.bf16.msra.mxu0 %v4281_v50  ;;  %v4369_v50 = vor.u32 %v5226_v48, %v4368_v47  ;;  %v4345_v7 = vor.u32 %v5220_v4, %v4344_v3  ;;  %vm1373_vm5 = vcmask 523264   ;;  %vm1376_vm6 = vcmask 785408   ;;  %s7675_s25 = sld [smem:[#allocation38_spill]]  ;;  %s6039_s7 = smov 64  }
 0x114   : > { %1143 = vmatpush.bf16.msra.mxu3 %v4285_v51  ;;  %1315 = vmatpush.bf16.msra.mxu2 %v4373_v35  ;;  %v944_v51 = vsub.f32 1.0, %v943_v41  ;;  %s7676_s14 = sld [smem:[#allocation39_spill]]  ;;  %vm1447_vm7 = vcmask 130048   ;;  %vm1883_vm11 = vcmask 195584   ;;  %s3941_s22 = sshll.u32 %s833_s18, 4  ;;  %s3942_s22 = int_to_ptr.vmem [resolvable:$true] %s3941_s22 }
 0x115   : > { %s7677_s8 = sld [smem:[#allocation40_spill]] }
 0x116   : > { %v945_v0 = vmul.f32 %v5509_v31, %v944_v51  ;;  %s7678_s23 = sld [smem:[#allocation41_spill]] }
 0x117   : > { %1131 = vmatpush.bf16.msra.mxu0 %v4273_v60  ;;  %v4357_v60 = vor.u32 %v5223_v58, %v4356_v57 }
 0x118   : > { %1144 = vmatpush.bf16.msra.mxu3 %v4277_v61  ;;  %1316 = vmatpush.bf16.msra.mxu2 %v4361_v45  ;;  %v4336_v61 = vld [vmem:[%s6401_s15] sm:$0xf] }
 0x11a   : > { %1132 = vmatmul.bf16.vlgmr.msra.gmra.mxu0 %v1027_v11 }
 0x11b   : > { %1337 = vmatpush.bf16.msrb.mxu0 %v4429_v62  ;;  %1145 = vmatmul.bf16.vlgmr.msra.gmra.mxu3 %v1027_v11  ;;  %v5219_v62 = vld [vmem:[%s6401_s15 + $0x8] sm:$0xf0] }
 0x11c   : > { %1324 = vmatpush.bf16.msrb.mxu3 %v4425_v63  ;;  %v5218_v63 = vld [vmem:[%s6401_s15 + $0x4] sm:$0xf]  ;;  %1317 = vmatpush.bf16.msra.mxu2 %v4349_v55  ;;  %v4337_v1 = vor.u32 %v5219_v62, %v4336_v61  ;;  %s6038_s15 = smov 96  }
 0x11d   : > { %v4341_v6 = vor.u32 %v5218_v63, %v4338_v2 }
 0x11f   : > { %1338 = vmatpush.bf16.msrb.mxu0 %v4417_v9 }
 0x120   : > { %1325 = vmatpush.bf16.msrb.mxu3 %v4413_v8  ;;  %v946_v8 = vadd.f32 %v5509_v31, %v945_v0  ;;  %1318 = vmatpush.bf16.msra.mxu2 %v4337_v1 }
 0x122   : > { %v6533_v9 = vsel %vm947_vm0, %v5509_v31, %v946_v8 }
 0x123   : > { %1339 = vmatpush.bf16.msrb.mxu0 %v4405_v21 }
 0x124   : > { %1326 = vmatpush.bf16.msrb.mxu3 %v4401_v20  ;;  %v6537_v20 = vperm.slane %v926_v18, 0 }
 0x127   : > { %1340 = vmatpush.bf16.msrb.mxu0 %v4393_v30 }
 0x128   : > { %1327 = vmatpush.bf16.msrb.mxu3 %v4389_v29 }
 0x12b   : > { %1341 = vmatpush.bf16.msrb.mxu0 %v4381_v40  ;;  %v1024_v40 = vld [vmem:[%s7676_s14 + $0x8] sm:$0xff] }
 0x12c   : > { %1328 = vmatpush.bf16.msrb.mxu3 %v4377_v39  ;;  %v1021_v39 = vld [vmem:[%s7675_s25 + $0x8] sm:$0xff] }
 0x12f   : > { %1342 = vmatpush.bf16.msrb.mxu0 %v4369_v50  ;;  %v1023_v50 = vld [vmem:[%s7676_s14] sm:$0xff] }
 0x130   : > { %1329 = vmatpush.bf16.msrb.mxu3 %v4365_v49  ;;  %v1020_v49 = vld [vmem:[%s7675_s25] sm:$0xff] }
 0x133   : > { %1343 = vmatpush.bf16.msrb.mxu0 %v4357_v60 }
 0x134   : > { %1330 = vmatpush.bf16.msrb.mxu3 %v4353_v59 }
 0x137   : > { %1344 = vmatpush.bf16.msrb.mxu0 %v4345_v7 }
 0x138   : > { %1331 = vmatpush.bf16.msrb.mxu3 %v4341_v6  ;;  %v1414_v6 = vld [vmem:[%s7677_s8] sm:$0xff]  ;;  %s3924_s8 = scalar_lea.sflag [#allocation5], %s6380_s16 }
 0x170   : > { %v933_v10 = vpop.xlane.xlu0 %932 }
 0x171   : > { %v949_v11 = vmul.f32 %v6533_v9, %v933_v10 }
 0x173   : > { %v954_v12 = vadd.f32 1e-06, %v949_v11  ;;  %v6601_v11 = vld [vmem:[#allocation2] sm:$0xff] }
 0x175   : > { %5510 = vrsqrt.f32 %v954_v12  ;;  %vm965_vm2 = vweird.f32 %v954_v12 }
 0x17b   : > { %v5511_v13 = vpop.eup %5510 }
 0x17c   : > { %v960_v14 = vmul.f32 %v5511_v13, %v954_v12  ;;  %vm966_vm1 = vweird.f32 %v5511_v13  ;;  %v928_v12 = vmul.f32 %v6601_v11, %v6601_v11 }
 0x17d   : > { %vm967_vm3 = vmor %vm965_vm2, %vm966_vm1 }
 0x17e   : > { %v961_v15 = vmul.f32 %v5511_v13, %v960_v14  ;;  %v5273_v14 = vld [vmem:[%s6419_s1 + $0xb8] sm:$0xf0] }
 0x180   : > { %v962_v16 = vmul.f32 0.5, %v961_v15 }
 0x182   : > { %v963_v17 = vsub.f32 1.5, %v962_v16  ;;  %v4552_v16 = vld [vmem:[%s6419_s1 + $0x98] sm:$0xf] }
 0x184   : > { %v964_v19 = vmul.f32 %v5511_v13, %v963_v17  ;;  %v5270_v17 = vld [vmem:[%s6419_s1 + $0xa0] sm:$0xf0] }
 0x185   : > { %v4553_v18 = vor.u32 %v5270_v17, %v4552_v16  ;;  %v4508_v16 = vld [vmem:[%s6419_s1 + $0x48] sm:$0xf]  ;;  %v5260_v17 = vld [vmem:[%s6419_s1 + $0x50] sm:$0xf0] }
 0x186   : > { %v968_v21 = vsel %vm967_vm3, %v5511_v13, %v964_v19  ;;  %v4564_v13 = vld [vmem:[%s6419_s1 + $0xb0] sm:$0xf]  ;;  %v4540_v19 = vld [vmem:[%s6419_s1 + $0x80] sm:$0xf] }
 0x187   : > { %v1009_v22 = vmul.f32 %v968_v21, %v6447_v5  ;;  %v4565_v15 = vor.u32 %v5273_v14, %v4564_v13  ;;  %v5267_v21 = vld [vmem:[%s6419_s1 + $0x88] sm:$0xf0]  ;;  %v4520_v13 = vld [vmem:[%s6419_s1 + $0x60] sm:$0xf] }
 0x188   : > { %v5263_v14 = vld [vmem:[%s6419_s1 + $0x68] sm:$0xf0] }
 0x189   : > { %v1015_v23 = vmul.f32 %v6537_v20, %v1009_v22  ;;  %1812 = vmatpush.bf16.msra.mxu0 %v4565_v15  ;;  %v4541_v22 = vor.u32 %v5267_v21, %v4540_v19  ;;  %v4521_v15 = vor.u32 %v5263_v14, %v4520_v13  ;;  %v4496_v21 = vld [vmem:[%s6419_s1 + $0x30] sm:$0xf] }
 0x18b   : > { %v1150_v24 = vpack.c.bf16 %v1015_v23, %v1015_v23  ;;  %v4528_v23 = vld [vmem:[%s6419_s1 + $0x68] sm:$0xf] }
 0x18d   : > { %1319 = vmatmul.bf16.vlgmr.msra.gmra.mxu2 %v1150_v24  ;;  %1332 = vmatmul.bf16.vlgmr.msrb.gmra.mxu3 %v1150_v24 }
 0x18e   : > { %1345 = vmatmul.bf16.vlgmr.msrb.gmra.mxu0 %v1150_v24  ;;  %v5264_v24 = vld [vmem:[%s6419_s1 + $0x70] sm:$0xf0] }
 0x18f   : > { %1813 = vmatpush.bf16.msra.mxu0 %v4553_v18  ;;  %v4509_v18 = vor.u32 %v5260_v17, %v4508_v16  ;;  %v6690_v16 = vld [vmem:[%s6411_s17 + $0x30] sm:$0xff] }
 0x193   : > { %1814 = vmatpush.bf16.msra.mxu0 %v4541_v22  ;;  %v5257_v22 = vld [vmem:[%s6419_s1 + $0x38] sm:$0xf0] }
 0x197   : > { %v1133_v25 = vpop.f32.mrf.mxu0 }
 0x198   : > { %1364 = vrot.lane.b32.xlu2 %v1133_v25, %s6037_s2  ;;  %v1352_v34 = vsub.f32 0.0, %v1133_v25  ;;  %v1350_v54 = vmul.f32 %v1133_v25, %v1020_v49  ;;  %v4529_v25 = vor.u32 %v5264_v24, %v4528_v23 }
 0x19a   : > { %1815 = vmatpush.bf16.msra.mxu0 %v4529_v25  ;;  %v4497_v25 = vor.u32 %v5257_v22, %v4496_v21  ;;  %v6705_v21 = vld [vmem:[%s6411_s17 + $0x18] sm:$0xff] }
 0x19e   : > { %v6542_v26 = vpop.f32.mrf.mxu3 }
 0x19f   : > { %v1135_v27 = vpop.f32.mrf.mxu0 }
 0x1a0   : > { %v4516_v27 = vld [vmem:[%s6419_s1 + $0x50] sm:$0xf] }
 0x1a6   : > { %v1148_v28 = vpop.f32.mrf.mxu3 }
 0x1a7   : > { %v5261_v28 = vld [vmem:[%s6419_s1 + $0x58] sm:$0xf0] }
 0x1f2   : > { %v1365_v45 = vpop.permute.xlu2 %1364 }
 0x20b   : > { %v6544_v29 = vpop.f32.mrf.mxu0 }
 0x210   : > { %v1320_v30 = vpop.f32.mrf.mxu2  ;;  %v1333_v31 = vpop.f32.mrf.mxu3 }
 0x211   : > { %v1384_v32 = vsub.f32 0.0, %v1320_v30  ;;  %v1353_v5 = vsub.f32 0.0, %v1333_v31  ;;  %1366 = vrot.lane.b32.xlu1 %v1333_v31, %s6037_s2  ;;  %v1351_v44 = vmul.f32 %v1333_v31, %v1021_v39  ;;  %v1383_v62 = vmul.f32 %v1320_v30, %v1021_v39  ;;  %v4504_v31 = vld [vmem:[%s6419_s1 + $0x38] sm:$0xf]  ;;  %v4480_v39 = vld [vmem:[%s6419_s1 + $0x8] sm:$0xf] }
 0x213   : > { %v1348_v33 = vpop.f32.mrf.mxu0  ;;  %1358 = vrot.lane.b32.xlu0 %v1353_v5, %s6038_s15  ;;  %1386 = vrot.lane.b32.xlu2 %v1384_v32, %s6038_s15  ;;  %v5258_v32 = vld [vmem:[%s6419_s1 + $0x40] sm:$0xf0] }
 0x214   : > { %v4505_v5 = vor.u32 %v5258_v32, %v4504_v31  ;;  %v4472_v31 = vld [vmem:[%s6419_s1] sm:$0xf]  ;;  %v5251_v32 = vld [vmem:[%s6419_s1 + $0x8] sm:$0xf0] }
 0x218   : > { %v1322_v35 = vpop.f32.mrf.mxu2  ;;  %v1335_v36 = vpop.f32.mrf.mxu3 }
 0x219   : > { %1356 = vrot.lane.b32.xlu1 %v1352_v34, %s6038_s15  ;;  %v4492_v35 = vld [vmem:[%s6419_s1 + $0x20] sm:$0xf]  ;;  %v5255_v36 = vld [vmem:[%s6419_s1 + $0x28] sm:$0xf0] }
 0x221   : > { %1390 = vrot.lane.b32.xlu1 %v1320_v30, %s6037_s2  ;;  %v4517_v30 = vor.u32 %v5261_v28, %v4516_v27  ;;  %v4484_v27 = vld [vmem:[%s6419_s1 + $0x18] sm:$0xf]  ;;  %v5254_v28 = vld [vmem:[%s6419_s1 + $0x20] sm:$0xf0] }
 0x223   : > { %1816 = vmatpush.bf16.msra.mxu0 %v4517_v30  ;;  %v4485_v30 = vor.u32 %v5254_v28, %v4484_v27  ;;  %v6715_v27 = vld [vmem:[%s6411_s17 + $0x10] sm:$0xff]  ;;  %v6719_v28 = vld [vmem:[%s6411_s17 + $0x8] sm:$0xff] }
 0x227   : > { %1817 = vmatpush.bf16.msra.mxu0 %v4505_v5 }
 0x26d   : > { %v1387_v57 = vpop.permute.xlu2 %1386 }
 0x283   : > { %v1367_v37 = vpop.permute.xlu1 %1366 }
 0x285   : > { %v1359_v38 = vpop.permute.xlu0 %1358 }
 0x286   : > { %v1372_v41 = vsel %vm1370_vm4, %v1359_v38, %v1367_v37 }
 0x287   : > { %v1375_v42 = vsel %vm1373_vm5, %v1372_v41, %v1359_v38 }
 0x288   : > { %v1378_v43 = vsel %vm1376_vm6, %v1375_v42, %v1367_v37  ;;  %v4493_v37 = vor.u32 %v5255_v36, %v4492_v35 }
 0x289   : > { %v1380_v46 = vmul.f32 %v1378_v43, %v1024_v40 }
 0x28a   : > { %1818 = vmatpush.bf16.msra.mxu0 %v4493_v37 }
 0x28b   : > { %v6560_v47 = vadd.f32 %v1380_v46, %v1351_v44  ;;  %v1357_v48 = vpop.permute.xlu1 %1356 }
 0x28c   : > { %v1371_v51 = vsel %vm1370_vm4, %v1357_v48, %v1365_v45 }
 0x28d   : > { %v1374_v52 = vsel %vm1373_vm5, %v1371_v51, %v1357_v48  ;;  %4430 = vmatpush.xpose.msk.msra.mxu1 %vm1373_vm5, %v6560_v47  ;;  %1486 = vrot.lane.b32.xlu2 %v6560_v47, %s6039_s7 }
 0x28e   : > { %v1377_v53 = vsel %vm1376_vm6, %v1374_v52, %v1365_v45 }
 0x28f   : > { %v1379_v55 = vmul.f32 %v1377_v53, %v1023_v50 }
 0x291   : > { %v6575_v56 = vadd.f32 %v1379_v55, %v1350_v54 }
 0x293   : > { %4431 = vmatpush.xpose.msk.msra.mxu1 %vm1373_vm5, %v6575_v56  ;;  %1484 = vrot.lane.b32.xlu1 %v6575_v56, %s6039_s7  ;;  %v1391_v58 = vpop.permute.xlu1 %1390 }
 0x294   : > { %v1393_v59 = vsel %vm1370_vm4, %v1387_v57, %v1391_v58 }
 0x295   : > { %v1394_v60 = vsel %vm1373_vm5, %v1393_v59, %v1387_v57  ;;  %v5503_v57 = vpack.i.bf16 %v6542_v26, %v6544_v29 }
 0x296   : > { %v1395_v61 = vsel %vm1376_vm6, %v1394_v60, %v1391_v58 }
 0x297   : > { %1476 = vmatpush.msrb.mxu1 %v6544_v29  ;;  %v1396_v63 = vmul.f32 %v1395_v61, %v1024_v40  ;;  %v5252_v40 = vld [vmem:[%s6419_s1 + $0x10] sm:$0xf0] }
 0x298   : > { %v4481_v43 = vor.u32 %v5252_v40, %v4480_v39  ;;  %v4558_v39 = vld [vmem:[%s6419_s1 + $0xb4] sm:$0xf0] }
 0x299   : > { %1477 = vmatpush.msrb.mxu1 %v6542_v26  ;;  %v1397_v0 = vadd.f32 %v1396_v63, %v1383_v62 }
 0x29a   : > { %1819 = vmatpush.bf16.msra.mxu0 %v4481_v43 }
 0x29b   : > { %1482 = vrot.lane.b32.xlu2 %v1397_v0, %s6039_s7  ;;  %4432 = vmatmul.msk.f32.vlgmr.msra.gmra.mxu1 %vm1373_vm5, %v1397_v0  ;;  %v4556_v0 = vld [vmem:[%s6419_s1 + $0xa8] sm:$0xf] }
 0x2e7   : > { %v6588_v1 = vpop.permute.xlu2 %1486 }
 0x2e8   : > { %4434 = vmatpush.xpose.msk.msra.mxu3 %vm1373_vm5, %v6588_v1 }
 0x2f5   : > { %v1483_v3 = vpop.permute.xlu2 %1482 }
 0x305   : > { %v6592_v2 = vpop.permute.xlu1 %1484 }
 0x306   : > { %4435 = vmatpush.xpose.msk.msra.mxu3 %vm1373_vm5, %v6592_v2 }
 0x309   : > { %4436 = vmatmul.msk.f32.vlgmr.msra.gmra.mxu3 %vm1373_vm5, %v1483_v3  ;;  %v5272_v3 = vld [vmem:[%s6419_s1 + $0xb0] sm:$0xf0] }
 0x318   : > { %v1442_v4 = vpop.f32.mrf.mxu1 }
 0x319   : > { %v1445_v7 = vmul.f32 0.125, %v1442_v4  ;;  %v4557_v4 = vor.u32 %v5272_v3, %v4556_v0  ;;  %v5253_v0 = vld [vmem:[%s6419_s1 + $0x1c] sm:$0xf]  ;;  %v4486_v3 = vld [vmem:[%s6419_s1 + $0x24] sm:$0xf0] }
 0x31b   : > { %v1446_v8 = vadd.f32 %v1445_v7, %v1414_v6  ;;  %1786 = vmatpush.bf16.msrb.mxu3 %v4557_v4  ;;  %v5269_v7 = vld [vmem:[%s6419_s1 + $0x98] sm:$0xf0]  ;;  %v4489_v4 = vor.u32 %v5253_v0, %v4486_v3 }
 0x31d   : > { %v1448_v10 = vsel %vm1447_vm7, %v1446_v8, -inf }
 0x31e   : > { %1449 = vmax.xlane.f32.xlu0 %v1448_v10  ;;  %v4532_v10 = vld [vmem:[%s6419_s1 + $0x78] sm:$0xf] }
 0x326   : > { %934 = vadd.xlane.f32.xlu0 %v928_v12 }
 0x38c   : > { %v1511_v33 = vpop.f32.mrf.mxu3 }
 0x38d   : > { %v1514_v34 = vmul.f32 0.125, %v1511_v33  ;;  %v4473_v33 = vor.u32 %v5251_v32, %v4472_v31 }
 0x38f   : > { %v1515_v38 = vadd.f32 %v1514_v34, %v1414_v6  ;;  %v4544_v6 = vld [vmem:[%s6419_s1 + $0x90] sm:$0xf] }
 0x391   : > { %v1450_v41 = vpop.xlane.xlu0 %1449  ;;  %v1516_v42 = vsel %vm1447_vm7, %v1515_v38, -inf }
 0x392   : > { %v1451_v44 = vsub.f32 %v1446_v8, %v1450_v41  ;;  %1517 = vmax.xlane.f32.xlu1 %v1516_v42  ;;  %v4545_v8 = vor.u32 %v5269_v7, %v4544_v6  ;;  %v5250_v6 = vld [vmem:[%s6419_s1 + $0x4] sm:$0xf]  ;;  %v4474_v7 = vld [vmem:[%s6419_s1 + $0xc] sm:$0xf0] }
 0x394   : > { %v1452_v45 = vmul.f32 1.442695, %v1451_v44  ;;  %1787 = vmatpush.bf16.msrb.mxu3 %v4545_v8  ;;  %v5268_v44 = vld [vmem:[%s6419_s1 + $0x94] sm:$0xf]  ;;  %v4477_v8 = vor.u32 %v5250_v6, %v4474_v7  ;;  %v4702_v6 = vld [vmem:[%s6419_s1 + $0x170] sm:$0xf] }
 0x395   : > { %v5297_v7 = vld [vmem:[%s6419_s1 + $0x178] sm:$0xf0] }
 0x396   : > { %5512 = vpow2.f32 %v1452_v45  ;;  %v4546_v45 = vld [vmem:[%s6419_s1 + $0x9c] sm:$0xf0] }
 0x399   : > { %v935_v46 = vpop.xlane.xlu0 %934 }
 0x39a   : > { %v950_v48 = vmul.f32 %v6533_v9, %v935_v46  ;;  %v4549_v46 = vor.u32 %v5268_v44, %v4546_v45 }
 0x39c   : > { %v6623_v49 = vpop.eup %5512  ;;  %v955_v50 = vadd.f32 1e-06, %v950_v48  ;;  %v5265_v48 = vld [vmem:[%s6419_s1 + $0x7c] sm:$0xf] }
 0x39d   : > { %v1454_v51 = vsel %vm1447_vm7, %v6623_v49, 0.0 }
 0x39e   : > { %5514 = vrsqrt.f32 %v955_v50  ;;  %1455 = vadd.xlane.f32.xlu2 %v1454_v51  ;;  %vm975_vm8 = vweird.f32 %v955_v50  ;;  %v5262_v51 = vld [vmem:[%s6419_s1 + $0x64] sm:$0xf] }
 0x3a4   : > { %v5515_v52 = vpop.eup %5514 }
 0x3a5   : > { %v970_v53 = vmul.f32 %v5515_v52, %v955_v50  ;;  %vm976_vm9 = vweird.f32 %v5515_v52 }
 0x3a6   : > { %vm977_vm10 = vmor %vm975_vm8, %vm976_vm9 }
 0x3a7   : > { %v971_v54 = vmul.f32 %v5515_v52, %v970_v53 }
 0x3a9   : > { %v972_v55 = vmul.f32 0.5, %v971_v54 }
 0x3ab   : > { %v973_v58 = vsub.f32 1.5, %v972_v55  ;;  %5504 = vrot.lane.b32.xlu1 %v5503_v57, %s6039_s7  ;;  %v5259_v57 = vld [vmem:[%s6419_s1 + $0x4c] sm:$0xf] }
 0x3ad   : > { %v974_v59 = vmul.f32 %v5515_v52, %v973_v58  ;;  %v4510_v58 = vld [vmem:[%s6419_s1 + $0x54] sm:$0xf0] }
 0x3af   : > { %v978_v60 = vsel %vm977_vm10, %v5515_v52, %v974_v59  ;;  %v4522_v52 = vld [vmem:[%s6419_s1 + $0x6c] sm:$0xf0]  ;;  %v4513_v59 = vor.u32 %v5259_v57, %v4510_v58 }
 0x3b0   : > { %v1010_v61 = vmul.f32 %v978_v60, %v6601_v11  ;;  %v5266_v11 = vld [vmem:[%s6419_s1 + $0x80] sm:$0xf0]  ;;  %v4525_v53 = vor.u32 %v5262_v51, %v4522_v52  ;;  %v5256_v60 = vld [vmem:[%s6419_s1 + $0x34] sm:$0xf] }
 0x3b1   : > { %v4533_v12 = vor.u32 %v5266_v11, %v4532_v10 }
 0x3b2   : > { %v1016_v62 = vmul.f32 %v6537_v20, %v1010_v61  ;;  %v4498_v61 = vld [vmem:[%s6419_s1 + $0x3c] sm:$0xf0] }
 0x3b3   : > { %1788 = vmatpush.bf16.msrb.mxu3 %v4533_v12 }
 0x3b4   : > { %v6632_v63 = vpack.c.bf16 %v1016_v62, %v1016_v62  ;;  %v4501_v62 = vor.u32 %v5256_v60, %v4498_v61 }
 0x3b6   : > { %1820 = vmatmul.bf16.vlgmr.msra.gmra.mxu0 %v6632_v63 }
 0x3b7   : > { %1789 = vmatpush.bf16.msrb.mxu3 %v4521_v15  ;;  %v6686_v15 = vld [vmem:[%s6411_s17 + $0x38] sm:$0xff] }
 0x3b8   : > { %1612 = vmatpush.bf16.msrb.mxu2 %v6686_v15  ;;  %1992 = vmatpush.bf16.msrb.mxu0 %v6686_v15 }
 0x3bb   : > { %1790 = vmatpush.bf16.msrb.mxu3 %v4509_v18  ;;  %v6695_v18 = vld [vmem:[%s6411_s17 + $0x28] sm:$0xff] }
 0x3bc   : > { %1613 = vmatpush.bf16.msrb.mxu2 %v6690_v16  ;;  %1993 = vmatpush.bf16.msrb.mxu0 %v6690_v16 }
 0x3bf   : > { %1791 = vmatpush.bf16.msrb.mxu3 %v4497_v25 }
 0x3c0   : > { %1614 = vmatpush.bf16.msrb.mxu2 %v6695_v18  ;;  %1994 = vmatpush.bf16.msrb.mxu0 %v6695_v18 }
 0x3c3   : > { %1792 = vmatpush.bf16.msrb.mxu3 %v4485_v30  ;;  %v6725_v30 = vld [vmem:[%s6411_s17] sm:$0xff] }
 0x3c7   : > { %1793 = vmatpush.bf16.msrb.mxu3 %v4473_v33 }
 0x3ca   : > { %1794 = vmatmul.bf16.vlgmr.msrb.gmra.mxu3 %v6632_v63 }
 0x405   : > { %v1518_v19 = vpop.xlane.xlu1 %1517 }
 0x406   : > { %v1519_v23 = vsub.f32 %v1515_v38, %v1518_v19  ;;  %v5271_v38 = vld [vmem:[%s6419_s1 + $0xac] sm:$0xf] }
 0x407   : > { %v4561_v42 = vor.u32 %v5271_v38, %v4558_v39  ;;  %v6740_v38 = vld [vmem:[%s7675_s25 + $0x10] sm:$0xff] }
 0x408   : > { %v1520_v24 = vmul.f32 1.442695, %v1519_v23 }
 0x40a   : > { %5516 = vpow2.f32 %v1520_v24 }
 0x410   : > { %v5517_v5 = vpop.eup %5516 }
 0x411   : > { %v1456_v34 = vpop.xlane.xlu2 %1455  ;;  %v1522_v35 = vsel %vm1447_vm7, %v5517_v5, 0.0 }
 0x412   : > { %5518 = vrcp.f32 %v1456_v34  ;;  %1523 = vadd.xlane.f32.xlu2 %v1522_v35  ;;  %v6733_v35 = vld [vmem:[%s7676_s14 + $0x10] sm:$0xff] }
 0x418   : > { %v5519_v36 = vpop.eup %5518 }
 0x419   : > { %v1458_v37 = vmul.f32 %v5519_v36, %v6623_v49  ;;  %v4534_v49 = vld [vmem:[%s6419_s1 + $0x84] sm:$0xf0] }
 0x41a   : > { %v4537_v50 = vor.u32 %v5265_v48, %v4534_v49 }
 0x41b   : > { %4433 = vmatmul.msk.f32.vlgmr.msrb.gmra.mxu1 %vm1447_vm7, %v1458_v37 }
 0x41d   : > { %v5505_v40 = vpop.permute.xlu1 %5504 }
 0x41e   : > { %v6657_v41 = vunpack.i.l.bf16 %v5505_v40  ;;  %v6659_v43 = vunpack.i.h.bf16 %v5505_v40 }
 0x420   : > { %1552 = vmatpush.msra.mxu1 %v6657_v41 }
 0x422   : > { %1553 = vmatpush.msra.mxu1 %v6659_v43 }
 0x424   : > { %1799 = vmatpush.bf16.msrb.mxu1 %v4561_v42 }
 0x428   : > { %1800 = vmatpush.bf16.msrb.mxu1 %v4549_v46 }
 0x42c   : > { %1801 = vmatpush.bf16.msrb.mxu1 %v4537_v50 }
 0x430   : > { %1802 = vmatpush.bf16.msrb.mxu1 %v4525_v53 }
 0x433   : > { %v6669_v54 = vpop.f32.mrf.mxu0 }
 0x434   : > { %1911 = vmatpush.msra.mxu3 %v6669_v54  ;;  %1803 = vmatpush.bf16.msrb.mxu1 %v4513_v59 }
 0x436   : > { %1912 = vmatpush.msra.mxu3 %v6544_v29 }
 0x438   : > { %1913 = vmatpush.msra.mxu3 %v6542_v26  ;;  %1804 = vmatpush.bf16.msrb.mxu1 %v4501_v62  ;;  %v6775_v62 = vld [vmem:[%s7678_s23] sm:$0xff] }
 0x43b   : > { %v1823_v55 = vpop.f32.mrf.mxu0 }
 0x43c   : > { %1805 = vmatpush.bf16.msrb.mxu1 %v4489_v4  ;;  %v6758_v55 = vld [vmem:[#allocation2 + $0x20] sm:$0xff] }
 0x43d   : > { %v929_v57 = vmul.f32 %v6758_v55, %v6758_v55 }
 0x440   : > { %1806 = vmatpush.bf16.msrb.mxu1 %v4477_v8  ;;  %v4690_v8 = vld [vmem:[%s6419_s1 + $0x158] sm:$0xf] }
 0x44d   : > { %v1795_v13 = vpop.f32.mrf.mxu3 }
 0x44e   : > { %1832 = vrot.lane.b32.xlu1 %v1795_v13, %s6037_s2  ;;  %v1826_v25 = vsub.f32 0.0, %v1795_v13  ;;  %v1825_v51 = vmul.f32 %v1795_v13, %v6740_v38  ;;  %v4678_v13 = vld [vmem:[%s6419_s1 + $0x140] sm:$0xf] }
 0x455   : > { %v1797_v14 = vpop.f32.mrf.mxu3 }
 0x456   : > { %v5291_v14 = vld [vmem:[%s6419_s1 + $0x148] sm:$0xf0] }
 0x485   : > { %v1524_v10 = vpop.xlane.xlu2 %1523 }
 0x486   : > { %5520 = vrcp.f32 %v1524_v10  ;;  %v4703_v10 = vor.u32 %v5297_v7, %v4702_v6 }
 0x48c   : > { %v5521_v11 = vpop.eup %5520 }
 0x48d   : > { %v1526_v12 = vmul.f32 %v5521_v11, %v5517_v5  ;;  %v5294_v11 = vld [vmem:[%s6419_s1 + $0x160] sm:$0xf0] }
 0x48f   : > { %4437 = vmatmul.msk.f32.vlgmr.msra.gmra.mxu1 %vm1447_vm7, %v1526_v12  ;;  %v4691_v12 = vor.u32 %v5294_v11, %v4690_v8 }
 0x497   : > { %1807 = vmatmul.bf16.vlgmr.msrb.gmra.mxu1 %v6632_v63  ;;  %v6700_v63 = vld [vmem:[%s6411_s17 + $0x20] sm:$0xff] }
 0x498   : > { %v1479_v17 = vpop.f32.mrf.mxu1  ;;  %1615 = vmatpush.bf16.msrb.mxu2 %v6700_v63  ;;  %1995 = vmatpush.bf16.msrb.mxu0 %v6700_v63 }
 0x49c   : > { %1616 = vmatpush.bf16.msrb.mxu2 %v6705_v21  ;;  %1996 = vmatpush.bf16.msrb.mxu0 %v6705_v21 }
 0x4a0   : > { %1617 = vmatpush.bf16.msrb.mxu2 %v6715_v27  ;;  %1997 = vmatpush.bf16.msrb.mxu0 %v6715_v27 }
 0x4a4   : > { %1618 = vmatpush.bf16.msrb.mxu2 %v6719_v28  ;;  %1998 = vmatpush.bf16.msrb.mxu0 %v6719_v28 }
 0x4a8   : > { %1619 = vmatpush.bf16.msrb.mxu2 %v6725_v30  ;;  %1999 = vmatpush.bf16.msrb.mxu0 %v6725_v30 }
 0x4c0   : > { %v1833_v45 = vpop.permute.xlu1 %1832 }
 0x50c   : > { %v1555_v19 = vpop.f32.mrf.mxu1 }
 0x514   : > { %v1808_v22 = vpop.f32.mrf.mxu1 }
 0x515   : > { %1847 = vrot.lane.b32.xlu2 %v1808_v22, %s6037_s2  ;;  %v1841_v23 = vsub.f32 0.0, %v1808_v22  ;;  %v1840_v40 = vmul.f32 %v1808_v22, %v6740_v38  ;;  %v5288_v22 = vld [vmem:[%s6419_s1 + $0x130] sm:$0xf0] }
 0x517   : > { %1843 = vrot.lane.b32.xlu0 %v1841_v23, %s6038_s15 }
 0x51c   : > { %v1810_v24 = vpop.f32.mrf.mxu1 }
 0x51d   : > { %1559 = vrot.lane.b32.xlu2 %v1555_v19, %s6039_s7  ;;  %v4666_v19 = vld [vmem:[%s6419_s1 + $0x128] sm:$0xf] }
 0x51e   : > { %v4667_v23 = vor.u32 %v5288_v22, %v4666_v19  ;;  %v4682_v19 = vld [vmem:[%s6419_s1 + $0x150] sm:$0xf]  ;;  %v5293_v22 = vld [vmem:[%s6419_s1 + $0x158] sm:$0xf0] }
 0x51f   : > { %1828 = vrot.lane.b32.xlu0 %v1826_v25, %s6038_s15 }
 0x56f   : > { %v1848_v31 = vpop.permute.xlu2 %1847 }
 0x577   : > { %v1560_v32 = vpop.permute.xlu2 %1559 }
 0x578   : > { %v1562_v5 = vsel %vm1373_vm5, %v1479_v17, %v1560_v32  ;;  %v4679_v17 = vor.u32 %v5291_v14, %v4678_v13 }
 0x579   : > { %v1563_v33 = vpack.c.bf16 %v1562_v5, %v1562_v5 }
 0x57b   : > { %1620 = vmatmul.bf16.vlgmr.msrb.gmra.mxu2 %v1563_v33 }
 0x589   : > { %v1844_v34 = vpop.permute.xlu0 %1843 }
 0x58a   : > { %v1850_v36 = vsel %vm1370_vm4, %v1844_v34, %v1848_v31 }
 0x58b   : > { %v1851_v37 = vsel %vm1373_vm5, %v1850_v36, %v1844_v34 }
 0x58c   : > { %v1852_v39 = vsel %vm1376_vm6, %v1851_v37, %v1848_v31 }
 0x58d   : > { %v1853_v42 = vmul.f32 %v1852_v39, %v6733_v35  ;;  %v4654_v39 = vld [vmem:[%s6419_s1 + $0x110] sm:$0xf] }
 0x58f   : > { %v1854_v44 = vadd.f32 %v1853_v42, %v1840_v40  ;;  %v5285_v40 = vld [vmem:[%s6419_s1 + $0x118] sm:$0xf0] }
 0x590   : > { %v4655_v42 = vor.u32 %v5285_v40, %v4654_v39  ;;  %v5281_v39 = vld [vmem:[%s6419_s1 + $0xf8] sm:$0xf0] }
 0x591   : > { %4566 = vmatpush.xpose.msk.msra.mxu2 %vm1373_vm5, %v1854_v44  ;;  %1920 = vrot.lane.b32.xlu0 %v1854_v44, %s6039_s7  ;;  %v1829_v46 = vpop.permute.xlu0 %1828 }
 0x592   : > { %v1835_v48 = vsel %vm1370_vm4, %v1829_v46, %v1833_v45 }
 0x593   : > { %v1836_v49 = vsel %vm1373_vm5, %v1835_v48, %v1829_v46  ;;  %v5282_v46 = vld [vmem:[%s6419_s1 + $0x100] sm:$0xf0] }
 0x594   : > { %v1837_v50 = vsel %vm1376_vm6, %v1836_v49, %v1833_v45  ;;  %v4642_v45 = vld [vmem:[%s6419_s1 + $0xf8] sm:$0xf]  ;;  %v4630_v49 = vld [vmem:[%s6419_s1 + $0xe0] sm:$0xf] }
 0x595   : > { %v1838_v52 = vmul.f32 %v1837_v50, %v6733_v35  ;;  %4567 = vmatpush.xpose.msk.msra.mxu2 %vm1373_vm5, %v6560_v47  ;;  %v4643_v48 = vor.u32 %v5282_v46, %v4642_v45  ;;  %v5279_v50 = vld [vmem:[%s6419_s1 + $0xe8] sm:$0xf0]  ;;  %v4610_v46 = vld [vmem:[%s6419_s1 + $0xc0] sm:$0xf] }
 0x597   : > { %v1839_v53 = vadd.f32 %v1838_v52, %v1825_v51  ;;  %v4631_v52 = vor.u32 %v5279_v50, %v4630_v49 }
 0x599   : > { %4568 = vmatpush.xpose.msk.msra.mxu2 %vm1373_vm5, %v6575_v56  ;;  %1918 = vrot.lane.b32.xlu1 %v1839_v53, %s6039_s7 }
 0x59c   : > { %4569 = vmatmul.msk.f32.vlgmr.msra.gmra.mxu2 %vm1373_vm5, %v1839_v53 }
 0x59d   : > { %2193 = vmatpush.bf16.msrb.mxu2 %v4703_v10 }
 0x5a1   : > { %2194 = vmatpush.bf16.msrb.mxu2 %v4691_v12 }
 0x5a5   : > { %2195 = vmatpush.bf16.msrb.mxu2 %v4679_v17 }
 0x5a9   : > { %2196 = vmatpush.bf16.msrb.mxu2 %v4667_v23  ;;  %v4683_v23 = vor.u32 %v5293_v22, %v4682_v19 }
 0x5ad   : > { %2197 = vmatpush.bf16.msrb.mxu2 %v4655_v42  ;;  %v4622_v42 = vld [vmem:[%s6419_s1 + $0xd8] sm:$0xf] }
 0x5b1   : > { %2198 = vmatpush.bf16.msrb.mxu2 %v4643_v48  ;;  %v5275_v48 = vld [vmem:[%s6419_s1 + $0xc8] sm:$0xf0] }
 0x5b2   : > { %v4611_v49 = vor.u32 %v5275_v48, %v4610_v46 }
 0x5b5   : > { %2199 = vmatpush.bf16.msrb.mxu2 %v4631_v52 }
 0x5c3   : > { %936 = vadd.xlane.f32.xlu1 %v929_v57  ;;  %v4618_v57 = vld [vmem:[%s6419_s1 + $0xc8] sm:$0xf] }
 0x5dc   : > { %1960 = vrot.lane.b32.xlu1 %v6669_v54, %s6039_s7 }
 0x5fe   : > { %v6764_v58 = vpop.f32.mrf.mxu2 }
 0x603   : > { %v1921_v59 = vpop.permute.xlu0 %1920 }
 0x604   : > { %4571 = vmatpush.xpose.msk.msra.mxu1 %vm1373_vm5, %v1921_v59  ;;  %v5276_v59 = vld [vmem:[%s6419_s1 + $0xd0] sm:$0xf0] }
 0x606   : > { %v1623_v60 = vpop.f32.mrf.mxu2 }
 0x607   : > { %v4619_v60 = vor.u32 %v5276_v59, %v4618_v57  ;;  %v5295_v57 = vld [vmem:[%s6419_s1 + $0x16c] sm:$0xf]  ;;  %v4696_v59 = vld [vmem:[%s6419_s1 + $0x174] sm:$0xf0] }
 0x608   : > { %4572 = vmatpush.xpose.msk.msra.mxu1 %vm1373_vm5, %v6588_v1 }
 0x609   : > { %2200 = vmatpush.bf16.msrb.mxu2 %v4619_v60  ;;  %v5292_v60 = vld [vmem:[%s6419_s1 + $0x154] sm:$0xf] }
 0x60b   : > { %v1919_v61 = vpop.permute.xlu1 %1918 }
 0x60c   : > { %4573 = vmatpush.xpose.msk.msra.mxu1 %vm1373_vm5, %v6592_v2 }
 0x60d   : > { %2372 = vmatpush.bf16.msra.mxu2 %v6686_v15 }
 0x60f   : > { %4574 = vmatmul.msk.f32.vlgmr.msra.gmra.mxu1 %vm1373_vm5, %v1919_v61 }
 0x611   : > { %2373 = vmatpush.bf16.msra.mxu2 %v6690_v16 }
 0x615   : > { %2374 = vmatpush.bf16.msra.mxu2 %v6695_v18 }
 0x619   : > { %2375 = vmatpush.bf16.msra.mxu2 %v6700_v63 }
 0x61d   : > { %2376 = vmatpush.bf16.msra.mxu2 %v6705_v21 }
 0x61f   : > { %v1878_v54 = vpop.f32.mrf.mxu2 }
 0x620   : > { %v1881_v0 = vmul.f32 0.125, %v1878_v54 }
 0x621   : > { %2377 = vmatpush.bf16.msra.mxu2 %v6715_v27 }
 0x622   : > { %v6778_v3 = vadd.f32 %v1881_v0, %v6775_v62  ;;  %v4694_v0 = vld [vmem:[%s6419_s1 + $0x168] sm:$0xf] }
 0x624   : > { %v1884_v4 = vsel %vm1883_vm11, %v6778_v3, -inf }
 0x625   : > { %1885 = vmax.xlane.f32.xlu0 %v1884_v4  ;;  %v5296_v4 = vld [vmem:[%s6419_s1 + $0x170] sm:$0xf0]  ;;  %2378 = vmatpush.bf16.msra.mxu2 %v6719_v28 }
 0x629   : > { %2379 = vmatpush.bf16.msra.mxu2 %v6725_v30 }
 0x636   : > { %v937_v24 = vpop.xlane.xlu1 %936 }
 0x637   : > { %v951_v31 = vmul.f32 %v6533_v9, %v937_v24  ;;  %v4670_v24 = vld [vmem:[%s6419_s1 + $0x138] sm:$0xf] }
 0x639   : > { %v956_v32 = vadd.f32 1e-06, %v951_v31  ;;  %v4658_v31 = vld [vmem:[%s6419_s1 + $0x120] sm:$0xf] }
 0x63b   : > { %5522 = vrsqrt.f32 %v956_v32  ;;  %vm985_vm12 = vweird.f32 %v956_v32 }
 0x641   : > { %v5523_v5 = vpop.eup %5522 }
 0x642   : > { %v980_v33 = vmul.f32 %v5523_v5, %v956_v32  ;;  %vm986_vm13 = vweird.f32 %v5523_v5  ;;  %v5287_v32 = vld [vmem:[%s6419_s1 + $0x128] sm:$0xf0] }
 0x643   : > { %vm987_vm14 = vmor %vm985_vm12, %vm986_vm13 }
 0x644   : > { %v981_v34 = vmul.f32 %v5523_v5, %v980_v33  ;;  %v4646_v33 = vld [vmem:[%s6419_s1 + $0x108] sm:$0xf] }
 0x646   : > { %v982_v36 = vmul.f32 0.5, %v981_v34  ;;  %v5284_v34 = vld [vmem:[%s6419_s1 + $0x110] sm:$0xf0] }
 0x648   : > { %v983_v37 = vsub.f32 1.5, %v982_v36  ;;  %v4647_v36 = vor.u32 %v5284_v34, %v4646_v33  ;;  %v4624_v33 = vld [vmem:[%s6419_s1 + $0xe4] sm:$0xf0] }
 0x64a   : > { %v984_v44 = vmul.f32 %v5523_v5, %v983_v37  ;;  %v4634_v37 = vld [vmem:[%s6419_s1 + $0xf0] sm:$0xf] }
 0x64b   : > { %v4635_v40 = vor.u32 %v5281_v39, %v4634_v37  ;;  %v4612_v37 = vld [vmem:[%s6419_s1 + $0xcc] sm:$0xf0] }
 0x64c   : > { %v988_v51 = vsel %vm987_vm14, %v5523_v5, %v984_v44  ;;  %v4659_v5 = vor.u32 %v5287_v32, %v4658_v31  ;;  %v5278_v44 = vld [vmem:[%s6419_s1 + $0xe0] sm:$0xf0]  ;;  %v5280_v31 = vld [vmem:[%s6419_s1 + $0xf4] sm:$0xf]  ;;  %v4636_v32 = vld [vmem:[%s6419_s1 + $0xfc] sm:$0xf0] }
 0x64d   : > { %v1011_v53 = vmul.f32 %v988_v51, %v6758_v55  ;;  %v4695_v55 = vor.u32 %v5296_v4, %v4694_v0  ;;  %v4623_v45 = vor.u32 %v5278_v44, %v4622_v42  ;;  %v4699_v0 = vor.u32 %v5295_v57, %v4696_v59  ;;  %v4684_v4 = vld [vmem:[%s6419_s1 + $0x15c] sm:$0xf0] }
 0x64e   : > { %v1961_v25 = vpop.permute.xlu1 %1960 }
 0x64f   : > { %1979 = vmatpush.msrb.mxu1 %v1961_v25  ;;  %v1017_v61 = vmul.f32 %v6537_v20, %v1011_v53  ;;  %2167 = vmatpush.bf16.msrb.mxu3 %v4695_v55  ;;  %v5290_v25 = vld [vmem:[%s6419_s1 + $0x140] sm:$0xf0]  ;;  %v4687_v55 = vor.u32 %v5292_v60, %v4684_v4 }
 0x651   : > { %1980 = vmatpush.msrb.mxu1 %v6657_v41  ;;  %v6803_v54 = vpack.c.bf16 %v1017_v61, %v1017_v61 }
 0x653   : > { %1981 = vmatpush.msrb.mxu1 %v6659_v43  ;;  %2201 = vmatmul.bf16.vlgmr.msrb.gmra.mxu2 %v6803_v54 }
 0x654   : > { %2168 = vmatpush.bf16.msrb.mxu3 %v4683_v23 }
 0x655   : > { %2180 = vmatpush.bf16.msra.mxu1 %v4699_v0 }
 0x659   : > { %2181 = vmatpush.bf16.msra.mxu1 %v4687_v55 }
 0x68c   : > { %v1943_v6 = vpop.f32.mrf.mxu1 }
 0x68d   : > { %v1946_v7 = vmul.f32 0.125, %v1943_v6  ;;  %v5289_v6 = vld [vmem:[%s6419_s1 + $0x13c] sm:$0xf] }
 0x68f   : > { %v1947_v8 = vadd.f32 %v1946_v7, %v6775_v62  ;;  %v4672_v7 = vld [vmem:[%s6419_s1 + $0x144] sm:$0xf0] }
 0x691   : > { %v1948_v10 = vsel %vm1883_vm11, %v1947_v8, -inf }
 0x692   : > { %1949 = vmax.xlane.f32.xlu2 %v1948_v10 }
 0x698   : > { %v1886_v11 = vpop.xlane.xlu0 %1885 }
 0x699   : > { %v1887_v12 = vsub.f32 %v6778_v3, %v1886_v11  ;;  %v4671_v3 = vor.u32 %v5290_v25, %v4670_v24  ;;  %v5283_v24 = vld [vmem:[%s6419_s1 + $0x10c] sm:$0xf]  ;;  %v4648_v25 = vld [vmem:[%s6419_s1 + $0x114] sm:$0xf0] }
 0x69b   : > { %v1888_v13 = vmul.f32 1.442695, %v1887_v12  ;;  %2169 = vmatpush.bf16.msrb.mxu3 %v4671_v3  ;;  %v4675_v12 = vor.u32 %v5289_v6, %v4672_v7  ;;  %v4651_v3 = vor.u32 %v5283_v24, %v4648_v25  ;;  %v6884_v25 = vld [vmem:[#allocation2 + $0x10] sm:$0xff] }
 0x69d   : > { %5524 = vpow2.f32 %v1888_v13  ;;  %v4660_v13 = vld [vmem:[%s6419_s1 + $0x12c] sm:$0xf0]  ;;  %2182 = vmatpush.bf16.msra.mxu1 %v4675_v12 }
 0x69f   : > { %2170 = vmatpush.bf16.msrb.mxu3 %v4659_v5  ;;  %v4639_v5 = vor.u32 %v5280_v31, %v4636_v32 }
 0x6a3   : > { %v5525_v14 = vpop.eup %5524  ;;  %2171 = vmatpush.bf16.msrb.mxu3 %v4647_v36  ;;  %v5274_v36 = vld [vmem:[%s6419_s1 + $0xc4] sm:$0xf] }
 0x6a4   : > { %v1890_v17 = vsel %vm1883_vm11, %v5525_v14, 0.0  ;;  %v4615_v39 = vor.u32 %v5274_v36, %v4612_v37 }
 0x6a5   : > { %1891 = vadd.xlane.f32.xlu0 %v1890_v17 }
 0x6a7   : > { %2172 = vmatpush.bf16.msrb.mxu3 %v4635_v40 }
 0x6ab   : > { %2173 = vmatpush.bf16.msrb.mxu3 %v4623_v45 }
 0x6af   : > { %2174 = vmatpush.bf16.msrb.mxu3 %v4611_v49 }
 0x6d6   : > { %v6834_v50 = vpop.f32.mrf.mxu2 }
 0x6de   : > { %v2204_v61 = vpop.f32.mrf.mxu2 }
 0x705   : > { %v1950_v51 = vpop.xlane.xlu2 %1949 }
 0x706   : > { %v1951_v52 = vsub.f32 %v1947_v8, %v1950_v51  ;;  %v5286_v8 = vld [vmem:[%s6419_s1 + $0x124] sm:$0xf] }
 0x707   : > { %v4663_v17 = vor.u32 %v5286_v8, %v4660_v13 }
 0x708   : > { %v1952_v53 = vmul.f32 1.442695, %v1951_v52 }
 0x709   : > { %2183 = vmatpush.bf16.msra.mxu1 %v4663_v17 }
 0x70a   : > { %5526 = vpow2.f32 %v1952_v53 }
 0x70d   : > { %2184 = vmatpush.bf16.msra.mxu1 %v4651_v3  ;;  %v930_v3 = vmul.f32 %v6884_v25, %v6884_v25 }
 0x710   : > { %v5527_v10 = vpop.eup %5526 }
 0x711   : > { %v1954_v11 = vsel %vm1883_vm11, %v5527_v10, 0.0  ;;  %2185 = vmatpush.bf16.msra.mxu1 %v4639_v5 }
 0x712   : > { %1955 = vadd.xlane.f32.xlu2 %v1954_v11 }
 0x718   : > { %v1892_v19 = vpop.xlane.xlu0 %1891 }
 0x719   : > { %5528 = vrcp.f32 %v1892_v19 }
 0x71f   : > { %v5529_v22 = vpop.eup %5528 }
 0x720   : > { %v1894_v23 = vmul.f32 %v5529_v22, %v5525_v14  ;;  %v5277_v14 = vld [vmem:[%s6419_s1 + $0xdc] sm:$0xf] }
 0x721   : > { %v4627_v34 = vor.u32 %v5277_v14, %v4624_v33 }
 0x722   : > { %4570 = vmatmul.msk.f32.vlgmr.msra.gmra.mxu3 %vm1883_vm11, %v1894_v23 }
 0x723   : > { %2291 = vmatpush.msra.mxu3 %v6834_v50  ;;  %2186 = vmatpush.bf16.msra.mxu1 %v4627_v34 }
 0x725   : > { %2292 = vmatpush.msra.mxu3 %v6544_v29 }
 0x727   : > { %2293 = vmatpush.msra.mxu3 %v6542_v26  ;;  %2187 = vmatpush.bf16.msra.mxu1 %v4615_v39 }
 0x72a   : > { %2175 = vmatmul.bf16.vlgmr.msrb.gmra.mxu3 %v6803_v54 }
 0x785   : > { %v1956_v40 = vpop.xlane.xlu2 %1955 }
 0x786   : > { %5530 = vrcp.f32 %v1956_v40 }
 0x78c   : > { %v5531_v42 = vpop.eup %5530 }
 0x78d   : > { %v1958_v44 = vmul.f32 %v5531_v42, %v5527_v10 }
 0x78f   : > { %4575 = vmatmul.msk.f32.vlgmr.msrb.gmra.mxu1 %vm1883_vm11, %v1958_v44 }
 0x797   : > { %2188 = vmatmul.bf16.vlgmr.msra.gmra.mxu1 %v6803_v54 }
 0x7a5   : > { %v1915_v45 = vpop.f32.mrf.mxu3 }
 0x7ad   : > { %v2176_v46 = vpop.f32.mrf.mxu3 }
 0x7ae   : > { %v2207_v48 = vsub.f32 0.0, %v2176_v46  ;;  %v2206_v22 = vmul.f32 %v2176_v46, %v6740_v38 }
 0x7b0   : > { %2209 = vrot.lane.b32.xlu1 %v2207_v48, %s6038_s15 }
 0x7b5   : > { %v2178_v49 = vpop.f32.mrf.mxu3 }
 0x80c   : > { %v1983_v51 = vpop.f32.mrf.mxu1 }
 0x814   : > { %v2189_v52 = vpop.f32.mrf.mxu1 }
 0x815   : > { %v2222_v53 = vsub.f32 0.0, %v2189_v52  ;;  %2228 = vrot.lane.b32.xlu0 %v2189_v52, %s6037_s2  ;;  %v2221_v7 = vmul.f32 %v2189_v52, %v6740_v38 }
 0x817   : > { %2224 = vrot.lane.b32.xlu2 %v2222_v53, %s6038_s15 }
 0x81c   : > { %v2191_v57 = vpop.f32.mrf.mxu1 }
 0x81d   : > { %2213 = vrot.lane.b32.xlu0 %v2176_v46, %s6037_s2 }
 0x81f   : > { %1987 = vrot.lane.b32.xlu2 %v1983_v51, %s6039_s7 }
 0x822   : > { %v2210_v12 = vpop.permute.xlu1 %2209 }
 0x871   : > { %v2225_v59 = vpop.permute.xlu2 %2224 }
 0x879   : > { %v1988_v54 = vpop.permute.xlu2 %1987 }
 0x87a   : > { %v1990_v60 = vsel %vm1373_vm5, %v1915_v45, %v1988_v54 }
 0x87b   : > { %v1991_v61 = vpack.c.bf16 %v1990_v60, %v1990_v60  ;;  %v4832_v60 = vld [vmem:[%s6419_s1 + $0x228] sm:$0xf] }
 0x87d   : > { %2000 = vmatmul.bf16.vlgmr.msrb.gmra.mxu0 %v1991_v61  ;;  %v5320_v61 = vld [vmem:[%s6419_s1 + $0x230] sm:$0xf0] }
 0x887   : > { %v2229_v0 = vpop.permute.xlu0 %2228 }
 0x888   : > { %v2231_v4 = vsel %vm1370_vm4, %v2225_v59, %v2229_v0 }
 0x889   : > { %v2232_v55 = vsel %vm1373_vm5, %v2231_v4, %v2225_v59  ;;  %v4833_v4 = vor.u32 %v5320_v61, %v4832_v60  ;;  %v4792_v61 = vld [vmem:[%s6419_s1 + $0x1d0] sm:$0xf] }
 0x88a   : > { %v2233_v6 = vsel %vm1376_vm6, %v2232_v55, %v2229_v0  ;;  %v4840_v0 = vld [vmem:[%s6419_s1 + $0x230] sm:$0xf]  ;;  %v5321_v55 = vld [vmem:[%s6419_s1 + $0x238] sm:$0xf0] }
 0x88b   : > { %v2234_v10 = vmul.f32 %v2233_v6, %v6733_v35  ;;  %v4820_v6 = vld [vmem:[%s6419_s1 + $0x210] sm:$0xf]  ;;  %2547 = vmatpush.bf16.msrb.mxu3 %v4833_v4 }
 0x88d   : > { %v2235_v11 = vadd.f32 %v2234_v10, %v2221_v7  ;;  %v5317_v7 = vld [vmem:[%s6419_s1 + $0x218] sm:$0xf0] }
 0x88f   : > { %2300 = vrot.lane.b32.xlu1 %v2235_v11, %s6039_s7  ;;  %4704 = vmatpush.xpose.msk.msra.mxu0 %vm1373_vm5, %v2235_v11  ;;  %v2214_v8 = vpop.permute.xlu0 %2213  ;;  %v4841_v11 = vor.u32 %v5321_v55, %v4840_v0  ;;  %v5309_v0 = vld [vmem:[%s6419_s1 + $0x1d8] sm:$0xf0] }
 0x890   : > { %v2216_v13 = vsel %vm1370_vm4, %v2210_v12, %v2214_v8  ;;  %v5313_v55 = vld [vmem:[%s6419_s1 + $0x1fc] sm:$0xf] }
 0x891   : > { %v2217_v17 = vsel %vm1373_vm5, %v2216_v13, %v2210_v12  ;;  %v4828_v12 = vld [vmem:[%s6419_s1 + $0x218] sm:$0xf]  ;;  %v4821_v13 = vor.u32 %v5317_v7, %v4820_v6  ;;  %v4810_v6 = vld [vmem:[%s6419_s1 + $0x204] sm:$0xf0] }
 0x892   : > { %v2218_v19 = vsel %vm1376_vm6, %v2217_v17, %v2214_v8  ;;  %v5318_v8 = vld [vmem:[%s6419_s1 + $0x220] sm:$0xf0] }
 0x893   : > { %v2219_v23 = vmul.f32 %v2218_v19, %v6733_v35  ;;  %4705 = vmatpush.xpose.msk.msra.mxu0 %vm1373_vm5, %v6560_v47  ;;  %v4829_v17 = vor.u32 %v5318_v8, %v4828_v12  ;;  %v4808_v19 = vld [vmem:[%s6419_s1 + $0x1f8] sm:$0xf]  ;;  %2548 = vmatpush.bf16.msrb.mxu3 %v4821_v13  ;;  %v5306_v13 = vld [vmem:[%s6419_s1 + $0x1c0] sm:$0xf0] }
 0x894   : > { %v4780_v8 = vld [vmem:[%s6419_s1 + $0x1b8] sm:$0xf] }
 0x895   : > { %v2220_v24 = vadd.f32 %v2219_v23, %v2206_v22  ;;  %v5314_v22 = vld [vmem:[%s6419_s1 + $0x200] sm:$0xf0]  ;;  %v4816_v23 = vld [vmem:[%s6419_s1 + $0x200] sm:$0xf] }
 0x897   : > { %4706 = vmatpush.xpose.msk.msra.mxu0 %vm1373_vm5, %v6575_v56  ;;  %2298 = vrot.lane.b32.xlu0 %v2220_v24, %s6039_s7 }
 0x89a   : > { %4707 = vmatmul.msk.f32.vlgmr.msra.gmra.mxu0 %vm1373_vm5, %v2220_v24  ;;  %v5315_v24 = vld [vmem:[%s6419_s1 + $0x208] sm:$0xf0] }
 0x8c1   : > { %938 = vadd.xlane.f32.xlu0 %v930_v3 }
 0x8d5   : > { %2340 = vrot.lane.b32.xlu0 %v6834_v50, %s6039_s7 }
 0x8fa   : > { %v6890_v31 = vpop.f32.mrf.mxu0 }
 0x901   : > { %v2301_v32 = vpop.permute.xlu1 %2300 }
 0x902   : > { %v2003_v5 = vpop.f32.mrf.mxu0  ;;  %4709 = vmatpush.xpose.msk.msrb.mxu1 %vm1373_vm5, %v2301_v32  ;;  %v4809_v32 = vor.u32 %v5314_v22, %v4808_v19  ;;  %v5310_v22 = vld [vmem:[%s6419_s1 + $0x1e4] sm:$0xf] }
 0x903   : > { %v4817_v5 = vor.u32 %v5315_v24, %v4816_v23  ;;  %v4798_v23 = vld [vmem:[%s6419_s1 + $0x1ec] sm:$0xf0] }
 0x904   : > { %2549 = vmatpush.bf16.msrb.mxu3 %v4809_v32  ;;  %v4781_v32 = vor.u32 %v5306_v13, %v4780_v8 }
 0x906   : > { %4710 = vmatpush.xpose.msk.msrb.mxu1 %vm1373_vm5, %v6588_v1 }
 0x909   : > { %v2299_v14 = vpop.permute.xlu0 %2298 }
 0x90a   : > { %4711 = vmatpush.xpose.msk.msrb.mxu1 %vm1373_vm5, %v6592_v2 }
 0x90d   : > { %4712 = vmatmul.msk.f32.vlgmr.msrb.gmra.mxu1 %vm1373_vm5, %v2299_v14  ;;  %v4796_v14 = vld [vmem:[%s6419_s1 + $0x1e0] sm:$0xf] }
 0x90e   : > { %2573 = vmatpush.bf16.msra.mxu1 %v4841_v11  ;;  %v4772_v11 = vld [vmem:[%s6419_s1 + $0x1b0] sm:$0xf] }
 0x912   : > { %2574 = vmatpush.bf16.msra.mxu1 %v4829_v17  ;;  %v4813_v17 = vor.u32 %v5313_v55, %v4810_v6  ;;  %v5298_v6 = vld [vmem:[%s6419_s1 + $0x184] sm:$0xf] }
 0x916   : > { %2575 = vmatpush.bf16.msra.mxu1 %v4817_v5  ;;  %v4760_v5 = vld [vmem:[%s6419_s1 + $0x198] sm:$0xf] }
 0x917   : > { %v2259_v33 = vpop.f32.mrf.mxu0 }
 0x918   : > { %v2262_v34 = vmul.f32 0.125, %v2259_v33  ;;  %v5311_v33 = vld [vmem:[%s6419_s1 + $0x1e8] sm:$0xf0] }
 0x91a   : > { %v2263_v36 = vadd.f32 %v2262_v34, %v6775_v62 }
 0x91c   : > { %v2264_v50 = vsel %vm1883_vm11, %v2263_v36, -inf }
 0x91d   : > { %2265 = vmax.xlane.f32.xlu1 %v2264_v50  ;;  %v5312_v50 = vld [vmem:[%s6419_s1 + $0x1f0] sm:$0xf0] }
 0x934   : > { %v939_v37 = vpop.xlane.xlu0 %938 }
 0x935   : > { %v952_v53 = vmul.f32 %v6533_v9, %v939_v37 }
 0x937   : > { %v6909_v57 = vadd.f32 1e-06, %v952_v53  ;;  %v4784_v53 = vld [vmem:[%s6419_s1 + $0x1c8] sm:$0xf] }
 0x939   : > { %vm995_vm15 = vweird.f32 %v6909_v57 }
 0x947   : > { %v2341_v39 = vpop.permute.xlu0 %2340 }
 0x948   : > { %2359 = vmatpush.msrb.mxu0 %v2341_v39 }
 0x94a   : > { %2360 = vmatpush.msrb.mxu0 %v6657_v41 }
 0x94c   : > { %2361 = vmatpush.msrb.mxu0 %v6659_v43 }
 0x98a   : > { %v2323_v40 = vpop.f32.mrf.mxu1 }
 0x98b   : > { %v2326_v42 = vmul.f32 0.125, %v2323_v40  ;;  %v5319_v40 = vld [vmem:[%s6419_s1 + $0x22c] sm:$0xf] }
 0x98d   : > { %v2327_v44 = vadd.f32 %v2326_v42, %v6775_v62  ;;  %v4797_v42 = vor.u32 %v5311_v33, %v4796_v14  ;;  %v5302_v14 = vld [vmem:[%s6419_s1 + $0x1a0] sm:$0xf0] }
 0x98f   : > { %v2328_v45 = vsel %vm1883_vm11, %v2327_v44, -inf  ;;  %2550 = vmatpush.bf16.msrb.mxu3 %v4797_v42  ;;  %v4748_v42 = vld [vmem:[%s6419_s1 + $0x180] sm:$0xf] }
 0x990   : > { %2329 = vmax.xlane.f32.xlu2 %v2328_v45  ;;  %v2266_v46 = vpop.xlane.xlu1 %2265  ;;  %v4834_v45 = vld [vmem:[%s6419_s1 + $0x234] sm:$0xf0] }
 0x991   : > { %v2267_v48 = vsub.f32 %v2263_v36, %v2266_v46  ;;  %v4804_v36 = vld [vmem:[%s6419_s1 + $0x1e8] sm:$0xf]  ;;  %v5316_v46 = vld [vmem:[%s6419_s1 + $0x214] sm:$0xf]  ;;  %v4837_v60 = vor.u32 %v5319_v40, %v4834_v45  ;;  %v5299_v45 = vld [vmem:[%s6419_s1 + $0x188] sm:$0xf0] }
 0x993   : > { %v2268_v49 = vmul.f32 1.442695, %v2267_v48  ;;  %v4822_v48 = vld [vmem:[%s6419_s1 + $0x21c] sm:$0xf0]  ;;  %2560 = vmatpush.bf16.msra.mxu0 %v4837_v60 }
 0x995   : > { %5532 = vpow2.f32 %v2268_v49 }
 0x996   : > { %5534 = vrsqrt.f32 %v6909_v57 }
 0x99b   : > { %v6904_v51 = vpop.eup %5532 }
 0x99c   : > { %v2270_v52 = vsel %vm1883_vm11, %v6904_v51, 0.0  ;;  %v6912_v59 = vpop.eup %5534 }
 0x99d   : > { %2271 = vadd.xlane.f32.xlu1 %v2270_v52  ;;  %v990_v54 = vmul.f32 %v6912_v59, %v6909_v57  ;;  %v4805_v52 = vor.u32 %v5312_v50, %v4804_v36  ;;  %vm996_vm0 = vweird.f32 %v6912_v59  ;;  %v5305_v57 = vld [vmem:[%s6419_s1 + $0x1b8] sm:$0xf0]  ;;  %v5303_v36 = vld [vmem:[%s6419_s1 + $0x1a8] sm:$0xf0] }
 0x99e   : > { %vm6948_vm1 = vmor %vm995_vm15, %vm996_vm0  ;;  %v4773_v19 = vor.u32 %v5305_v57, %v4772_v11 }
 0x99f   : > { %v991_v10 = vmul.f32 %v6912_v59, %v990_v54  ;;  %v5308_v54 = vld [vmem:[%s6419_s1 + $0x1d0] sm:$0xf0]  ;;  %2576 = vmatpush.bf16.msra.mxu1 %v4805_v52 }
 0x9a0   : > { %v4785_v4 = vor.u32 %v5308_v54, %v4784_v53 }
 0x9a1   : > { %v992_v3 = vmul.f32 0.5, %v991_v10  ;;  %v4793_v10 = vor.u32 %v5309_v0, %v4792_v61  ;;  %v5304_v0 = vld [vmem:[%s6419_s1 + $0x1b4] sm:$0xf] }
 0x9a2   : > { %2551 = vmatpush.bf16.msrb.mxu3 %v4785_v4 }
 0x9a3   : > { %v993_v37 = vsub.f32 1.5, %v992_v3  ;;  %2577 = vmatpush.bf16.msra.mxu1 %v4793_v10 }
 0x9a5   : > { %v994_v7 = vmul.f32 %v6912_v59, %v993_v37  ;;  %v4801_v37 = vor.u32 %v5310_v22, %v4798_v23 }
 0x9a6   : > { %2552 = vmatpush.bf16.msrb.mxu3 %v4773_v19 }
 0x9a7   : > { %v998_v3 = vsel %vm6948_vm1, %v6912_v59, %v994_v7  ;;  %v4761_v59 = vor.u32 %v5302_v14, %v4760_v5  ;;  %2578 = vmatpush.bf16.msra.mxu1 %v4781_v32 }
 0x9aa   : > { %2553 = vmatpush.bf16.msrb.mxu3 %v4761_v59 }
 0xa03   : > { %v2330_v34 = vpop.xlane.xlu2 %2329 }
 0xa04   : > { %v2331_v39 = vsub.f32 %v2327_v44, %v2330_v34  ;;  %v4825_v44 = vor.u32 %v5316_v46, %v4822_v48  ;;  %v4768_v34 = vld [vmem:[%s6419_s1 + $0x1a0] sm:$0xf]  ;;  %v4756_v46 = vld [vmem:[%s6419_s1 + $0x188] sm:$0xf]  ;;  %v5300_v48 = vld [vmem:[%s6419_s1 + $0x190] sm:$0xf0] }
 0xa05   : > { %v4769_v40 = vor.u32 %v5303_v36, %v4768_v34  ;;  %v4757_v53 = vor.u32 %v5300_v48, %v4756_v46 }
 0xa06   : > { %v2332_v49 = vmul.f32 1.442695, %v2331_v39  ;;  %2561 = vmatpush.bf16.msra.mxu0 %v4825_v44  ;;  %v1012_v39 = vmul.f32 %v998_v3, %v6884_v25  ;;  %v4774_v44 = vld [vmem:[%s6419_s1 + $0x1bc] sm:$0xf0] }
 0xa07   : > { %2579 = vmatpush.bf16.msra.mxu1 %v4769_v40  ;;  %v4777_v4 = vor.u32 %v5304_v0, %v4774_v44 }
 0xa08   : > { %5536 = vpow2.f32 %v2332_v49  ;;  %v4749_v49 = vor.u32 %v5299_v45, %v4748_v42  ;;  %v1018_v52 = vmul.f32 %v6537_v20, %v1012_v39 }
 0xa0a   : > { %2562 = vmatpush.bf16.msra.mxu0 %v4813_v17  ;;  %2554 = vmatpush.bf16.msrb.mxu3 %v4749_v49  ;;  %v2385_v61 = vpack.c.bf16 %v1018_v52, %v1018_v52 }
 0xa0b   : > { %2580 = vmatpush.bf16.msra.mxu1 %v4757_v53 }
 0xa0e   : > { %v6956_v24 = vpop.eup %5536  ;;  %2563 = vmatpush.bf16.msra.mxu0 %v4801_v37  ;;  %2581 = vmatmul.bf16.vlgmr.msra.gmra.mxu1 %v2385_v61 }
 0xa0f   : > { %v2334_v33 = vsel %vm1883_vm11, %v6956_v24, 0.0  ;;  %2752 = vmatpush.bf16.msrb.mxu1 %v6686_v15  ;;  %v5307_v15 = vld [vmem:[%s6419_s1 + $0x1cc] sm:$0xf] }
 0xa10   : > { %2335 = vadd.xlane.f32.xlu2 %v2334_v33  ;;  %v2272_v50 = vpop.xlane.xlu1 %2271 }
 0xa11   : > { %5538 = vrcp.f32 %v2272_v50 }
 0xa13   : > { %2753 = vmatpush.bf16.msrb.mxu1 %v6690_v16 }
 0xa17   : > { %v5539_v54 = vpop.eup %5538  ;;  %2754 = vmatpush.bf16.msrb.mxu1 %v6695_v18  ;;  %v5301_v18 = vld [vmem:[%s6419_s1 + $0x19c] sm:$0xf] }
 0xa18   : > { %v2274_v60 = vmul.f32 %v5539_v54, %v6904_v51  ;;  %v4786_v51 = vld [vmem:[%s6419_s1 + $0x1d4] sm:$0xf0] }
 0xa19   : > { %v4789_v16 = vor.u32 %v5307_v15, %v4786_v51  ;;  %v4972_v15 = vld [vmem:[%s6419_s1 + $0x2f4] sm:$0xf0] }
 0xa1a   : > { %4708 = vmatmul.msk.f32.vlgmr.msra.gmra.mxu3 %vm1883_vm11, %v2274_v60 }
 0xa1b   : > { %2755 = vmatpush.bf16.msrb.mxu1 %v6700_v63  ;;  %2564 = vmatpush.bf16.msra.mxu0 %v4789_v16  ;;  %v4762_v63 = vld [vmem:[%s6419_s1 + $0x1a4] sm:$0xf0] }
 0xa1c   : > { %v4765_v55 = vor.u32 %v5301_v18, %v4762_v63  ;;  %v5340_v63 = vld [vmem:[%s6419_s1 + $0x2d4] sm:$0xf] }
 0xa1f   : > { %2756 = vmatpush.bf16.msrb.mxu1 %v6705_v21  ;;  %2565 = vmatpush.bf16.msra.mxu0 %v4777_v4  ;;  %v4750_v21 = vld [vmem:[%s6419_s1 + $0x18c] sm:$0xf0] }
 0xa20   : > { %v4753_v7 = vor.u32 %v5298_v6, %v4750_v21 }
 0xa22   : > { %2555 = vmatmul.bf16.vlgmr.msrb.gmra.mxu3 %v2385_v61 }
 0xa23   : > { %2757 = vmatpush.bf16.msrb.mxu1 %v6715_v27  ;;  %2566 = vmatpush.bf16.msra.mxu0 %v4765_v55  ;;  %v4960_v55 = vld [vmem:[%s6419_s1 + $0x2dc] sm:$0xf0] }
 0xa24   : > { %v4963_v6 = vor.u32 %v5340_v63, %v4960_v55  ;;  %v4946_v63 = vld [vmem:[%s6419_s1 + $0x2b8] sm:$0xf]  ;;  %v5338_v55 = vld [vmem:[%s6419_s1 + $0x2c0] sm:$0xf0] }
 0xa27   : > { %2758 = vmatpush.bf16.msrb.mxu1 %v6719_v28  ;;  %2567 = vmatpush.bf16.msra.mxu0 %v4753_v7 }
 0xa2b   : > { %2759 = vmatpush.bf16.msrb.mxu1 %v6725_v30 }
 0xa83   : > { %v2336_v27 = vpop.xlane.xlu2 %2335 }
 0xa84   : > { %5540 = vrcp.f32 %v2336_v27 }
 0xa8a   : > { %v5541_v28 = vpop.eup %5540 }
 0xa8b   : > { %v2338_v30 = vmul.f32 %v5541_v28, %v6956_v24  ;;  %v6993_v10 = vpop.f32.mrf.mxu1 }
 0xa8d   : > { %4713 = vmatmul.msk.f32.vlgmr.msrb.gmra.mxu0 %vm1883_vm11, %v2338_v30 }
 0xa93   : > { %v2584_v57 = vpop.f32.mrf.mxu1 }
 0xa94   : > { %v4948_v57 = vld [vmem:[%s6419_s1 + $0x2c4] sm:$0xf0] }
 0xa95   : > { %2568 = vmatmul.bf16.vlgmr.msra.gmra.mxu0 %v2385_v61  ;;  %v5343_v61 = vld [vmem:[%s6419_s1 + $0x2ec] sm:$0xf] }
 0xa96   : > { %v4975_v51 = vor.u32 %v5343_v61, %v4972_v15  ;;  %v4970_v15 = vld [vmem:[%s6419_s1 + $0x2e8] sm:$0xf] }
 0xa9d   : > { %v2295_v11 = vpop.f32.mrf.mxu3 }
 0xaa5   : > { %v2556_v12 = vpop.f32.mrf.mxu3 }
 0xaa6   : > { %v2587_v17 = vsub.f32 0.0, %v2556_v12  ;;  %v2586_v48 = vmul.f32 %v2556_v12, %v6740_v38 }
 0xaad   : > { %v2558_v8 = vpop.f32.mrf.mxu3 }
 0xb0a   : > { %v2363_v13 = vpop.f32.mrf.mxu0 }
 0xb0b   : > { %2367 = vrot.lane.b32.xlu2 %v2363_v13, %s6039_s7  ;;  %v5334_v13 = vld [vmem:[%s6419_s1 + $0x2a4] sm:$0xf] }
 0xb12   : > { %v2569_v19 = vpop.f32.mrf.mxu0 }
 0xb13   : > { %v2602_v22 = vsub.f32 0.0, %v2569_v19  ;;  %2608 = vrot.lane.b32.xlu0 %v2569_v19, %s6037_s2  ;;  %2589 = vrot.lane.b32.xlu2 %v2587_v17, %s6038_s15  ;;  %v2601_v50 = vmul.f32 %v2569_v19, %v6740_v38  ;;  %v7024_v38 = vld [vmem:[#allocation2 + $0x18] sm:$0xff] }
 0xb14   : > { %v931_v53 = vmul.f32 %v7024_v38, %v7024_v38  ;;  %v4936_v17 = vld [vmem:[%s6419_s1 + $0x2ac] sm:$0xf0] }
 0xb15   : > { %2604 = vrot.lane.b32.xlu1 %v2602_v22, %s6038_s15  ;;  %v4939_v22 = vor.u32 %v5334_v13, %v4936_v17  ;;  %v5326_v13 = vld [vmem:[%s6419_s1 + $0x260] sm:$0xf0] }
 0xb1a   : > { %v2571_v23 = vpop.f32.mrf.mxu0 }
 0xb1b   : > { %2593 = vrot.lane.b32.xlu0 %v2556_v12, %s6037_s2 }
 0xb65   : > { %v2368_v24 = vpop.permute.xlu2 %2367 }
 0xb66   : > { %v2370_v3 = vsel %vm1373_vm5, %v2295_v11, %v2368_v24  ;;  %v5337_v11 = vld [vmem:[%s6419_s1 + $0x2bc] sm:$0xf] }
 0xb67   : > { %v2371_v32 = vpack.c.bf16 %v2370_v3, %v2370_v3  ;;  %v4951_v8 = vor.u32 %v5337_v11, %v4948_v57  ;;  %v5331_v3 = vld [vmem:[%s6419_s1 + $0x28c] sm:$0xf]  ;;  %v4910_v11 = vld [vmem:[%s6419_s1 + $0x270] sm:$0xf]  ;;  %v5329_v57 = vld [vmem:[%s6419_s1 + $0x278] sm:$0xf0] }
 0xb69   : > { %2380 = vmatmul.bf16.vlgmr.msra.gmra.mxu2 %v2371_v32  ;;  %v4924_v32 = vld [vmem:[%s6419_s1 + $0x294] sm:$0xf0] }
 0xb6d   : > { %v2590_v39 = vpop.permute.xlu2 %2589 }
 0xb85   : > { %v2609_v5 = vpop.permute.xlu0 %2608 }
 0xb87   : > { %v2605_v14 = vpop.permute.xlu1 %2604 }
 0xb88   : > { %v2611_v33 = vsel %vm1370_vm4, %v2605_v14, %v2609_v5 }
 0xb89   : > { %v2612_v34 = vsel %vm1373_vm5, %v2611_v33, %v2605_v14  ;;  %v5328_v14 = vld [vmem:[%s6419_s1 + $0x274] sm:$0xf]  ;;  %v4912_v33 = vld [vmem:[%s6419_s1 + $0x27c] sm:$0xf0] }
 0xb8a   : > { %v2613_v36 = vsel %vm1376_vm6, %v2612_v34, %v2609_v5  ;;  %v4927_v5 = vor.u32 %v5331_v3, %v4924_v32 }
 0xb8b   : > { %v2614_v37 = vmul.f32 %v2613_v36, %v6733_v35  ;;  %v4915_v36 = vor.u32 %v5328_v14, %v4912_v33 }
 0xb8d   : > { %v2594_v59 = vpop.permute.xlu0 %2593  ;;  %v2615_v40 = vadd.f32 %v2614_v37, %v2601_v50  ;;  %v5325_v50 = vld [vmem:[%s6419_s1 + $0x25c] sm:$0xf]  ;;  %v4900_v37 = vld [vmem:[%s6419_s1 + $0x264] sm:$0xf0] }
 0xb8e   : > { %v2596_v42 = vsel %vm1370_vm4, %v2590_v39, %v2594_v59 }
 0xb8f   : > { %v2597_v45 = vsel %vm1373_vm5, %v2596_v42, %v2590_v39  ;;  %2680 = vrot.lane.b32.xlu1 %v2615_v40, %s6039_s7  ;;  %4842 = vmatpush.xpose.msk.msrb.mxu2 %vm1373_vm5, %v2615_v40  ;;  %v5322_v40 = vld [vmem:[%s6419_s1 + $0x244] sm:$0xf]  ;;  %v4888_v42 = vld [vmem:[%s6419_s1 + $0x24c] sm:$0xf0] }
 0xb90   : > { %v2598_v46 = vsel %vm1376_vm6, %v2597_v45, %v2594_v59  ;;  %v4903_v59 = vor.u32 %v5325_v50, %v4900_v37 }
 0xb91   : > { %v2599_v49 = vmul.f32 %v2598_v46, %v6733_v35  ;;  %v4891_v46 = vor.u32 %v5322_v40, %v4888_v42 }
 0xb93   : > { %4843 = vmatpush.xpose.msk.msrb.mxu2 %vm1373_vm5, %v6560_v47  ;;  %v2600_v52 = vadd.f32 %v2599_v49, %v2586_v48 }
 0xb95   : > { %2678 = vrot.lane.b32.xlu2 %v2600_v52, %s6039_s7 }
 0xb97   : > { %4844 = vmatpush.xpose.msk.msrb.mxu2 %vm1373_vm5, %v6575_v56 }
 0xb9a   : > { %4845 = vmatmul.msk.f32.vlgmr.msrb.gmra.mxu2 %vm1373_vm5, %v2600_v52 }
 0xb9b   : > { %2671 = vmatpush.msra.mxu2 %v6993_v10 }
 0xb9d   : > { %2672 = vmatpush.msra.mxu2 %v6544_v29 }
 0xb9f   : > { %2673 = vmatpush.msra.mxu2 %v6542_v26 }
 0xbb9   : > { %940 = vadd.xlane.f32.xlu1 %v931_v53 }
 0xbec   : > { %v7022_v35 = vpop.f32.mrf.mxu2 }
 0xbef   : > { %v2679_v16 = vpop.permute.xlu2 %2678 }
 0xbf4   : > { %v2383_v54 = vpop.f32.mrf.mxu2 }
 0xc01   : > { %v2681_v60 = vpop.permute.xlu1 %2680 }
 0xc02   : > { %4847 = vmatpush.xpose.msk.msra.mxu3 %vm1373_vm5, %v2681_v60 }
 0xc06   : > { %4848 = vmatpush.xpose.msk.msra.mxu3 %vm1373_vm5, %v6588_v1 }
 0xc0a   : > { %4849 = vmatpush.xpose.msk.msra.mxu3 %vm1373_vm5, %v6592_v2 }
 0xc0d   : > { %4850 = vmatmul.msk.f32.vlgmr.msra.gmra.mxu3 %vm1373_vm5, %v2679_v16 }
 0xc0e   : > { %2940 = vmatpush.bf16.msrb.mxu3 %v4975_v51  ;;  %v5344_v51 = vld [vmem:[%s6419_s1 + $0x2f0] sm:$0xf0] }
 0xc0f   : > { %v4971_v16 = vor.u32 %v5344_v51, %v4970_v15  ;;  %v4930_v51 = vld [vmem:[%s6419_s1 + $0x290] sm:$0xf] }
 0xc11   : > { %2927 = vmatpush.bf16.msrb.mxu2 %v4971_v16  ;;  %v5333_v16 = vld [vmem:[%s6419_s1 + $0x298] sm:$0xf0] }
 0xc12   : > { %2941 = vmatpush.bf16.msrb.mxu3 %v4963_v6  ;;  %v4947_v6 = vor.u32 %v5338_v55, %v4946_v63  ;;  %v5327_v63 = vld [vmem:[%s6419_s1 + $0x268] sm:$0xf0] }
 0xc16   : > { %2942 = vmatpush.bf16.msrb.mxu3 %v4951_v8  ;;  %v4898_v8 = vld [vmem:[%s6419_s1 + $0x258] sm:$0xf] }
 0xc17   : > { %v4899_v17 = vor.u32 %v5326_v13, %v4898_v8  ;;  %v5629_v8 = vld [vmem:[%s6411_s17 + $0x20] sm:$0xff] }
 0xc1a   : > { %2943 = vmatpush.bf16.msrb.mxu3 %v4939_v22  ;;  %v5323_v22 = vld [vmem:[%s6419_s1 + $0x248] sm:$0xf0] }
 0xc1d   : > { %v2639_v0 = vpop.f32.mrf.mxu2 }
 0xc1e   : > { %v2642_v44 = vmul.f32 0.125, %v2639_v0  ;;  %2944 = vmatpush.bf16.msrb.mxu3 %v4927_v5 }
 0xc20   : > { %v2643_v4 = vadd.f32 %v2642_v44, %v6775_v62  ;;  %v4958_v44 = vld [vmem:[%s6419_s1 + $0x2d0] sm:$0xf] }
 0xc22   : > { %v2644_v18 = vsel %vm1883_vm11, %v2643_v4, -inf  ;;  %2945 = vmatpush.bf16.msrb.mxu3 %v4915_v36 }
 0xc23   : > { %2645 = vmax.xlane.f32.xlu0 %v2644_v18 }
 0xc26   : > { %2946 = vmatpush.bf16.msrb.mxu3 %v4903_v59  ;;  %v5345_v59 = vld [vmem:[%s6419_s1 + $0x2f8] sm:$0xf0] }
 0xc2a   : > { %2947 = vmatpush.bf16.msrb.mxu3 %v4891_v46  ;;  %v4966_v46 = vld [vmem:[%s6419_s1 + $0x2d8] sm:$0xf] }
 0xc2c   : > { %v941_v21 = vpop.xlane.xlu1 %940 }
 0xc2d   : > { %v953_v7 = vmul.f32 %v6533_v9, %v941_v21  ;;  %v4934_v21 = vld [vmem:[%s6419_s1 + $0x2a0] sm:$0xf] }
 0xc2f   : > { %v958_v27 = vadd.f32 1e-06, %v953_v7  ;;  %v5335_v7 = vld [vmem:[%s6419_s1 + $0x2a8] sm:$0xf0] }
 0xc31   : > { %5542 = vrsqrt.f32 %v958_v27  ;;  %vm1005_vm2 = vweird.f32 %v958_v27 }
 0xc37   : > { %v5543_v28 = vpop.eup %5542 }
 0xc38   : > { %v1000_v30 = vmul.f32 %v5543_v28, %v958_v27  ;;  %vm1006_vm3 = vweird.f32 %v5543_v28  ;;  %v4935_v27 = vor.u32 %v5335_v7, %v4934_v21  ;;  %v5324_v21 = vld [vmem:[%s6419_s1 + $0x250] sm:$0xf0] }
 0xc39   : > { %vm1007_vm7 = vmor %vm1005_vm2, %vm1006_vm3 }
 0xc3a   : > { %v1001_v12 = vmul.f32 %v5543_v28, %v1000_v30 }
 0xc3c   : > { %v1002_v19 = vmul.f32 0.5, %v1001_v12  ;;  %v4911_v12 = vor.u32 %v5329_v57, %v4910_v11  ;;  %v5627_v11 = vld [vmem:[%s6411_s17 + $0x30] sm:$0xff]  ;;  %v5628_v57 = vld [vmem:[%s6411_s17 + $0x28] sm:$0xff] }
 0xc3e   : > { %v1003_v23 = vsub.f32 1.5, %v1002_v19  ;;  %v4886_v19 = vld [vmem:[%s6419_s1 + $0x240] sm:$0xf] }
 0xc40   : > { %v1004_v24 = vmul.f32 %v5543_v28, %v1003_v23  ;;  %v4887_v23 = vor.u32 %v5323_v22, %v4886_v19 }
 0xc42   : > { %v1008_v34 = vsel %vm1007_vm7, %v5543_v28, %v1004_v24  ;;  %v4922_v28 = vld [vmem:[%s6419_s1 + $0x288] sm:$0xf] }
 0xc43   : > { %v1013_v39 = vmul.f32 %v1008_v34, %v7024_v38 }
 0xc45   : > { %v1019_v45 = vmul.f32 %v6537_v20, %v1013_v39  ;;  %v4978_v39 = vld [vmem:[%s6419_s1 + $0x2f0] sm:$0xf] }
 0xc47   : > { %v7055_v48 = vpack.c.bf16 %v1019_v45, %v1019_v45  ;;  %v4979_v45 = vor.u32 %v5345_v59, %v4978_v39 }
 0xc49   : > { %2948 = vmatmul.bf16.vlgmr.msrb.gmra.mxu3 %v7055_v48 }
 0xc90   : > { %v2703_v49 = vpop.f32.mrf.mxu3 }
 0xc91   : > { %v2706_v52 = vmul.f32 0.125, %v2703_v49  ;;  %v5342_v49 = vld [vmem:[%s6419_s1 + $0x2e0] sm:$0xf0] }
 0xc93   : > { %v2707_v53 = vadd.f32 %v2706_v52, %v6775_v62  ;;  %v4967_v52 = vor.u32 %v5342_v49, %v4966_v46 }
 0xc95   : > { %v2708_v54 = vsel %vm1883_vm11, %v2707_v53, -inf }
 0xc96   : > { %2709 = vmax.xlane.f32.xlu0 %v2708_v54  ;;  %v2646_v60 = vpop.xlane.xlu0 %2645  ;;  %v5339_v54 = vld [vmem:[%s6419_s1 + $0x2c8] sm:$0xf0] }
 0xc97   : > { %v2647_v61 = vsub.f32 %v2643_v4, %v2646_v60  ;;  %v5341_v4 = vld [vmem:[%s6419_s1 + $0x2d8] sm:$0xf0] }
 0xc98   : > { %v4959_v18 = vor.u32 %v5341_v4, %v4958_v44  ;;  %v5330_v44 = vld [vmem:[%s6419_s1 + $0x280] sm:$0xf0] }
 0xc99   : > { %v2648_v20 = vmul.f32 1.442695, %v2647_v61  ;;  %v4942_v61 = vld [vmem:[%s6419_s1 + $0x2a8] sm:$0xf] }
 0xc9a   : > { %2928 = vmatpush.bf16.msrb.mxu2 %v4959_v18  ;;  %v4906_v18 = vld [vmem:[%s6419_s1 + $0x260] sm:$0xf] }
 0xc9b   : > { %5544 = vpow2.f32 %v2648_v20  ;;  %v5336_v20 = vld [vmem:[%s6419_s1 + $0x2b0] sm:$0xf0]  ;;  %v4907_v55 = vor.u32 %v5327_v63, %v4906_v18 }
 0xc9c   : > { %v4943_v15 = vor.u32 %v5336_v20, %v4942_v61 }
 0xc9e   : > { %2929 = vmatpush.bf16.msrb.mxu2 %v4947_v6  ;;  %v4894_v6 = vld [vmem:[%s6419_s1 + $0x248] sm:$0xf] }
 0xc9f   : > { %v4895_v7 = vor.u32 %v5324_v21, %v4894_v6 }
 0xca1   : > { %v5545_v0 = vpop.eup %5544 }
 0xca2   : > { %v2650_v62 = vsel %vm1883_vm11, %v5545_v0, 0.0  ;;  %2930 = vmatpush.bf16.msrb.mxu2 %v4935_v27 }
 0xca3   : > { %2651 = vadd.xlane.f32.xlu2 %v2650_v62  ;;  %v4918_v62 = vld [vmem:[%s6419_s1 + $0x278] sm:$0xf] }
 0xca4   : > { %v4919_v4 = vor.u32 %v5330_v44, %v4918_v62 }
 0xcbb   : > { %2720 = vrot.lane.b32.xlu2 %v6993_v10, %s6039_s7  ;;  %v5332_v10 = vld [vmem:[%s6419_s1 + $0x290] sm:$0xf0] }
 0xcbc   : > { %v4923_v30 = vor.u32 %v5332_v10, %v4922_v28 }
 0xcbe   : > { %2931 = vmatpush.bf16.msrb.mxu2 %v4923_v30  ;;  %v5626_v30 = vld [vmem:[%s6411_s17 + $0x38] sm:$0xff] }
 0xcc2   : > { %2932 = vmatpush.bf16.msrb.mxu2 %v4911_v12 }
 0xcc6   : > { %2933 = vmatpush.bf16.msrb.mxu2 %v4899_v17 }
 0xcca   : > { %2934 = vmatpush.bf16.msrb.mxu2 %v4887_v23 }
 0xccc   : > { %v7079_v5 = vpop.f32.mrf.mxu3 }
 0xccd   : > { %v2982_v14 = vsub.f32 0.0, %v7079_v5 }
 0xccf   : > { %2984 = vrot.lane.b32.xlu0 %v2982_v14, %s6038_s15 }
 0xcd4   : > { %v2951_v36 = vpop.f32.mrf.mxu3 }
 0xd09   : > { %v2710_v24 = vpop.xlane.xlu0 %2709 }
 0xd0a   : > { %v2711_v3 = vsub.f32 %v2707_v53, %v2710_v24  ;;  %v4954_v53 = vld [vmem:[%s6419_s1 + $0x2c0] sm:$0xf]  ;;  %v5630_v24 = vld [vmem:[%s6411_s17 + $0x18] sm:$0xff]  ;;  %s7698_s1 = sld [smem:[#allocation45_spill]] }
 0xd0b   : > { %v4955_v60 = vor.u32 %v5339_v54, %v4954_v53 }
 0xd0c   : > { %v2712_v32 = vmul.f32 1.442695, %v2711_v3 }
 0xd0e   : > { %5546 = vpow2.f32 %v2712_v32  ;;  %v5632_v32 = vld [vmem:[%s7676_s14 + $0x10] sm:$0xff] }
 0xd14   : > { %v5547_v33 = vpop.eup %5546 }
 0xd15   : > { %v2714_v34 = vsel %vm1883_vm11, %v5547_v33, 0.0 }
 0xd16   : > { %v2652_v50 = vpop.xlane.xlu2 %2651  ;;  %2715 = vadd.xlane.f32.xlu1 %v2714_v34  ;;  %v5633_v34 = vld [vmem:[%s6411_s17 + $0x10] sm:$0xff] }
 0xd17   : > { %5548 = vrcp.f32 %v2652_v50 }
 0xd1d   : > { %v5549_v37 = vpop.eup %5548 }
 0xd1e   : > { %v2654_v40 = vmul.f32 %v5549_v37, %v5545_v0  ;;  %v2721_v42 = vpop.permute.xlu2 %2720  ;;  %v4931_v0 = vor.u32 %v5333_v16, %v4930_v51  ;;  %v5634_v37 = vld [vmem:[%s6411_s17 + $0x8] sm:$0xff] }
 0xd1f   : > { %2739 = vmatpush.msrb.mxu0 %v2721_v42 }
 0xd20   : > { %4846 = vmatmul.msk.f32.vlgmr.msra.gmra.mxu2 %vm1883_vm11, %v2654_v40 }
 0xd21   : > { %2740 = vmatpush.msrb.mxu0 %v6657_v41 }
 0xd23   : > { %2741 = vmatpush.msrb.mxu0 %v6659_v43 }
 0xd25   : > { %2953 = vmatpush.bf16.msra.mxu0 %v4979_v45 }
 0xd28   : > { %2935 = vmatmul.bf16.vlgmr.msrb.gmra.mxu2 %v7055_v48 }
 0xd29   : > { %2954 = vmatpush.bf16.msra.mxu0 %v4967_v52 }
 0xd2d   : > { %2955 = vmatpush.bf16.msra.mxu0 %v4955_v60 }
 0xd2f   : > { %2988 = vrot.lane.b32.xlu1 %v7079_v5, %s6037_s2 }
 0xd31   : > { %2956 = vmatpush.bf16.msra.mxu0 %v4943_v15 }
 0xd35   : > { %2957 = vmatpush.bf16.msra.mxu0 %v4931_v0 }
 0xd39   : > { %2958 = vmatpush.bf16.msra.mxu0 %v4919_v4 }
 0xd3d   : > { %2959 = vmatpush.bf16.msra.mxu0 %v4907_v55 }
 0xd41   : > { %2960 = vmatpush.bf16.msra.mxu0 %v4895_v7  ;;  %v2985_v12 = vpop.permute.xlu0 %2984 }
 0xd89   : > { %v2716_v27 = vpop.xlane.xlu1 %2715 }
 0xd8a   : > { %5550 = vrcp.f32 %v2716_v27 }
 0xd90   : > { %v5551_v28 = vpop.eup %5550 }
 0xd91   : > { %v2718_v10 = vmul.f32 %v5551_v28, %v5547_v33  ;;  %v5637_v28 = vld [vmem:[#allocation2 + $0x8] sm:$0xff] }
 0xd93   : > { %4851 = vmatmul.msk.f32.vlgmr.msrb.gmra.mxu0 %vm1883_vm11, %v2718_v10  ;;  %v7159_v10 = vadd.f32 %v5637_v28, %v6764_v58 }
 0xd94   : > { %3132 = vmatpush.bf16.msrb.mxu0 %v5626_v30 }
 0xd95   : > { %v3150_v30 = vmul.f32 %v7159_v10, %v7159_v10 }
 0xd98   : > { %3133 = vmatpush.bf16.msrb.mxu0 %v5627_v11  ;;  %v7163_v11 = vld [vmem:[#allocation2] sm:$0xff] }
 0xd9b   : > { %2961 = vmatmul.bf16.vlgmr.msra.gmra.mxu0 %v7055_v48  ;;  %v5631_v48 = vld [vmem:[%s7675_s25 + $0x10] sm:$0xff] }
 0xd9c   : > { %3134 = vmatpush.bf16.msrb.mxu0 %v5628_v57  ;;  %v2981_v3 = vmul.f32 %v5631_v48, %v7079_v5  ;;  %v5635_v5 = vld [vmem:[%s6411_s17] sm:$0xff]  ;;  %v7167_v57 = vadd.f32 %v7163_v11, %v6890_v31 }
 0xda0   : > { %3135 = vmatpush.bf16.msrb.mxu0 %v5629_v8 }
 0xda1   : > { %v2989_v13 = vpop.permute.xlu1 %2988 }
 0xda2   : > { %v2991_v17 = vsel %vm1370_vm4, %v2985_v12, %v2989_v13 }
 0xda3   : > { %v2992_v19 = vsel %vm1373_vm5, %v2991_v17, %v2985_v12  ;;  %v2675_v22 = vpop.f32.mrf.mxu2  ;;  %v3151_v12 = vmul.f32 %v7167_v57, %v7167_v57 }
 0xda4   : > { %v2993_v23 = vsel %vm1376_vm6, %v2992_v19, %v2989_v13  ;;  %3136 = vmatpush.bf16.msrb.mxu0 %v5630_v24 }
 0xda5   : > { %v2994_v14 = vmul.f32 %v5632_v32, %v2993_v23  ;;  %v7181_v23 = vld [vmem:[#allocation2 + $0x20] sm:$0xff] }
 0xda6   : > { %v7185_v24 = vadd.f32 %v7181_v23, %v7022_v35  ;;  %v5372_v35 = vld [vmem:[%s6421_s5 + $0xcc] sm:$0xf0] }
 0xda7   : > { %v2995_v33 = vadd.f32 %v2994_v14, %v2981_v3  ;;  %v5376_v3 = vld [vmem:[%s6421_s5 + $0xec] sm:$0xf0] }
 0xda8   : > { %3137 = vmatpush.bf16.msrb.mxu0 %v5633_v34  ;;  %v3152_v34 = vmul.f32 %v7185_v24, %v7185_v24 }
 0xda9   : > { %4980 = vmatpush.xpose.msk.msra.mxu1 %vm1373_vm5, %v2995_v33 }
 0xdab   : > { %v2936_v36 = vpop.f32.mrf.mxu2 }
 0xdac   : > { %v2967_v50 = vsub.f32 0.0, %v2936_v36  ;;  %2973 = vrot.lane.b32.xlu2 %v2936_v36, %s6037_s2  ;;  %3138 = vmatpush.bf16.msrb.mxu0 %v5634_v37  ;;  %v2966_v53 = vmul.f32 %v5631_v48, %v2936_v36  ;;  %v5104_v48 = vld [vmem:[%s6421_s5 + $0xe0] sm:$0xf]  ;;  %v5370_v37 = vld [vmem:[%s6421_s5 + $0xc4] sm:$0xf] }
 0xdad   : > { %4981 = vmatpush.xpose.msk.msra.mxu1 %vm1373_vm5, %v6560_v47  ;;  %v5105_v14 = vor.u32 %v5376_v3, %v5104_v48  ;;  %v4994_v3 = vld [vmem:[%s6421_s5 + $0x10] sm:$0xf0] }
 0xdae   : > { %2969 = vrot.lane.b32.xlu0 %v2967_v50, %s6038_s15  ;;  %v5088_v50 = vld [vmem:[%s6421_s5 + $0xc0] sm:$0xf] }
 0xdb0   : > { %3139 = vmatpush.bf16.msrb.mxu0 %v5635_v5  ;;  %v5089_v5 = vor.u32 %v5372_v35, %v5088_v50 }
 0xdb1   : > { %4982 = vmatpush.xpose.msk.msra.mxu1 %vm1373_vm5, %v6575_v56 }
 0xdb3   : > { %v2938_v39 = vpop.f32.mrf.mxu2 }
 0xdb4   : > { %v5090_v39 = vld [vmem:[%s6421_s5 + $0xd0] sm:$0xf0] }
 0xdb6   : > { %3060 = vrot.lane.b32.xlu0 %v2995_v33, %s6039_s7  ;;  %v5106_v33 = vld [vmem:[%s6421_s5 + $0xf0] sm:$0xf0] }
 0xe06   : > { %v2974_v42 = vpop.permute.xlu2 %2973 }
 0xe10   : > { %v2743_v59 = vpop.f32.mrf.mxu0 }
 0xe11   : > { %2747 = vrot.lane.b32.xlu2 %v2743_v59, %s6039_s7  ;;  %v5093_v59 = vor.u32 %v5370_v37, %v5090_v39 }
 0xe18   : > { %v2962_v40 = vpop.f32.mrf.mxu0 }
 0xe20   : > { %v2964_v45 = vpop.f32.mrf.mxu0  ;;  %v2970_v46 = vpop.permute.xlu0 %2969 }
 0xe21   : > { %v2976_v49 = vsel %vm1370_vm4, %v2970_v46, %v2974_v42  ;;  %v5366_v45 = vld [vmem:[%s6421_s5 + $0xa4] sm:$0xf] }
 0xe22   : > { %v2977_v47 = vsel %vm1373_vm5, %v2976_v49, %v2970_v46  ;;  %v5074_v49 = vld [vmem:[%s6421_s5 + $0xb0] sm:$0xf0] }
 0xe23   : > { %v2978_v52 = vsel %vm1376_vm6, %v2977_v47, %v2974_v42  ;;  %v5368_v42 = vld [vmem:[%s6421_s5 + $0xac] sm:$0xf0]  ;;  %v5077_v47 = vor.u32 %v5366_v45, %v5074_v49 }
 0xe24   : > { %v2979_v54 = vmul.f32 %v5632_v32, %v2978_v52  ;;  %v5374_v32 = vld [vmem:[%s6421_s5 + $0xe4] sm:$0xf]  ;;  %v5056_v52 = vld [vmem:[%s6421_s5 + $0x80] sm:$0xf] }
 0xe25   : > { %v5109_v36 = vor.u32 %v5374_v32, %v5106_v33 }
 0xe26   : > { %v2980_v60 = vadd.f32 %v2979_v54, %v2966_v53  ;;  %v5364_v53 = vld [vmem:[%s6421_s5 + $0x8c] sm:$0xf0]  ;;  %v5362_v54 = vld [vmem:[%s6421_s5 + $0x84] sm:$0xf] }
 0xe28   : > { %3058 = vrot.lane.b32.xlu1 %v2980_v60, %s6039_s7  ;;  %v3061_v56 = vpop.permute.xlu0 %3060 }
 0xe29   : > { %4985 = vmatpush.xpose.msk.msra.mxu2 %vm1373_vm5, %v3061_v56  ;;  %v5058_v56 = vld [vmem:[%s6421_s5 + $0x90] sm:$0xf0] }
 0xe2d   : > { %4986 = vmatpush.xpose.msk.msra.mxu2 %vm1373_vm5, %v6588_v1 }
 0xe31   : > { %4987 = vmatpush.xpose.msk.msra.mxu2 %vm1373_vm5, %v6592_v2  ;;  %v5636_v2 = vld [vmem:[%s7678_s23] sm:$0xff] }
 0xe35   : > { %3454 = vmatpush.bf16.msrb.mxu2 %v5109_v36 }
 0xe39   : > { %3455 = vmatpush.bf16.msrb.mxu2 %v5093_v59 }
 0xe3d   : > { %3456 = vmatpush.bf16.msrb.mxu2 %v5077_v47 }
 0xe6b   : > { %v2748_v61 = vpop.permute.xlu2 %2747 }
 0xe6c   : > { %v2750_v20 = vsel %vm1373_vm5, %v2675_v22, %v2748_v61  ;;  %v5061_v61 = vor.u32 %v5362_v54, %v5058_v56 }
 0xe6d   : > { %v2751_v15 = vpack.c.bf16 %v2750_v20, %v2750_v20  ;;  %v5040_v20 = vld [vmem:[%s6421_s5 + $0x60] sm:$0xf] }
 0xe6e   : > { %3457 = vmatpush.bf16.msrb.mxu2 %v5061_v61 }
 0xe6f   : > { %2760 = vmatmul.bf16.vlgmr.msrb.gmra.mxu1 %v2751_v15  ;;  %v5360_v15 = vld [vmem:[%s6421_s5 + $0x6c] sm:$0xf0] }
 0xe70   : > { %3051 = vmatpush.msrb.mxu1 %v2962_v40 }
 0xe72   : > { %3052 = vmatpush.msrb.mxu1 %v6544_v29 }
 0xe74   : > { %3053 = vmatpush.msrb.mxu1 %v6542_v26 }
 0xe7f   : > { %4983 = vmatmul.msk.f32.vlgmr.msra.gmra.mxu1 %vm1373_vm5, %v2980_v60  ;;  %v5057_v60 = vor.u32 %v5364_v53, %v5056_v52  ;;  %v5640_v53 = vld [vmem:[%s6399_s29] sm:$0x3]  ;;  %s7695_s29 = sld [smem:[#allocation30_spill]] }
 0xe80   : > { %3431 = vmatpush.bf16.msra.mxu1 %v5105_v14  ;;  %v7226_v54 = vperm.slane %v5640_v53, 1 }
 0xe84   : > { %3432 = vmatpush.bf16.msra.mxu1 %v5089_v5 }
 0xe9a   : > { %v3059_v51 = vpop.permute.xlu1 %3058 }
 0xe9b   : > { %4988 = vmatmul.msk.f32.vlgmr.msra.gmra.mxu2 %vm1373_vm5, %v3059_v51  ;;  %v5358_v51 = vld [vmem:[%s6421_s5 + $0x64] sm:$0xf] }
 0xeec   : > { %v2761_v16 = vpop.f32.mrf.mxu1 }
 0xeed   : > { %v7172_v58 = vadd.f32 %v2761_v16, %v6884_v25  ;;  %v5041_v16 = vor.u32 %v5360_v15, %v5040_v20 }
 0xeef   : > { %v3153_v17 = vmul.f32 %v7172_v58, %v7172_v58 }
 0xef4   : > { %v2763_v1 = vpop.f32.mrf.mxu1 }
 0xef5   : > { %v5042_v1 = vld [vmem:[%s6421_s5 + $0x70] sm:$0xf0] }
 0xefc   : > { %v3019_v0 = vpop.f32.mrf.mxu1 }
 0xefd   : > { %v3022_v62 = vmul.f32 0.125, %v3019_v0  ;;  %v5045_v0 = vor.u32 %v5358_v51, %v5042_v1  ;;  %v5377_v1 = vld [vmem:[%s6421_s5 + $0xf4] sm:$0xf0] }
 0xeff   : > { %v3023_v44 = vadd.f32 %v5636_v2, %v3022_v62  ;;  %3458 = vmatpush.bf16.msrb.mxu2 %v5045_v0 }
 0xf01   : > { %v3024_v4 = vsel %vm1883_vm11, %v3023_v44, -inf }
 0xf02   : > { %3025 = vmax.xlane.f32.xlu1 %v3024_v4  ;;  %v5354_v4 = vld [vmem:[%s6421_s5 + $0x44] sm:$0xf] }
 0xf1e   : > { %v3083_v29 = vpop.f32.mrf.mxu2 }
 0xf1f   : > { %v3086_v18 = vmul.f32 0.125, %v3083_v29 }
 0xf21   : > { %v3087_v26 = vadd.f32 %v5636_v2, %v3086_v18  ;;  %v5024_v2 = vld [vmem:[%s6421_s5 + $0x40] sm:$0xf]  ;;  %v5026_v18 = vld [vmem:[%s6421_s5 + $0x50] sm:$0xf0] }
 0xf23   : > { %v3088_v63 = vsel %vm1883_vm11, %v3087_v26, -inf }
 0xf24   : > { %3089 = vmax.xlane.f32.xlu0 %v3088_v63  ;;  %v5008_v63 = vld [vmem:[%s6421_s5 + $0x20] sm:$0xf] }
 0xf75   : > { %v3026_v55 = vpop.xlane.xlu1 %3025 }
 0xf76   : > { %v3027_v6 = vsub.f32 %v3023_v44, %v3026_v55  ;;  %v5356_v44 = vld [vmem:[%s6421_s5 + $0x4c] sm:$0xf0] }
 0xf77   : > { %v5025_v29 = vor.u32 %v5356_v44, %v5024_v2  ;;  %v5352_v55 = vld [vmem:[%s6421_s5 + $0x2c] sm:$0xf0] }
 0xf78   : > { %v3028_v21 = vmul.f32 1.442695, %v3027_v6  ;;  %v5350_v6 = vld [vmem:[%s6421_s5 + $0x24] sm:$0xf] }
 0xf7a   : > { %5552 = vpow2.f32 %v3028_v21  ;;  %v5009_v21 = vor.u32 %v5352_v55, %v5008_v63  ;;  %v5064_v63 = vld [vmem:[%s6421_s5 + $0x88] sm:$0xf]  ;;  %v5365_v55 = vld [vmem:[%s6421_s5 + $0x94] sm:$0xf0] }
 0xf80   : > { %v7154_v7 = vpop.eup %5552 }
 0xf81   : > { %v3030_v27 = vsel %vm1883_vm11, %v7154_v7, 0.0 }
 0xf82   : > { %3031 = vadd.xlane.f32.xlu0 %v3030_v27  ;;  %v5010_v27 = vld [vmem:[%s6421_s5 + $0x30] sm:$0xf0] }
 0xf83   : > { %v5013_v28 = vor.u32 %v5350_v6, %v5010_v27  ;;  %v5065_v6 = vor.u32 %v5365_v55, %v5064_v63  ;;  %v5359_v63 = vld [vmem:[%s6421_s5 + $0x6c] sm:$0xf]  ;;  %v5050_v55 = vld [vmem:[%s6421_s5 + $0x78] sm:$0xf0] }
 0xf8a   : > { %3155 = vadd.xlane.f32.xlu0 %v3150_v30 }
 0xf92   : > { %3157 = vadd.xlane.f32.xlu0 %v3151_v12 }
 0xf97   : > { %v3090_v8 = vpop.xlane.xlu0 %3089 }
 0xf98   : > { %v3091_v13 = vsub.f32 %v3087_v26, %v3090_v8  ;;  %v5029_v26 = vor.u32 %v5354_v4, %v5026_v18  ;;  %v5096_v4 = vld [vmem:[%s6421_s5 + $0xc8] sm:$0xf] }
 0xf99   : > { %v5080_v18 = vld [vmem:[%s6421_s5 + $0xa8] sm:$0xf] }
 0xf9a   : > { %v3092_v19 = vmul.f32 1.442695, %v3091_v13  ;;  %3161 = vadd.xlane.f32.xlu0 %v3153_v17  ;;  %3459 = vmatpush.bf16.msrb.mxu2 %v5029_v26  ;;  %v4992_v13 = vld [vmem:[%s6421_s5] sm:$0xf]  ;;  %v5348_v17 = vld [vmem:[%s6421_s5 + $0xc] sm:$0xf0] }
 0xf9b   : > { %v4993_v48 = vor.u32 %v5348_v17, %v4992_v13  ;;  %v5369_v26 = vld [vmem:[%s6421_s5 + $0xb4] sm:$0xf0] }
 0xf9c   : > { %5554 = vpow2.f32 %v3092_v19  ;;  %v5346_v19 = vld [vmem:[%s6421_s5 + $0x4] sm:$0xf]  ;;  %v5353_v13 = vld [vmem:[%s6421_s5 + $0x34] sm:$0xf0] }
 0xf9d   : > { %v4997_v32 = vor.u32 %v5346_v19, %v4994_v3  ;;  %v5000_v19 = vld [vmem:[%s6421_s5 + $0x8] sm:$0xf] }
 0xf9e   : > { %3460 = vmatpush.bf16.msrb.mxu2 %v5013_v28  ;;  %v5032_v28 = vld [vmem:[%s6421_s5 + $0x48] sm:$0xf] }
 0xfa2   : > { %v7176_v31 = vpop.eup %5554  ;;  %3461 = vmatpush.bf16.msrb.mxu2 %v4997_v32 }
 0xfa3   : > { %v3094_v22 = vsel %vm1883_vm11, %v7176_v31, 0.0 }
 0xfa4   : > { %3095 = vadd.xlane.f32.xlu2 %v3094_v22 }
 0xfbc   : > { %3100 = vrot.lane.b32.xlu2 %v2962_v40, %s6039_s7  ;;  %v5072_v40 = vld [vmem:[%s6421_s5 + $0xa0] sm:$0xf] }
 0xfbd   : > { %v5073_v46 = vor.u32 %v5368_v42, %v5072_v40 }
 0xfbf   : > { %3433 = vmatpush.bf16.msra.mxu1 %v5073_v46 }
 0xfc3   : > { %3434 = vmatpush.bf16.msra.mxu1 %v5057_v60 }
 0xfc7   : > { %3435 = vmatpush.bf16.msra.mxu1 %v5041_v16  ;;  %v5112_v16 = vld [vmem:[%s6421_s5 + $0xe8] sm:$0xf] }
 0xfc8   : > { %v5113_v2 = vor.u32 %v5377_v1, %v5112_v16  ;;  %v5114_v16 = vld [vmem:[%s6421_s5 + $0xf8] sm:$0xf0] }
 0xfcb   : > { %3436 = vmatpush.bf16.msra.mxu1 %v5025_v29  ;;  %v5373_v29 = vld [vmem:[%s6421_s5 + $0xd4] sm:$0xf0] }
 0xfcf   : > { %3437 = vmatpush.bf16.msra.mxu1 %v5009_v21  ;;  %v5048_v21 = vld [vmem:[%s6421_s5 + $0x68] sm:$0xf] }
 0xfd3   : > { %3438 = vmatpush.bf16.msra.mxu1 %v4993_v48 }
 0xfe5   : > { %3159 = vadd.xlane.f32.xlu2 %v3152_v34 }
 0xff5   : > { %v3032_v62 = vpop.xlane.xlu0 %3031 }
 0xff6   : > { %5556 = vrcp.f32 %v3032_v62 }
 0xffc   : > { %v5557_v30 = vpop.eup %5556 }
 0xffd   : > { %v3034_v12 = vmul.f32 %v5557_v30, %v7154_v7  ;;  %v3156_v8 = vpop.xlane.xlu0 %3155  ;;  %v5357_v30 = vld [vmem:[%s6421_s5 + $0x54] sm:$0xf0] }
 0xffe   : > { %v3165_v22 = vmul.f32 %v3156_v8, %v6533_v9  ;;  %v5016_v8 = vld [vmem:[%s6421_s5 + $0x28] sm:$0xf] }
 0xfff   : > { %4984 = vmatmul.msk.f32.vlgmr.msrb.gmra.mxu1 %vm1883_vm11, %v3034_v12  ;;  %v5033_v12 = vor.u32 %v5357_v30, %v5032_v28  ;;  %v5017_v17 = vor.u32 %v5353_v13, %v5016_v8  ;;  %v5351_v28 = vld [vmem:[%s6421_s5 + $0x2c] sm:$0xf]  ;;  %v5018_v30 = vld [vmem:[%s6421_s5 + $0x38] sm:$0xf0] }
0x1000   : > { %v3170_v14 = vadd.f32 1e-06, %v3165_v22  ;;  %v5349_v22 = vld [vmem:[%s6421_s5 + $0x14] sm:$0xf0]  ;;  %v5347_v8 = vld [vmem:[%s6421_s5 + $0xc] sm:$0xf] }
0x1001   : > { %v5001_v48 = vor.u32 %v5349_v22, %v5000_v19  ;;  %v5002_v13 = vld [vmem:[%s6421_s5 + $0x18] sm:$0xf0] }
0x1002   : > { %5558 = vrsqrt.f32 %v3170_v14  ;;  %vm3181_vm6 = vweird.f32 %v3170_v14 }
0x1005   : > { %v3158_v33 = vpop.xlane.xlu0 %3157 }
0x1006   : > { %v3166_v34 = vmul.f32 %v3158_v33, %v6533_v9 }
0x1008   : > { %v5559_v7 = vpop.eup %5558  ;;  %v3171_v36 = vadd.f32 1e-06, %v3166_v34 }
0x1009   : > { %v3176_v50 = vmul.f32 %v5559_v7, %v3170_v14  ;;  %vm3182_vm4 = vweird.f32 %v5559_v7 }
0x100a   : > { %5560 = vrsqrt.f32 %v3171_v36  ;;  %vm3183_vm8 = vmor %vm3181_vm6, %vm3182_vm4  ;;  %vm3191_vm10 = vweird.f32 %v3171_v36 }
0x100b   : > { %v3177_v35 = vmul.f32 %v5559_v7, %v3176_v50 }
0x100d   : > { %v3178_v37 = vmul.f32 0.5, %v3177_v35  ;;  %v3162_v3 = vpop.xlane.xlu0 %3161 }
0x100e   : > { %v3168_v32 = vmul.f32 %v3162_v3, %v6533_v9 }
0x100f   : > { %v3179_v5 = vsub.f32 1.5, %v3178_v37 }
0x1010   : > { %v5561_v39 = vpop.eup %5560  ;;  %v3173_v14 = vadd.f32 1e-06, %v3168_v32 }
0x1011   : > { %v3186_v59 = vmul.f32 %v5561_v39, %v3171_v36  ;;  %v3180_v40 = vmul.f32 %v5559_v7, %v3179_v5  ;;  %vm3192_vm9 = vweird.f32 %v5561_v39 }
0x1012   : > { %vm3193_vm12 = vmor %vm3191_vm10, %vm3192_vm9  ;;  %vm3211_vm13 = vweird.f32 %v3173_v14 }
0x1013   : > { %v3187_v42 = vmul.f32 %v5561_v39, %v3186_v59  ;;  %v3184_v46 = vsel %vm3183_vm8, %v5559_v7, %v3180_v40 }
0x1014   : > { %v3225_v60 = vmul.f32 %v3184_v46, %v7159_v10 }
0x1015   : > { %v3188_v45 = vmul.f32 0.5, %v3187_v42 }
0x1016   : > { %v3231_v20 = vmul.f32 %v7226_v54, %v3225_v60 }
0x1017   : > { %v3189_v49 = vsub.f32 1.5, %v3188_v45  ;;  %v3096_v47 = vpop.xlane.xlu2 %3095 }
0x1018   : > { %5562 = vrcp.f32 %v3096_v47 }
0x1019   : > { %v3190_v52 = vmul.f32 %v5561_v39, %v3189_v49  ;;  %5564 = vrsqrt.f32 %v3173_v14 }
0x101b   : > { %v3194_v56 = vsel %vm3193_vm12, %v5561_v39, %v3190_v52 }
0x101c   : > { %v3226_v61 = vmul.f32 %v3194_v56, %v7167_v57 }
0x101e   : > { %v3232_v15 = vmul.f32 %v7226_v54, %v3226_v61  ;;  %v5563_v0 = vpop.eup %5562 }
0x101f   : > { %v3101_v51 = vpop.permute.xlu2 %3100  ;;  %v3098_v44 = vmul.f32 %v5563_v0, %v7176_v31  ;;  %v5081_v31 = vor.u32 %v5369_v26, %v5080_v18  ;;  %v5565_v33 = vpop.eup %5564  ;;  %v5371_v0 = vld [vmem:[%s6421_s5 + $0xcc] sm:$0xf]  ;;  %v5066_v26 = vld [vmem:[%s6421_s5 + $0x98] sm:$0xf0] }
0x1020   : > { %3119 = vmatpush.msra.mxu3 %v3101_v51  ;;  %v7234_v62 = vpack.c.bf16 %v3232_v15, %v3231_v20  ;;  %v3206_v34 = vmul.f32 %v5565_v33, %v3173_v14  ;;  %v5375_v51 = vld [vmem:[%s6421_s5 + $0xec] sm:$0xf] }
0x1021   : > { %v5117_v1 = vor.u32 %v5375_v51, %v5114_v16  ;;  %v5363_v18 = vld [vmem:[%s6421_s5 + $0x8c] sm:$0xf]  ;;  %v5381_v51 = vld [vmem:[%s6427_s26 + $0x18] sm:$0xff] }
0x1022   : > { %3120 = vmatpush.msra.mxu3 %v6657_v41  ;;  %3439 = vmatmul.bf16.vlgmr.msra.gmra.mxu1 %v7234_v62  ;;  %v5097_v41 = vor.u32 %v5373_v29, %v5096_v4  ;;  %v3207_v50 = vmul.f32 %v5565_v33, %v3206_v34  ;;  %v5367_v4 = vld [vmem:[%s6421_s5 + $0xac] sm:$0xf]  ;;  %v5082_v29 = vld [vmem:[%s6421_s5 + $0xb8] sm:$0xf0] }
0x1023   : > { %3462 = vmatmul.bf16.vlgmr.msrb.gmra.mxu2 %v7234_v62  ;;  %3500 = vmatpush.bf16.msra.mxu0 %v5117_v1  ;;  %v5389_v16 = vld [vmem:[%s6427_s26 + $0x58] sm:$0xff] }
0x1024   : > { %3121 = vmatpush.msra.mxu3 %v6659_v43  ;;  %v5361_v43 = vld [vmem:[%s6421_s5 + $0x74] sm:$0xf0]  ;;  %v3208_v37 = vmul.f32 0.5, %v3207_v50 }
0x1025   : > { %4989 = vmatmul.msk.f32.vlgmr.msra.gmra.mxu3 %vm1883_vm11, %v3098_v44  ;;  %v5049_v27 = vor.u32 %v5361_v43, %v5048_v21  ;;  %vm3212_vm11 = vweird.f32 %v5565_v33  ;;  %v5355_v21 = vld [vmem:[%s6421_s5 + $0x4c] sm:$0xf]  ;;  %v5034_v43 = vld [vmem:[%s6421_s5 + $0x58] sm:$0xf0] }
0x1026   : > { %3477 = vmatpush.bf16.msrb.mxu3 %v5113_v2  ;;  %v3209_v5 = vsub.f32 1.5, %v3208_v37  ;;  %vm3213_vm14 = vmor %vm3211_vm13, %vm3212_vm11  ;;  %v5098_v2 = vld [vmem:[%s6421_s5 + $0xd8] sm:$0xf0]  ;;  %s5194_s5 = sshll.u32 %s7695_s29, 3 }
0x1027   : > { %v5101_v44 = vor.u32 %v5371_v0, %v5098_v2  ;;  %s7541_s30 = scalar_lea.hbm %s7698_s1, %s5194_s5 }
0x1028   : > { %v3210_v40 = vmul.f32 %v5565_v33, %v3209_v5 }
0x1029   : > { %3501 = vmatpush.bf16.msra.mxu0 %v5101_v44 }
0x102a   : > { %3478 = vmatpush.bf16.msrb.mxu3 %v5097_v41  ;;  %v3214_v46 = vsel %vm3213_vm14, %v5565_v33, %v3210_v40  ;;  %v5085_v41 = vor.u32 %v5367_v4, %v5082_v29  ;;  %v5392_v40 = vld [vmem:[%s6427_s26 + $0x70] sm:$0xff] }
0x102b   : > { %v3228_v52 = vmul.f32 %v3214_v46, %v7172_v58  ;;  %v5383_v46 = vld [vmem:[%s6427_s26 + $0x28] sm:$0xff]  ;;  %v5380_v29 = vld [vmem:[%s6427_s26 + $0x10] sm:$0xff] }
0x102d   : > { %v3234_v61 = vmul.f32 %v7226_v54, %v3228_v52  ;;  %3502 = vmatpush.bf16.msra.mxu0 %v5085_v41  ;;  %v5382_v52 = vld [vmem:[%s6427_s26 + $0x20] sm:$0xff]  ;;  %v5388_v41 = vld [vmem:[%s6427_s26 + $0x50] sm:$0xff] }
0x102e   : > { %3479 = vmatpush.bf16.msrb.mxu3 %v5081_v31  ;;  %v5069_v31 = vor.u32 %v5363_v18, %v5066_v26 }
0x1031   : > { %3503 = vmatpush.bf16.msra.mxu0 %v5069_v31 }
0x1032   : > { %3480 = vmatpush.bf16.msrb.mxu3 %v5065_v6  ;;  %v5053_v6 = vor.u32 %v5359_v63, %v5050_v55 }
0x1035   : > { %3504 = vmatpush.bf16.msra.mxu0 %v5053_v6  ;;  %v5379_v6 = vld [vmem:[%s6427_s26 + $0x8] sm:$0xff] }
0x1036   : > { %3481 = vmatpush.bf16.msrb.mxu3 %v5049_v27  ;;  %v5037_v27 = vor.u32 %v5355_v21, %v5034_v43  ;;  %v5387_v21 = vld [vmem:[%s6427_s26 + $0x48] sm:$0xff] }
0x1039   : > { %3505 = vmatpush.bf16.msra.mxu0 %v5037_v27 }
0x103a   : > { %3482 = vmatpush.bf16.msrb.mxu3 %v5033_v12  ;;  %v5021_v12 = vor.u32 %v5351_v28, %v5018_v30  ;;  %v5378_v30 = vld [vmem:[%s6427_s26] sm:$0xff] }
0x103d   : > { %3506 = vmatpush.bf16.msra.mxu0 %v5021_v12  ;;  %v5386_v12 = vld [vmem:[%s6427_s26 + $0x40] sm:$0xff] }
0x103e   : > { %3483 = vmatpush.bf16.msrb.mxu3 %v5017_v17  ;;  %v5005_v17 = vor.u32 %v5347_v8, %v5002_v13 }
0x1041   : > { %3507 = vmatpush.bf16.msra.mxu0 %v5005_v17 }
0x1042   : > { %3484 = vmatpush.bf16.msrb.mxu3 %v5001_v48 }
0x1045   : > { %3485 = vmatmul.bf16.vlgmr.msrb.gmra.mxu3 %v7234_v62 }
0x1058   : > { %v3160_v7 = vpop.xlane.xlu2 %3159 }
0x1059   : > { %v3167_v36 = vmul.f32 %v3160_v7, %v6533_v9 }
0x105b   : > { %v3172_v35 = vadd.f32 1e-06, %v3167_v36 }
0x105d   : > { %5566 = vrsqrt.f32 %v3172_v35  ;;  %vm3201_vm0 = vweird.f32 %v3172_v35 }
0x1063   : > { %v5567_v39 = vpop.eup %5566 }
0x1064   : > { %v3196_v59 = vmul.f32 %v5567_v39, %v3172_v35  ;;  %vm3202_vm15 = vweird.f32 %v5567_v39  ;;  %v5385_v35 = vld [vmem:[%s6427_s26 + $0x38] sm:$0xff] }
0x1065   : > { %vm3203_vm1 = vmor %vm3201_vm0, %vm3202_vm15  ;;  %3867 = vmatpush.bf16.msrb.mxu1 %v5385_v35 }
0x1066   : > { %v3197_v42 = vmul.f32 %v5567_v39, %v3196_v59  ;;  %v5384_v59 = vld [vmem:[%s6427_s26 + $0x30] sm:$0xff] }
0x1068   : > { %v3198_v45 = vmul.f32 0.5, %v3197_v42 }
0x1069   : > { %3868 = vmatpush.bf16.msrb.mxu1 %v5384_v59 }
0x106a   : > { %v3199_v49 = vsub.f32 1.5, %v3198_v45 }
0x106c   : > { %v3200_v47 = vmul.f32 %v5567_v39, %v3199_v49  ;;  %v5391_v49 = vld [vmem:[%s6427_s26 + $0x68] sm:$0xff] }
0x106d   : > { %3869 = vmatpush.bf16.msrb.mxu1 %v5383_v46 }
0x106e   : > { %v3204_v53 = vsel %vm3203_vm1, %v5567_v39, %v3200_v47 }
0x106f   : > { %v3227_v60 = vmul.f32 %v3204_v53, %v7185_v24  ;;  %v5390_v53 = vld [vmem:[%s6427_s26 + $0x60] sm:$0xff] }
0x1071   : > { %v3233_v56 = vmul.f32 %v7226_v54, %v3227_v60  ;;  %3870 = vmatpush.bf16.msrb.mxu1 %v5382_v52 }
0x1073   : > { %v3237_v20 = vpack.c.bf16 %v3234_v61, %v3233_v56 }
0x1075   : > { %3444 = vmatmul.bf16.gmra.mxu1 %v3237_v20  ;;  %3467 = vmatmul.bf16.gmra.mxu2 %v3237_v20 }
0x1076   : > { %3490 = vmatmul.bf16.gmra.mxu3 %v3237_v20  ;;  %3871 = vmatpush.bf16.msrb.mxu1 %v5381_v51 }
0x107a   : > { %3872 = vmatpush.bf16.msrb.mxu1 %v5380_v29 }
0x107c   : > { %v3055_v19 = vpop.f32.mrf.mxu1 }
0x107e   : > { %3873 = vmatpush.bf16.msrb.mxu1 %v5379_v6 }
0x1082   : > { %3874 = vmatpush.bf16.msrb.mxu1 %v5378_v30 }
0x109f   : > { %v7287_v7 = vpop.f32.mrf.mxu1 }
0x10a0   : > { %v5118_v37 = vmul.f32 -1.442695, %v7287_v7 }
0x10a2   : > { %5568 = vpow2.f32 %v5118_v37 }
0x10a6   : > { %v7289_v36 = vpop.f32.mrf.mxu2 }
0x10a7   : > { %v7291_v50 = vpop.f32.mrf.mxu1  ;;  %v5119_v39 = vmul.f32 -1.442695, %v7289_v36 }
0x10a8   : > { %v3123_v15 = vpop.f32.mrf.mxu3  ;;  %v5120_v5 = vmul.f32 -1.442695, %v7291_v50  ;;  %v5569_v60 = vpop.eup %5568 }
0x10a9   : > { %3127 = vrot.lane.b32.xlu1 %v3123_v15, %s6039_s7  ;;  %s7696_s7 = sld [smem:[#allocation44_spill]] }
0x10aa   : > { %5570 = vpow2.f32 %v5120_v5 }
0x10ab   : > { %5572 = vpow2.f32 %v5119_v39 }
0x10af   : > { %s3939_s20 = scalar_lea.hbm %s7696_s7, %s5194_s5 }
0x10b0   : > { %v5571_v56 = vpop.eup %5570  ;;  %s3943_s3 = sshll.u32 %s3939_s20, 4  ;;  %s3944_s3 = int_to_ptr.hbm [resolvable:$true] %s3943_s3 }
0x10b1   : > { %v5573_v61 = vpop.eup %5572  ;;  %v7313_v15 = vadd.f32 1.0, %v5571_v56  ;;  %s5926_s4 = sshra.s32 %s3944_s3, 4  ;;  %s5927_s4 = int_to_ptr.hbm [resolvable:$true] %s5926_s4 }
0x10b2   : > { %v7317_v0 = vadd.f32 1.0, %v5573_v61  ;;  %s5928_s17 = scalar_lea.hbm %s5927_s4, 8  ;;  %p5933_p2 = scmp.lt.s32.totalorder %s5927_s4, %s7696_s7 }
0x10b3   : > { %v3604_v29 = vand.u32 2147483648, %v7313_v15  ;;  %vm3598_vm10 = vweird.f32 %v7313_v15  ;;  %p5929_p6 = scmp.ne.s32.totalorder %s5927_s4, %s5928_s17 }
0x10b4   : > { %vm3583_vm15 = vweird.f32 %v7317_v0 }
0x10b5   : > { %p5930_p1 = pnand %p5929_p6, %p6165_p10 }
0x10b7   : > { %p5931_p0 = pneg %p5930_p1 }
0x10f2   : > { %v7303_v45 = vpop.f32.mrf.mxu1 }
0x10f3   : > { %v5122_v55 = vmul.f32 -1.442695, %v7303_v45 }
0x10fa   : > { %v7319_v2 = vpop.f32.mrf.mxu1 }
0x10fb   : > { %v5124_v31 = vmul.f32 -1.442695, %v7319_v2 }
0x111b   : > { %v3128_v22 = vpop.permute.xlu1 %3127 }
0x111c   : > { %v3130_v48 = vsel %vm1373_vm5, %v3055_v19, %v3128_v22 }
0x111d   : > { %v3131_v3 = vpack.c.bf16 %v3130_v48, %v3130_v48 }
0x111f   : > { %3140 = vmatmul.bf16.vlgmr.msrb.gmra.mxu0 %v3131_v3 }
0x112f   : > { %3508 = vmatmul.bf16.vlgmr.msra.gmra.mxu0 %v7234_v62  ;;  %v5393_v62 = vld [vmem:[%s6427_s26 + $0x78] sm:$0xff] }
0x1130   : > { %3890 = vmatpush.bf16.msra.mxu2 %v5393_v62 }
0x1134   : > { %3891 = vmatpush.bf16.msra.mxu2 %v5392_v40 }
0x1138   : > { %3892 = vmatpush.bf16.msra.mxu2 %v5391_v49 }
0x113c   : > { %3893 = vmatpush.bf16.msra.mxu2 %v5390_v53 }
0x113f   : > { %3513 = vmatmul.bf16.gmra.mxu0 %v3237_v20  ;;  %v7311_v20 = vadd.f32 1.0, %v5569_v60 }
0x1140   : > { %3894 = vmatpush.bf16.msra.mxu2 %v5389_v16 }
0x1141   : > { %v3572_v16 = vand.u32 2147483647, %v7311_v20  ;;  %vm3568_vm6 = vweird.f32 %v7311_v20 }
0x1143   : > { %vm7392_vm9 = vcmp.eq.f32.partialorder %v3572_v16, 8.507059e+37 }
0x1144   : > { %3895 = vmatpush.bf16.msra.mxu2 %v5388_v41 }
0x1148   : > { %3896 = vmatpush.bf16.msra.mxu2 %v5387_v21 }
0x114c   : > { %3897 = vmatpush.bf16.msra.mxu2 %v5386_v12 }
0x119c   : > { %v3141_v32 = vpop.f32.mrf.mxu0 }
0x119d   : > { %v7283_v14 = vadd.f32 %v3141_v32, %v7024_v38  ;;  %v7296_v38 = vpop.f32.mrf.mxu2 }
0x119e   : > { %v5121_v42 = vmul.f32 -1.442695, %v7296_v38 }
0x119f   : > { %v3154_v33 = vmul.f32 %v7283_v14, %v7283_v14 }
0x11a0   : > { %5574 = vpow2.f32 %v5121_v42 }
0x11a1   : > { %3163 = vadd.xlane.f32.xlu1 %v3154_v33  ;;  %5576 = vrcp.f32 %v7311_v20 }
0x11a2   : > { %5578 = vrcp.f32 %v7313_v15 }
0x11a3   : > { %5580 = vrcp.f32 %v7317_v0 }
0x11a4   : > { %v3143_v34 = vpop.f32.mrf.mxu0 }
0x11a5   : > { %v7307_v47 = vpop.f32.mrf.mxu2 }
0x11a6   : > { %v5575_v1 = vpop.eup %5574  ;;  %v5123_v27 = vmul.f32 -1.442695, %v7307_v47 }
0x11a7   : > { %v7326_v18 = vadd.f32 1.0, %v5575_v1  ;;  %v7337_v43 = vpop.eup %5576  ;;  %v3574_v1 = vand.u32 2147483648, %v7311_v20 }
0x11a8   : > { %v7340_v28 = vpop.eup %5578  ;;  %v3564_v17 = vmul.f32 %v7337_v43, %v7311_v20  ;;  %vm3569_vm7 = vweird.f32 %v7337_v43 }
0x11a9   : > { %v7344_v8 = vpop.eup %5580  ;;  %v3594_v19 = vmul.f32 %v7340_v28, %v7313_v15  ;;  %vm3599_vm4 = vweird.f32 %v7340_v28  ;;  %vm7388_vm8 = vmor %vm3568_vm6, %vm3569_vm7  ;;  %vm3613_vm14 = vweird.f32 %v7326_v18 }
0x11aa   : > { %v3565_v35 = vsub.f32 1.0, %v3564_v17  ;;  %v3579_v40 = vmul.f32 %v7344_v8, %v7317_v0  ;;  %v3602_v17 = vand.u32 2147483647, %v7313_v15  ;;  %vm7400_vm12 = vmor %vm3598_vm10, %vm3599_vm4  ;;  %vm3584_vm13 = vweird.f32 %v7344_v8 }
0x11ab   : > { %v3595_v62 = vsub.f32 1.0, %v3594_v19 }
0x11ac   : > { %v3566_v52 = vmul.f32 %v7337_v43, %v3565_v35  ;;  %v3580_v51 = vsub.f32 1.0, %v3579_v40  ;;  %vm3603_vm0 = vcmp.eq.f32.partialorder %v3602_v17, 8.507059e+37 }
0x11ad   : > { %v7328_v26 = vpop.f32.mrf.mxu2  ;;  %v3596_v53 = vmul.f32 %v7340_v28, %v3595_v62  ;;  %v3617_v62 = vand.u32 2147483647, %v7326_v18 }
0x11ae   : > { %v3581_v6 = vmul.f32 %v7344_v8, %v3580_v51 }
0x11b0   : > { %v3582_v35 = vadd.f32 %v7344_v8, %v3581_v6 }
0x1214   : > { %v3164_v44 = vpop.xlane.xlu1 %3163 }
0x1215   : > { %v3169_v4 = vmul.f32 %v3164_v44, %v6533_v9  ;;  %v5125_v9 = vmul.f32 -1.442695, %v7328_v26  ;;  %v7371_v44 = vpop.f32.mrf.mxu0 }
0x1217   : > { %v3174_v63 = vadd.f32 1e-06, %v3169_v4 }
0x1219   : > { %5582 = vrsqrt.f32 %v3174_v63  ;;  %vm3221_vm2 = vweird.f32 %v3174_v63 }
0x121a   : > { %5584 = vrcp.f32 %v7326_v18 }
0x121b   : > { %5586 = vpow2.f32 %v5124_v31  ;;  %v7376_v31 = vpop.f32.mrf.mxu3 }
0x121c   : > { %5588 = vpow2.f32 %v5122_v55  ;;  %v3567_v55 = vadd.f32 %v7337_v43, %v3566_v52 }
0x121d   : > { %5590 = vpow2.f32 %v5125_v9  ;;  %v3597_v9 = vadd.f32 %v7340_v28, %v3596_v53 }
0x121e   : > { %5592 = vpow2.f32 %v5123_v27 }
0x121f   : > { %v5583_v13 = vpop.eup %5582  ;;  %v3601_v15 = vsel %vm7400_vm12, %v7340_v28, %v3597_v9  ;;  %v3589_v28 = vand.u32 2147483648, %v7317_v0 }
0x1220   : > { %v7350_v22 = vpop.eup %5584  ;;  %v3216_v48 = vmul.f32 %v5583_v13, %v3174_v63  ;;  %vm3222_vm5 = vweird.f32 %v5583_v13 }
0x1221   : > { %v5587_v3 = vpop.eup %5586  ;;  %v3609_v37 = vmul.f32 %v7350_v22, %v7326_v18  ;;  %vm3223_vm3 = vmor %vm3221_vm2, %vm3222_vm5  ;;  %vm3614_vm11 = vweird.f32 %v7350_v22  ;;  %vm3618_vm2 = vcmp.eq.f32.partialorder %v3617_v62, 8.507059e+37 }
0x1222   : > { %v5589_v32 = vpop.eup %5588  ;;  %v3217_v33 = vmul.f32 %v5583_v13, %v3216_v48  ;;  %v7354_v5 = vadd.f32 1.0, %v5587_v3  ;;  %vm7428_vm1 = vmor %vm3613_vm14, %vm3614_vm11 }
0x1223   : > { %v5591_v34 = vpop.eup %5590  ;;  %v7358_v42 = vadd.f32 1.0, %v5589_v32  ;;  %v3610_v60 = vsub.f32 1.0, %v3609_v37  ;;  %vm7443_vm5 = vmor %vm3583_vm15, %vm3584_vm13  ;;  %v3488_v51 = vpop.f32.mrf.mxu3 }
0x1224   : > { %v3218_v39 = vmul.f32 0.5, %v3217_v33  ;;  %v5593_v59 = vpop.eup %5592  ;;  %v7360_v46 = vadd.f32 1.0, %v5591_v34  ;;  %5594 = vrcp.f32 %v7354_v5  ;;  %v3571_v33 = vsel %vm7388_vm8, %v7337_v43, %v3567_v55 }
0x1225   : > { %v7364_v56 = vadd.f32 1.0, %v5593_v59  ;;  %5596 = vrcp.f32 %v7358_v42  ;;  %v3611_v41 = vmul.f32 %v7350_v22, %v3610_v60  ;;  %v3619_v34 = vand.u32 2147483648, %v7326_v18 }
0x1226   : > { %v3219_v49 = vsub.f32 1.5, %v3218_v39  ;;  %5598 = vrcp.f32 %v7360_v46  ;;  %v3587_v39 = vand.u32 2147483647, %v7317_v0  ;;  %vm3628_vm7 = vweird.f32 %v7358_v42 }
0x1227   : > { %5600 = vrcp.f32 %v7364_v56  ;;  %v3612_v48 = vadd.f32 %v7350_v22, %v3611_v41  ;;  %v3620_v60 = vor.u32 1.1754944e-38, %v3619_v34  ;;  %vm3658_vm8 = vweird.f32 %v7354_v5 }
0x1228   : > { %v3220_v61 = vmul.f32 %v5583_v13, %v3219_v49  ;;  %v3632_v62 = vand.u32 2147483647, %v7358_v42  ;;  %vm3673_vm13 = vweird.f32 %v7360_v46  ;;  %vm3643_vm14 = vweird.f32 %v7364_v56 }
0x1229   : > { %v3616_v40 = vsel %vm7428_vm1, %v7350_v22, %v3612_v48  ;;  %v3586_v22 = vsel %vm7443_vm5, %v7344_v8, %v3582_v35 }
0x122a   : > { %v3224_v4 = vsel %vm3223_vm3, %v5583_v13, %v3220_v61  ;;  %v7386_v27 = vpop.eup %5594  ;;  %v3575_v13 = vor.u32 1.1754944e-38, %v3574_v1  ;;  %v3511_v61 = vpop.f32.mrf.mxu0  ;;  %v3621_v41 = vsel %vm3618_vm2, %v3620_v60, %v3616_v40  ;;  %vm3588_vm3 = vcmp.eq.f32.partialorder %v3587_v39, 8.507059e+37 }
0x122b   : > { %v3229_v63 = vmul.f32 %v3224_v4, %v7283_v14  ;;  %v7398_v20 = vpop.eup %5596  ;;  %v3654_v37 = vmul.f32 %v7386_v27, %v7354_v5  ;;  %v3590_v4 = vor.u32 1.1754944e-38, %v3589_v28  ;;  %v3716_v30 = vmul.f32 %v3621_v41, %v7296_v38 }
0x122c   : > { %v7406_v32 = vpop.eup %5598  ;;  %v3624_v49 = vmul.f32 %v7398_v20, %v7358_v42  ;;  %v3576_v52 = vsel %vm7392_vm9, %v3575_v13, %v3571_v33  ;;  %vm3659_vm4 = vweird.f32 %v7386_v27  ;;  %vm3629_vm6 = vweird.f32 %v7398_v20 }
0x122d   : > { %v3235_v21 = vmul.f32 %v7226_v54, %v3229_v63  ;;  %v3605_v54 = vor.u32 1.1754944e-38, %v3604_v29  ;;  %v7421_v43 = vpop.eup %5600  ;;  %v3669_v0 = vmul.f32 %v7406_v32, %v7360_v46  ;;  %v3655_v1 = vsub.f32 1.0, %v3654_v37  ;;  %v3491_v37 = vpop.f32.mrf.mxu3  ;;  %vm7477_vm12 = vmor %vm3658_vm8, %vm3659_vm4 }
0x122e   : > { %v3639_v16 = vmul.f32 %v7421_v43, %v7364_v56  ;;  %v3625_v63 = vsub.f32 1.0, %v3624_v49  ;;  %v3713_v9 = vmul.f32 %v3576_v52, %v7287_v7  ;;  %v3591_v6 = vsel %vm3588_vm3, %v3590_v4, %v3586_v22  ;;  %vm7486_vm11 = vmor %vm3628_vm7, %vm3629_vm6 }
0x122f   : > { %v3238_v3 = vpack.c.bf16 %v3235_v21, %v3235_v21  ;;  %v3606_v18 = vsel %vm3603_vm0, %v3605_v54, %v3601_v15  ;;  %v3670_v55 = vsub.f32 1.0, %v3669_v0  ;;  %v3656_v12 = vmul.f32 %v7386_v27, %v3655_v1 }
0x1230   : > { %v3715_v29 = vmul.f32 %v3606_v18, %v7291_v50  ;;  %v3640_v8 = vsub.f32 1.0, %v3639_v16  ;;  %v3723_v13 = vmul.f32 %v3713_v9, %v7376_v31  ;;  %v3714_v17 = vmul.f32 %v3591_v6, %v7289_v36 }
0x1231   : > { %3449 = vmatmul.bf16.gmra.mxu1 %v3238_v3  ;;  %3472 = vmatmul.bf16.gmra.mxu2 %v3238_v3  ;;  %v3626_v19 = vmul.f32 %v7398_v20, %v3625_v63  ;;  %v3671_v50 = vmul.f32 %v7406_v32, %v3670_v55  ;;  %v3726_v54 = vmul.f32 %v3716_v30, %v3511_v61  ;;  %v3662_v36 = vand.u32 2147483647, %v7354_v5 }
0x1232   : > { %3495 = vmatmul.bf16.gmra.mxu3 %v3238_v3  ;;  %3518 = vmatmul.bf16.gmra.mxu0 %v3238_v3  ;;  %v3725_v21 = vmul.f32 %v3715_v29, %v3488_v51  ;;  %v3641_v7 = vmul.f32 %v7421_v43, %v3640_v8  ;;  %v3657_v3 = vadd.f32 %v7386_v27, %v3656_v12  ;;  %v3664_v31 = vand.u32 2147483648, %v7354_v5  ;;  %v3514_v33 = vpop.f32.mrf.mxu0 }
0x1233   : > { %v3724_v38 = vmul.f32 %v3714_v17, %v7371_v44  ;;  %v3627_v15 = vadd.f32 %v7398_v20, %v3626_v19  ;;  %v3672_v34 = vadd.f32 %v7406_v32, %v3671_v50  ;;  %vm3674_vm9 = vweird.f32 %v7406_v32 }
0x1234   : > { %v3733_v48 = vpack.c.bf16 %v3725_v21, %v3723_v13  ;;  %v3634_v44 = vand.u32 2147483648, %v7358_v42  ;;  %vm3644_vm10 = vweird.f32 %v7421_v43  ;;  %v3679_v5 = vand.u32 2147483648, %v7360_v46  ;;  %vm3675_vm15 = vmor %vm3673_vm13, %vm3674_vm9 }
0x1235   : > { %v3734_v35 = vpack.c.bf16 %v3726_v54, %v3724_v38  ;;  %v3642_v59 = vadd.f32 %v7421_v43, %v3641_v7  ;;  %v3661_v18 = vsel %vm7477_vm12, %v7386_v27, %v3657_v3  ;;  %v3677_v40 = vand.u32 2147483647, %v7360_v46  ;;  %vm3645_vm1 = vmor %vm3643_vm14, %vm3644_vm10  ;;  %v3493_v29 = vpop.f32.mrf.mxu3 }
0x1236   : > { %v3649_v42 = vand.u32 2147483648, %v7364_v56  ;;  %v3665_v49 = vor.u32 1.1754944e-38, %v3664_v31  ;;  %v3631_v0 = vsel %vm7486_vm11, %v7398_v20, %v3627_v15  ;;  %v3647_v27 = vand.u32 2147483647, %v7364_v56 }
0x1237   : > { %vm3663_vm0 = vcmp.eq.f32.partialorder %v3662_v36, 8.507059e+37  ;;  %v3676_v52 = vsel %vm3675_vm15, %v7406_v32, %v3672_v34  ;;  %v3635_v46 = vor.u32 1.1754944e-38, %v3634_v44  ;;  %v3680_v60 = vor.u32 1.1754944e-38, %v3679_v5 }
0x1238   : > { %v3666_v53 = vsel %vm3663_vm0, %v3665_v49, %v3661_v18  ;;  %vm3633_vm5 = vcmp.eq.f32.partialorder %v3632_v62, 8.507059e+37  ;;  %v3646_v61 = vsel %vm3645_vm1, %v7421_v43, %v3642_v59  ;;  %vm3678_vm2 = vcmp.eq.f32.partialorder %v3677_v40, 8.507059e+37 }
0x1239   : > { %v3636_v22 = vsel %vm3633_vm5, %v3635_v46, %v3631_v0  ;;  %v3650_v51 = vor.u32 1.1754944e-38, %v3649_v42  ;;  %v3681_v16 = vsel %vm3678_vm2, %v3680_v60, %v3676_v52  ;;  %vm3648_vm3 = vcmp.eq.f32.partialorder %v3647_v27, 8.507059e+37 }
0x123a   : > { %v3719_v20 = vmul.f32 %v3666_v53, %v7319_v2  ;;  %v3516_v1 = vpop.f32.mrf.mxu0  ;;  %v3717_v32 = vmul.f32 %v3636_v22, %v7303_v45  ;;  %v3720_v4 = vmul.f32 %v3681_v16, %v7328_v26 }
0x123b   : > { %v3651_v56 = vsel %vm3648_vm3, %v3650_v51, %v3646_v61 }
0x123c   : > { %v3718_v41 = vmul.f32 %v3651_v56, %v7307_v47  ;;  %v3729_v63 = vmul.f32 %v3719_v20, %v3493_v29  ;;  %v3730_v55 = vmul.f32 %v3720_v4, %v3516_v1  ;;  %v3727_v9 = vmul.f32 %v3717_v32, %v3491_v37 }
0x123e   : > { %v3728_v43 = vmul.f32 %v3718_v41, %v3514_v33  ;;  %v3735_v6 = vpack.c.bf16 %v3729_v63, %v3727_v9 }
0x1240   : > { %v3736_v21 = vpack.c.bf16 %v3730_v55, %v3728_v43 }
0x1241   : > { %3875 = vmatmul.bf16.vlgmr.msrb.gmra.mxu1 %v3733_v48  ;;  %3898 = vmatmul.bf16.vlgmr.msra.gmra.mxu2 %v3734_v35 }
0x1251   : > { %3880 = vmatmul.bf16.gmra.mxu1 %v3735_v6  ;;  %3903 = vmatmul.bf16.gmra.mxu2 %v3736_v21  ;;  %v4268_v21 = vmul.f32 -1.442695, %v7181_v23  ;;  %v5641_v23 = vld [vmem:[#allocation2 + $0x18] sm:$0xff] }
0x12ae   : > { %v3450_v30 = vpop.f32.mrf.mxu1 }
0x12af   : > { %v5126_v8 = vmul.f32 -1.442695, %v3450_v30  ;;  %v3519_v2 = vpop.f32.mrf.mxu0 }
0x12b1   : > { %5602 = vpow2.f32 %v5126_v8 }
0x12b4   : > { %v3473_v12 = vpop.f32.mrf.mxu2 }
0x12b5   : > { %v5127_v13 = vmul.f32 -1.442695, %v3473_v12  ;;  %v3496_v45 = vpop.f32.mrf.mxu3 }
0x12b6   : > { %v3452_v17 = vpop.f32.mrf.mxu1 }
0x12b7   : > { %v5603_v26 = vpop.eup %5602  ;;  %5604 = vpow2.f32 %v5127_v13  ;;  %v3521_v19 = vpop.f32.mrf.mxu0 }
0x12b8   : > { %v3561_v47 = vadd.f32 1.0, %v5603_v26 }
0x12ba   : > { %5606 = vrcp.f32 %v3561_v47  ;;  %v3694_v33 = vand.u32 2147483648, %v3561_v47  ;;  %v3692_v35 = vand.u32 2147483647, %v3561_v47  ;;  %vm3688_vm4 = vweird.f32 %v3561_v47 }
0x12bc   : > { %v3475_v50 = vpop.f32.mrf.mxu2  ;;  %v3695_v28 = vor.u32 1.1754944e-38, %v3694_v33  ;;  %vm3693_vm8 = vcmp.eq.f32.partialorder %v3692_v35, 8.507059e+37 }
0x12bd   : > { %v5605_v54 = vpop.eup %5604  ;;  %v3498_v48 = vpop.f32.mrf.mxu3 }
0x12be   : > { %v3562_v7 = vadd.f32 1.0, %v5605_v54  ;;  %v3876_v3 = vpop.f32.mrf.mxu1 }
0x12c0   : > { %v5607_v38 = vpop.eup %5606  ;;  %5608 = vrcp.f32 %v3562_v7  ;;  %v3709_v49 = vand.u32 2147483648, %v3562_v7  ;;  %v3707_v52 = vand.u32 2147483647, %v3562_v7  ;;  %vm3703_vm10 = vweird.f32 %v3562_v7 }
0x12c1   : > { %v3684_v36 = vmul.f32 %v5607_v38, %v3561_v47  ;;  %vm3689_vm7 = vweird.f32 %v5607_v38 }
0x12c2   : > { %vm3690_vm6 = vmor %vm3688_vm4, %vm3689_vm7  ;;  %vm3708_vm11 = vcmp.eq.f32.partialorder %v3707_v52, 8.507059e+37 }
0x12c3   : > { %v3685_v31 = vsub.f32 1.0, %v3684_v36 }
0x12c4   : > { %v3899_v15 = vpop.f32.mrf.mxu2 }
0x12c5   : > { %v3686_v34 = vmul.f32 %v5607_v38, %v3685_v31  ;;  %v3900_v62 = vadd.f32 %v3899_v15, %v3876_v3 }
0x12c6   : > { %v5609_v44 = vpop.eup %5608  ;;  %v3878_v59 = vpop.f32.mrf.mxu1 }
0x12c7   : > { %v3687_v37 = vadd.f32 %v5607_v38, %v3686_v34  ;;  %v3699_v39 = vmul.f32 %v5609_v44, %v3562_v7  ;;  %v3913_v5 = vadd.f32 %v3900_v62, %v7159_v10  ;;  %vm3704_vm9 = vweird.f32 %v5609_v44 }
0x12c8   : > { %vm3705_vm12 = vmor %vm3703_vm10, %vm3704_vm9  ;;  %v3710_v10 = vor.u32 1.1754944e-38, %v3709_v49 }
0x12c9   : > { %v3691_v18 = vsel %vm3690_vm6, %v5607_v38, %v3687_v37  ;;  %v3700_v40 = vsub.f32 1.0, %v3699_v39  ;;  %3918 = vst [vmem:[#allocation2 + $0x8] sm:$0xff] %v3913_v5  ;;  %v900_v37 = vld [vmem:[%s678_s27] sm:$0xff] }
0x12ca   : > { %v3696_v42 = vsel %vm3693_vm8, %v3695_v28, %v3691_v18 }
0x12cb   : > { %v3721_v0 = vmul.f32 %v3696_v42, %v3450_v30  ;;  %v3701_v27 = vmul.f32 %v5609_v44, %v3700_v40 }
0x12cc   : > { %v3901_v46 = vpop.f32.mrf.mxu2 }
0x12cd   : > { %v3702_v53 = vadd.f32 %v5609_v44, %v3701_v27  ;;  %v3731_v60 = vmul.f32 %v3721_v0, %v3496_v45  ;;  %v3902_v61 = vadd.f32 %v3901_v46, %v3878_v59 }
0x12ce   : > { %v3881_v1 = vpop.f32.mrf.mxu1 }
0x12cf   : > { %v3706_v22 = vsel %vm3705_vm12, %v5609_v44, %v3702_v53  ;;  %v3737_v51 = vpack.c.bf16 %v3731_v60, %v3731_v60  ;;  %v3914_v16 = vadd.f32 %v3902_v61, %v7167_v57  ;;  %v4267_v57 = vmul.f32 -1.442695, %v7163_v11 }
0x12d0   : > { %v3711_v20 = vsel %vm3708_vm11, %v3710_v10, %v3706_v22 }
0x12d1   : > { %v3722_v56 = vmul.f32 %v3711_v20, %v3473_v12  ;;  %3919 = vst [vmem:[#allocation2] sm:$0xff] %v3914_v16  ;;  %3885 = vmatmul.bf16.gmra.mxu1 %v3737_v51  ;;  %5610 = vpow2.f32 %v4267_v57 }
0x12d2   : > { %5612 = vpow2.f32 %v4268_v21 }
0x12d3   : > { %v3732_v32 = vmul.f32 %v3722_v56, %v3519_v2  ;;  %v4269_v2 = vmul.f32 -1.442695, %v6884_v25 }
0x12d4   : > { %v3904_v4 = vpop.f32.mrf.mxu2 }
0x12d5   : > { %v3905_v29 = vadd.f32 %v3904_v4, %v3881_v1  ;;  %v3738_v41 = vpack.c.bf16 %v3732_v32, %v3732_v32  ;;  %5614 = vpow2.f32 %v4269_v2 }
0x12d6   : > { %v3883_v55 = vpop.f32.mrf.mxu1 }
0x12d7   : > { %v3915_v63 = vadd.f32 %v3905_v29, %v7185_v24  ;;  %3908 = vmatmul.bf16.gmra.mxu2 %v3738_v41  ;;  %v5611_v30 = vpop.eup %5610 }
0x12d8   : > { %v5613_v8 = vpop.eup %5612  ;;  %v863_v12 = vadd.f32 1.0, %v5611_v30 }
0x12d9   : > { %3920 = vst [vmem:[#allocation2 + $0x20] sm:$0xff] %v3915_v63  ;;  %v884_v24 = vadd.f32 1.0, %v5613_v8 }
0x12da   : > { %5616 = vrcp.f32 %v863_v12  ;;  %v875_v54 = vand.u32 2147483648, %v863_v12  ;;  %vm869_vm13 = vweird.f32 %v863_v12  ;;  %v873_v3 = vand.u32 2147483647, %v863_v12 }
0x12db   : > { %5618 = vrcp.f32 %v884_v24  ;;  %v5615_v13 = vpop.eup %5614  ;;  %v896_v48 = vand.u32 2147483648, %v884_v24  ;;  %vm890_vm0 = vweird.f32 %v884_v24  ;;  %v894_v34 = vand.u32 2147483647, %v884_v24 }
0x12dc   : > { %v3906_v9 = vpop.f32.mrf.mxu2  ;;  %v7519_v17 = vadd.f32 1.0, %v5615_v13  ;;  %5620 = vtanh.f32 %v5641_v23  ;;  %v876_v36 = vor.u32 1.1754944e-38, %v875_v54  ;;  %vm874_vm5 = vcmp.eq.f32.partialorder %v873_v3, 8.507059e+37 }
0x12dd   : > { %v3907_v43 = vadd.f32 %v3906_v9, %v3883_v55  ;;  %v897_v35 = vor.u32 1.1754944e-38, %v896_v48  ;;  %vm895_vm3 = vcmp.eq.f32.partialorder %v894_v34, 8.507059e+37 }
0x12de   : > { %5622 = vrcp.f32 %v7519_v17  ;;  %v919_v49 = vand.u32 2147483648, %v7519_v17 }
0x12df   : > { %v3916_v6 = vadd.f32 %v3907_v43, %v7172_v58 }
0x12e0   : > { %v5617_v45 = vpop.eup %5616 }
0x12e1   : > { %3921 = vst [vmem:[#allocation2 + $0x10] sm:$0xff] %v3916_v6  ;;  %v5619_v58 = vpop.eup %5618  ;;  %v865_v11 = vmul.f32 %v5617_v45, %v863_v12  ;;  %vm870_vm14 = vweird.f32 %v5617_v45 }
0x12e2   : > { %v886_v26 = vmul.f32 %v5619_v58, %v884_v24  ;;  %v5621_v38 = vpop.eup %5620  ;;  %vm871_vm15 = vmor %vm869_vm13, %vm870_vm14  ;;  %vm891_vm1 = vweird.f32 %v5619_v58 }
0x12e3   : > { %v866_v19 = vsub.f32 1.0, %v865_v11  ;;  %vm892_vm2 = vmor %vm890_vm0, %vm891_vm1 }
0x12e4   : > { %v887_v47 = vsub.f32 1.0, %v886_v26  ;;  %v5623_v33 = vpop.eup %5622 }
0x12e5   : > { %v867_v25 = vmul.f32 %v5617_v45, %v866_v19  ;;  %v909_v28 = vmul.f32 %v5623_v33, %v7519_v17 }
0x12e6   : > { %v888_v50 = vmul.f32 %v5619_v58, %v887_v47 }
0x12e7   : > { %v868_v7 = vadd.f32 %v5617_v45, %v867_v25  ;;  %v910_v18 = vsub.f32 1.0, %v909_v28 }
0x12e8   : > { %v889_v31 = vadd.f32 %v5619_v58, %v888_v50 }
0x12e9   : > { %v872_v15 = vsel %vm871_vm15, %v5617_v45, %v868_v7  ;;  %v911_v42 = vmul.f32 %v5623_v33, %v910_v18 }
0x12ea   : > { %v877_v62 = vsel %vm874_vm5, %v876_v36, %v872_v15  ;;  %v893_v44 = vsel %vm892_vm2, %v5619_v58, %v889_v31 }
0x12eb   : > { %v880_v39 = vmul.f32 %v5621_v38, %v877_v62  ;;  %v898_v5 = vsel %vm895_vm3, %v897_v35, %v893_v44 }
0x12ec   : > { %v901_v59 = vmul.f32 %v900_v37, %v898_v5 }
0x12ee   : > { %v902_v40 = vadd.f32 %v901_v59, %v880_v39 }
0x12f0   : > { %903 = vst [vmem:[%s833_s18] sm:$0xff] %v902_v40  ;;  %5624 = vtanh.f32 %v902_v40  ;;  %s5932_s18 = scalar_lea.hbm %s7696_s7, 256 }
0x12f1   : > { %p5934_p13 = scmp.lt.s32.totalorder %s5932_s18, %s5928_s17 }
0x12f3   : > { %p5935_p3 = por %p5934_p13, %p5933_p2 }
0x12f5   : > { %p5936_p4 = pnand %p5935_p3, %p5931_p0 }
0x12f7   : > { %5939 = shalt.err (!%p5936_p4)
}
0x12f8   : > { %5418 = dma.vmem_to_hbm [thread:$0]  (%p6165_p10), %s3942_s22, 128, %s3944_s3, %s3924_s8   ;;  %v912_v0 = vadd.f32 %v5623_v33, %v911_v42  ;;  %vm913_vm7 = vweird.f32 %v7519_v17  ;;  %vm914_vm4 = vweird.f32 %v5623_v33  ;;  %v917_v27 = vand.u32 2147483647, %v7519_v17  ;;  %v5625_v60 = vpop.eup %5624 }
0x12f9   : > { %vm915_vm6 = vmor %vm913_vm7, %vm914_vm4  ;;  %v920_v52 = vor.u32 1.1754944e-38, %v919_v49  ;;  %s7699_s29 = scalar_lea.vmem [#allocation19], %s6383_s0  ;;  %s3957_s27 = sshll.u32 %s7541_s30, 4  ;;  %s3958_s27 = int_to_ptr.hbm [resolvable:$true] %s3957_s27 }
0x12fa   : > { %v916_v46 = vsel %vm915_vm6, %v5623_v33, %v912_v0  ;;  %vm918_vm8 = vcmp.eq.f32.partialorder %v917_v27, 8.507059e+37  ;;  %s3955_s5 = sshll.u32 %s7699_s29, 4  ;;  %s7700_s22 = smov %s7699_s29  ;;  %s3956_s5 = int_to_ptr.vmem [resolvable:$true] %s3955_s5 }
0x12fb   : > { %v921_v53 = vsel %vm918_vm8, %v920_v52, %v916_v46  ;;  %s3929_s3 = scalar_lea.sflag [#allocation20], %s6380_s16  ;;  %s5954_s24 = sshra.s32 %s3958_s27, 4  ;;  %s5955_s24 = int_to_ptr.hbm [resolvable:$true] %s5954_s24 }
0x12fc   : > { %v924_v61 = vmul.f32 %v5625_v60, %v921_v53  ;;  %s5956_s8 = scalar_lea.hbm %s5955_s24, 8  ;;  %s5960_s2 = scalar_lea.hbm %s7698_s1, 256 }
0x12fd   : > { %p5957_p5 = scmp.ne.s32.totalorder %s5955_s24, %s5956_s8  ;;  %p5961_p9 = scmp.lt.s32.totalorder %s5955_s24, %s7698_s1 }
0x12fe   : > { %925 = vst [vmem:[%s7700_s22] sm:$0xff] %v924_v61  ;;  %p5962_p12 = scmp.lt.s32.totalorder %s5960_s2, %s5956_s8 }
0x12ff   : > { %p5958_p7 = pnand %p5957_p5, %p6165_p10 }
0x1300   : > { %p5963_p6 = por %p5962_p12, %p5961_p9 }
0x1301   : > { %p5959_p8 = pneg %p5958_p7 }
0x1303   : > { %p5964_p1 = pnand %p5963_p6, %p5959_p8 }
0x1305   : > { %5967 = shalt.err (!%p5964_p1)
}
0x1306   : > { %5419 = dma.vmem_to_hbm [thread:$0]  (%p6165_p10), %s3956_s5, 128, %s3958_s27, %s3929_s3  }
0x134e   : > { %v3886_v10 = vpop.f32.mrf.mxu1 }
0x1356   : > { %v3888_v22 = vpop.f32.mrf.mxu1 }
0x135a   : > { %v3909_v51 = vpop.f32.mrf.mxu2 }
0x135b   : > { %v3910_v16 = vadd.f32 %v3909_v51, %v3886_v10 }
0x135d   : > { %v3917_v20 = vadd.f32 %v3910_v16, %v7283_v14 }
0x135f   : > { %3922 = vst [vmem:[#allocation2 + $0x18] sm:$0xff] %v3917_v20 }
0x1362   : > { %v3911_v56 = vpop.f32.mrf.mxu2 }
0x1363 PF: > { %s7701_s16 = sld [smem:[#allocation28_spill]]  ;;  %p5458_p0 = scmp.ge.s32.totalorder %s6026_s21, 2 }
0x1365   : > { %p5451_p2 = pnand %p5458_p0, %p6169_p11 }
0x1367   : > { %p5452_p13 = pneg %p5451_p2 }
0x1369   : > { %s3969_s18 = sand.u32 1, %s7701_s16  }
0x136a   : > { %s3970_s15 = scalar_lea.sflag [#allocation5], %s3969_s18 }
0x136b   : > { %6005 = dma.done.wait (%p5452_p13), %s3970_s15, 128  }
0x136c   : > { %6007 = vsyncadd (%p5452_p13), %s3970_s15, 4294967168  ;;  %s3980_s28 = scalar_lea.sflag [#allocation20], %s3969_s18 }
0x136d   : > { %6009 = dma.done.wait (%p5452_p13), %s3980_s28, 128  }
0x136e   : > { %6011 = vsyncadd (%p5452_p13), %s3980_s28, 4294967168  ;;  %s7703_s21 = sld [smem:[#allocation31_spill]]  ;;  %s7706_s18 = smov %s6018_s19 }
0x136f   : > { %s7704_s20 = sld [smem:[#allocation29_spill]] }
0x1370   : > { %s7705_s29 = sld [smem:[#allocation32_spill]] }
0x1374   : > { %p44_p10 = scmp.ge.s32.totalorder %s7703_s21, 34  }
0x1375   : > { %s7707_s19 = smov %s7704_s20 }
0x1376   : > { %s7708_s20 = smov %s7705_s29  ;;  %46 = sbr.rel (!%p44_p10) target bundleno = 27 (0x1b), region = 241 }
0x137b   :  { %3986 = vsyncpa [#allocation4], 1 }
0x137c   :  { %3988 = vsyncpa [#allocation4 + $0x1], 1 }
0x137d   :  { %3989 = vsyncpa [#allocation7], 1 }
0x137e   :  { %3991 = vsyncpa [#allocation7 + $0x1], 1 }
0x137f   :  { %3992 = vsyncpa [#allocation10], 1 }
0x1380   :  { %3994 = vsyncpa [#allocation10 + $0x1], 1 }
0x1381   :  { %3995 = vsyncpa [#allocation13], 1 }
0x1382   :  { %3997 = vsyncpa [#allocation13 + $0x1], 1 }
0x1383   :  { %3998 = vsyncpa [#allocation16], 1 }
0x1384   :  { %4000 = vsyncpa [#allocation16 + $0x1], 1 }
0x1385   :  { %4001 = vsyncpa [#allocation5], 1 }
0x1386   :  { %4003 = vsyncpa [#allocation5 + $0x1], 1 }
0x1387   :  { %4004 = vsyncpa [#allocation20], 1 }
0x1388   :  { %4006 = vsyncpa [#allocation20 + $0x1], 1 }

</bundles_post_ra>
